<compile_context>
chip_gen: v5e
topology: v5e:2x2
jax: 0.10.0
libtpu: 0.0.40
codegen_flags: <defaults>
</compile_context>

<pallas_src>
import math
import functools

import jax
import jax.numpy as jnp
from jax import lax
from jax.experimental import pallas as pl
from jax.experimental.pallas import tpu as pltpu

LN_EPS = 1e-5          # torch.nn.LayerNorm default
N_CHUNKS = 3           # .chunk(3, -1) hard-coded in MultiheadAttention.forward


# --------------------------------------------------------------------------
# Fused kernel: MHA + residual -> LN1 -> FFN -> residual -> LN2
# --------------------------------------------------------------------------
def _fused_self_attention_kernel(
        x_ref, wq_ref, bq_ref, wk_ref, bk_ref, wv_ref, bv_ref, wo_ref, bo_ref,
        ln1w_ref, ln1b_ref, w1_ref, b1_ref, w2_ref, b2_ref, ln2w_ref, ln2b_ref,
        o_ref, *, scale, n_chunks):
    T, D, F = x_ref.shape
    fc = F // n_chunks
    inv_scale = 1.0 / scale
    norm_count = float(D * F)

    # Hoist all weight loads (everything is tiny and lives in VMEM).
    x = x_ref[...]                                      # (T, D, F)
    wq, bq = wq_ref[...], bq_ref[...]
    wk, bk = wk_ref[...], bk_ref[...]
    wv, bv = wv_ref[...], bv_ref[...]
    wo, bo = wo_ref[...], bo_ref[...]
    ln1w, ln1b = ln1w_ref[...], ln1b_ref[...]
    w1, b1 = w1_ref[...], b1_ref[...]
    w2, b2 = w2_ref[...], b2_ref[...]
    ln2w, ln2b = ln2w_ref[...], ln2b_ref[...]

    # ---- stage 1: per-batch-element multihead attention + residual --------
    h1 = []                                             # list of (T, F), one per d
    for d in range(D):
        xd = x[:, d, :]                                 # (T, F)
        q = jnp.dot(xd, wq, preferred_element_type=jnp.float32) + bq
        k = jnp.dot(xd, wk, preferred_element_type=jnp.float32) + bk
        v = jnp.dot(xd, wv, preferred_element_type=jnp.float32) + bv

        acc = jnp.zeros((T, F), jnp.float32)
        for h in range(n_chunks):
            lo, hi = h * fc, (h + 1) * fc               # sublane-aligned for fc=8
            qh, kh, vh = q[:, lo:hi], k[:, lo:hi], v[:, lo:hi]
            # scores = qh @ kh^T / scale  -> (T, T)
            s = lax.dot_general(qh, kh, (((1,), (1,)), ((), ())),
                                preferred_element_type=jnp.float32) * inv_scale
            s = s - jnp.max(s, axis=-1, keepdims=True)
            e = jnp.exp(s)
            p = e * pl.reciprocal(jnp.sum(e, axis=-1, keepdims=True), approx=True)
            head = jnp.dot(p, vh, preferred_element_type=jnp.float32)      # (T, fc)
            # per-head accumulate against the matching rows of W_o (no concat)
            acc = acc + jnp.dot(head, wo[lo:hi, :],
                                preferred_element_type=jnp.float32)
        h1.append(xd + acc + bo)                        # residual; LN applied below

    # ---- LayerNorm 1: per time step over the (D, F) slab -------------------
    mu1 = sum(jnp.sum(hd, axis=-1, keepdims=True) for hd in h1) / norm_count   # (T, 1)
    var1 = sum(jnp.sum((hd - mu1) ** 2, axis=-1, keepdims=True)
               for hd in h1) / norm_count                                       # (T, 1)
    inv1 = lax.rsqrt(var1 + LN_EPS)
    hn = [(h1[d] - mu1) * inv1 * ln1w[d:d + 1, :] + ln1b[d:d + 1, :]
          for d in range(D)]                            # list of (T, F)

    # ---- stage 2: position-wise FFN + residual ------------------------------
    h2 = []
    for d in range(D):
        t = jnp.dot(hn[d], w1, preferred_element_type=jnp.float32) + b1
        t = jnp.maximum(t, 0.0)                         # ReLU
        ff = jnp.dot(t, w2, preferred_element_type=jnp.float32) + b2
        # dropout after w2 is identity in eval mode.
        h2.append(hn[d] + ff)

    # ---- LayerNorm 2 --------------------------------------------------------
    mu2 = sum(jnp.sum(hd, axis=-1, keepdims=True) for hd in h2) / norm_count
    var2 = sum(jnp.sum((hd - mu2) ** 2, axis=-1, keepdims=True)
               for hd in h2) / norm_count
    inv2 = lax.rsqrt(var2 + LN_EPS)
    out = [(h2[d] - mu2) * inv2 * ln2w[d:d + 1, :] + ln2b[d:d + 1, :]
           for d in range(D)]

    # single full store of the assembled (T, D, F) result
    o_ref[...] = jnp.stack(out, axis=1)


# --------------------------------------------------------------------------
# Wrapper
# --------------------------------------------------------------------------
def self_attention_forward(x, params, n_head):
    """x: (T, D, F) float32.  Returns (T, D, F)."""
    T, D, F = x.shape
    assert F % N_CHUNKS == 0, "n_feature must be divisible by 3 (torch .chunk(3,-1))"
    scale = math.sqrt(F // n_head)

    kernel = functools.partial(_fused_self_attention_kernel,
                               scale=scale, n_chunks=N_CHUNKS)
    args = (x,
            params["wq"], params["bq"], params["wk"], params["bk"],
            params["wv"], params["bv"], params["wo"], params["bo"],
            params["ln1_w"], params["ln1_b"],
            params["w1"], params["b1"], params["w2"], params["b2"],
            params["ln2_w"], params["ln2_b"])

    # Single program (no grid): every operand is placed whole in VMEM.
    return pl.pallas_call(
        kernel,
        out_shape=jax.ShapeDtypeStruct((T, D, F), jnp.float32),
        in_specs=[pl.BlockSpec(memory_space=pltpu.MemorySpace.VMEM)
                  for _ in range(len(args))],
        out_specs=pl.BlockSpec(memory_space=pltpu.MemorySpace.VMEM),
    )(*args)


# --------------------------------------------------------------------------
# Deterministic parameter init (weights stored as (in, out), biases as (1, out))
# --------------------------------------------------------------------------
def init_params(key, F, H, D):
    keys = jax.random.split(key, 12)

    def lin(kw, kb, fan_in, fan_out):
        bound = 1.0 / math.sqrt(fan_in)
        w = jax.random.uniform(kw, (fan_in, fan_out), jnp.float32, -bound, bound)
        b = jax.random.uniform(kb, (1, fan_out), jnp.float32, -bound, bound)
        return w, b

    wq, bq = lin(keys[0], keys[1], F, F)
    wk, bk = lin(keys[2], keys[3], F, F)
    wv, bv = lin(keys[4], keys[5], F, F)
    wo, bo = lin(keys[6], keys[7], F, F)
    w1, b1 = lin(keys[8], keys[9], F, H)
    w2, b2 = lin(keys[10], keys[11], H, F)
    return dict(
        wq=wq, bq=bq, wk=wk, bk=bk, wv=wv, bv=bv, wo=wo, bo=bo,
        ln1_w=jnp.ones((D, F), jnp.float32), ln1_b=jnp.zeros((D, F), jnp.float32),
        w1=w1, b1=b1, w2=w2, b2=b2,
        ln2_w=jnp.ones((D, F), jnp.float32), ln2_b=jnp.zeros((D, F), jnp.float32),
    )


# --------------------------------------------------------------------------
# Pure-JAX reference (mirrors the PyTorch forward, eval mode)
# --------------------------------------------------------------------------
def reference_forward(x, params, n_head):
    T, D, F = x.shape
    scale = math.sqrt(F // n_head)

    def linear(z, w, b):
        return z @ w + b

    q = linear(x, params["wq"], params["bq"])
    k = linear(x, params["wk"], params["bk"])
    v = linear(x, params["wv"], params["bv"])
    fc = F // N_CHUNKS
    heads = []
    for h in range(N_CHUNKS):
        qh = q[..., h * fc:(h + 1) * fc]
        kh = k[..., h * fc:(h + 1) * fc]
        vh = v[..., h * fc:(h + 1) * fc]
        s = jnp.einsum('tdf,sdf->dts', qh, kh) / scale
        p = jax.nn.softmax(s, axis=-1)
        heads.append(jnp.einsum('dts,sdf->tdf', p, vh))
    mha = linear(jnp.concatenate(heads, -1), params["wo"], params["bo"])
    h1 = x + mha

    def ln(z, w, b):
        mu = jnp.mean(z, axis=(1, 2), keepdims=True)
        var = jnp.mean((z - mu) ** 2, axis=(1, 2), keepdims=True)
        return (z - mu) / jnp.sqrt(var + LN_EPS) * w + b

    h1n = ln(h1, params["ln1_w"], params["ln1_b"])
    t = jax.nn.relu(linear(h1n, params["w1"], params["b1"]))
    ff = linear(t, params["w2"], params["b2"])
    h2 = h1n + ff
    return ln(h2, params["ln2_w"], params["ln2_b"])


if __name__ == "__main__":
    # SelfAttention(D=4, n_feature=24, n_head=3, n_hidden=32), seq_len T=8
    T, D, F, H, n_head = 8, 4, 24, 32, 3
    key = jax.random.PRNGKey(0)
    kx, kp = jax.random.split(key)
    x = jax.random.normal(kx, (T, D, F), jnp.float32)
    params = init_params(kp, F, H, D)

    out = self_attention_forward(x, params, n_head)
    out = jax.block_until_ready(out)

    ref = reference_forward(x, params, n_head)
    assert out.shape == (T, D, F)
    max_err = float(jnp.max(jnp.abs(out - ref)))
    # tolerance 2e-3: pl.reciprocal(approx=True) in the softmax denominator
    assert max_err < 2e-3, f"mismatch vs reference: max_err={max_err}"
    print("KERNEL_OK")
</pallas_src>

<mosaic_0001>
module attributes {stable_mosaic.version = 11 : i64} {
  func.func @_fused_self_attention_kernel(%arg0: memref<8x4x24xf32, #tpu.memory_space<vmem>>, %arg1: memref<24x24xf32, #tpu.memory_space<vmem>>, %arg2: memref<1x24xf32, #tpu.memory_space<vmem>>, %arg3: memref<24x24xf32, #tpu.memory_space<vmem>>, %arg4: memref<1x24xf32, #tpu.memory_space<vmem>>, %arg5: memref<24x24xf32, #tpu.memory_space<vmem>>, %arg6: memref<1x24xf32, #tpu.memory_space<vmem>>, %arg7: memref<24x24xf32, #tpu.memory_space<vmem>>, %arg8: memref<1x24xf32, #tpu.memory_space<vmem>>, %arg9: memref<4x24xf32, #tpu.memory_space<vmem>>, %arg10: memref<4x24xf32, #tpu.memory_space<vmem>>, %arg11: memref<24x32xf32, #tpu.memory_space<vmem>>, %arg12: memref<1x32xf32, #tpu.memory_space<vmem>>, %arg13: memref<32x24xf32, #tpu.memory_space<vmem>>, %arg14: memref<1x24xf32, #tpu.memory_space<vmem>>, %arg15: memref<4x24xf32, #tpu.memory_space<vmem>>, %arg16: memref<4x24xf32, #tpu.memory_space<vmem>>, %arg17: memref<8x4x24xf32, #tpu.memory_space<vmem>>) attributes {dimension_semantics = [], scalar_prefetch = 0 : i64, scratch_operands = 0 : i64, tpu.core_type = #tpu.core_type<tc>} {
    %c0 = arith.constant 0 : index
    %c0_0 = arith.constant 0 : index
    %c0_1 = arith.constant 0 : index
    %0 = vector.load %arg0[%c0, %c0_0, %c0_1] : memref<8x4x24xf32, #tpu.memory_space<vmem>>, vector<8x4x24xf32>
    %c0_2 = arith.constant 0 : index
    %c0_3 = arith.constant 0 : index
    %1 = vector.load %arg1[%c0_2, %c0_3] : memref<24x24xf32, #tpu.memory_space<vmem>>, vector<24x24xf32>
    %c0_4 = arith.constant 0 : index
    %c0_5 = arith.constant 0 : index
    %2 = vector.load %arg2[%c0_4, %c0_5] : memref<1x24xf32, #tpu.memory_space<vmem>>, vector<1x24xf32>
    %c0_6 = arith.constant 0 : index
    %c0_7 = arith.constant 0 : index
    %3 = vector.load %arg3[%c0_6, %c0_7] : memref<24x24xf32, #tpu.memory_space<vmem>>, vector<24x24xf32>
    %c0_8 = arith.constant 0 : index
    %c0_9 = arith.constant 0 : index
    %4 = vector.load %arg4[%c0_8, %c0_9] : memref<1x24xf32, #tpu.memory_space<vmem>>, vector<1x24xf32>
    %c0_10 = arith.constant 0 : index
    %c0_11 = arith.constant 0 : index
    %5 = vector.load %arg5[%c0_10, %c0_11] : memref<24x24xf32, #tpu.memory_space<vmem>>, vector<24x24xf32>
    %c0_12 = arith.constant 0 : index
    %c0_13 = arith.constant 0 : index
    %6 = vector.load %arg6[%c0_12, %c0_13] : memref<1x24xf32, #tpu.memory_space<vmem>>, vector<1x24xf32>
    %c0_14 = arith.constant 0 : index
    %c0_15 = arith.constant 0 : index
    %7 = vector.load %arg7[%c0_14, %c0_15] : memref<24x24xf32, #tpu.memory_space<vmem>>, vector<24x24xf32>
    %c0_16 = arith.constant 0 : index
    %c0_17 = arith.constant 0 : index
    %8 = vector.load %arg8[%c0_16, %c0_17] : memref<1x24xf32, #tpu.memory_space<vmem>>, vector<1x24xf32>
    %c0_18 = arith.constant 0 : index
    %c0_19 = arith.constant 0 : index
    %9 = vector.load %arg9[%c0_18, %c0_19] : memref<4x24xf32, #tpu.memory_space<vmem>>, vector<4x24xf32>
    %c0_20 = arith.constant 0 : index
    %c0_21 = arith.constant 0 : index
    %10 = vector.load %arg10[%c0_20, %c0_21] : memref<4x24xf32, #tpu.memory_space<vmem>>, vector<4x24xf32>
    %c0_22 = arith.constant 0 : index
    %c0_23 = arith.constant 0 : index
    %11 = vector.load %arg11[%c0_22, %c0_23] : memref<24x32xf32, #tpu.memory_space<vmem>>, vector<24x32xf32>
    %c0_24 = arith.constant 0 : index
    %c0_25 = arith.constant 0 : index
    %12 = vector.load %arg12[%c0_24, %c0_25] : memref<1x32xf32, #tpu.memory_space<vmem>>, vector<1x32xf32>
    %c0_26 = arith.constant 0 : index
    %c0_27 = arith.constant 0 : index
    %13 = vector.load %arg13[%c0_26, %c0_27] : memref<32x24xf32, #tpu.memory_space<vmem>>, vector<32x24xf32>
    %c0_28 = arith.constant 0 : index
    %c0_29 = arith.constant 0 : index
    %14 = vector.load %arg14[%c0_28, %c0_29] : memref<1x24xf32, #tpu.memory_space<vmem>>, vector<1x24xf32>
    %c0_30 = arith.constant 0 : index
    %c0_31 = arith.constant 0 : index
    %15 = vector.load %arg15[%c0_30, %c0_31] : memref<4x24xf32, #tpu.memory_space<vmem>>, vector<4x24xf32>
    %c0_32 = arith.constant 0 : index
    %c0_33 = arith.constant 0 : index
    %16 = vector.load %arg16[%c0_32, %c0_33] : memref<4x24xf32, #tpu.memory_space<vmem>>, vector<4x24xf32>
    %17 = vector.extract_strided_slice %0 {offsets = [0, 0, 0], sizes = [8, 1, 24], strides = [1, 1, 1]} : vector<8x4x24xf32> to vector<8x1x24xf32>
    %18 = vector.shape_cast %17 : vector<8x1x24xf32> to vector<8x24xf32>
    %cst = arith.constant dense<0.000000e+00> : vector<8x24xf32>
    %19 = tpu.matmul %18, %1, %cst {dimension_numbers = #tpu.dot_dimension_numbers<[1], [0], [0], [1], [0, 0, 1, 1], [], []>} : vector<8x24xf32>, vector<24x24xf32>, vector<8x24xf32> -> vector<8x24xf32>
    %20 = vector.broadcast %2 : vector<1x24xf32> to vector<8x24xf32>
    %21 = arith.addf %19, %20 : vector<8x24xf32>
    %cst_34 = arith.constant dense<0.000000e+00> : vector<8x24xf32>
    %22 = tpu.matmul %18, %3, %cst_34 {dimension_numbers = #tpu.dot_dimension_numbers<[1], [0], [0], [1], [0, 0, 1, 1], [], []>} : vector<8x24xf32>, vector<24x24xf32>, vector<8x24xf32> -> vector<8x24xf32>
    %23 = vector.broadcast %4 : vector<1x24xf32> to vector<8x24xf32>
    %24 = arith.addf %22, %23 : vector<8x24xf32>
    %cst_35 = arith.constant dense<0.000000e+00> : vector<8x24xf32>
    %25 = tpu.matmul %18, %5, %cst_35 {dimension_numbers = #tpu.dot_dimension_numbers<[1], [0], [0], [1], [0, 0, 1, 1], [], []>} : vector<8x24xf32>, vector<24x24xf32>, vector<8x24xf32> -> vector<8x24xf32>
    %26 = vector.broadcast %6 : vector<1x24xf32> to vector<8x24xf32>
    %27 = arith.addf %25, %26 : vector<8x24xf32>
    %cst_36 = arith.constant 0.000000e+00 : f32
    %28 = vector.broadcast %cst_36 : f32 to vector<8x24xf32>
    %29 = vector.extract_strided_slice %21 {offsets = [0, 0], sizes = [8, 8], strides = [1, 1]} : vector<8x24xf32> to vector<8x8xf32>
    %30 = vector.extract_strided_slice %24 {offsets = [0, 0], sizes = [8, 8], strides = [1, 1]} : vector<8x24xf32> to vector<8x8xf32>
    %31 = vector.extract_strided_slice %27 {offsets = [0, 0], sizes = [8, 8], strides = [1, 1]} : vector<8x24xf32> to vector<8x8xf32>
    %cst_37 = arith.constant dense<0.000000e+00> : vector<8x8xf32>
    %32 = tpu.matmul %29, %30, %cst_37 {dimension_numbers = #tpu.dot_dimension_numbers<[1], [1], [0], [0], [0, 0, 1, 0], [], []>} : vector<8x8xf32>, vector<8x8xf32>, vector<8x8xf32> -> vector<8x8xf32>
    %cst_38 = arith.constant 0.353553385 : f32
    %33 = vector.broadcast %cst_38 : f32 to vector<8x8xf32>
    %34 = arith.mulf %32, %33 : vector<8x8xf32>
    %cst_39 = arith.constant dense<0xFF800000> : vector<8xf32>
    %35 = vector.multi_reduction <maximumf>, %34, %cst_39 [1] : vector<8x8xf32> to vector<8xf32>
    %36 = vector.shape_cast %35 : vector<8xf32> to vector<8x1xf32>
    %37 = vector.broadcast %36 : vector<8x1xf32> to vector<8x8xf32>
    %38 = arith.subf %34, %37 : vector<8x8xf32>
    %39 = math.exp %38 : vector<8x8xf32>
    %cst_40 = arith.constant dense<0.000000e+00> : vector<8xf32>
    %40 = vector.multi_reduction <add>, %39, %cst_40 [1] : vector<8x8xf32> to vector<8xf32>
    %41 = vector.shape_cast %40 : vector<8xf32> to vector<8x1xf32>
    %42 = tpu.reciprocal %41 {approx = true} : vector<8x1xf32> -> vector<8x1xf32>
    %43 = vector.broadcast %42 : vector<8x1xf32> to vector<8x8xf32>
    %44 = arith.mulf %39, %43 : vector<8x8xf32>
    %cst_41 = arith.constant dense<0.000000e+00> : vector<8x8xf32>
    %45 = tpu.matmul %44, %31, %cst_41 {dimension_numbers = #tpu.dot_dimension_numbers<[1], [0], [0], [1], [0, 0, 1, 1], [], []>} : vector<8x8xf32>, vector<8x8xf32>, vector<8x8xf32> -> vector<8x8xf32>
    %46 = vector.extract_strided_slice %7 {offsets = [0, 0], sizes = [8, 24], strides = [1, 1]} : vector<24x24xf32> to vector<8x24xf32>
    %cst_42 = arith.constant dense<0.000000e+00> : vector<8x24xf32>
    %47 = tpu.matmul %45, %46, %cst_42 {dimension_numbers = #tpu.dot_dimension_numbers<[1], [0], [0], [1], [0, 0, 1, 1], [], []>} : vector<8x8xf32>, vector<8x24xf32>, vector<8x24xf32> -> vector<8x24xf32>
    %48 = arith.addf %28, %47 : vector<8x24xf32>
    %49 = vector.extract_strided_slice %21 {offsets = [0, 8], sizes = [8, 8], strides = [1, 1]} : vector<8x24xf32> to vector<8x8xf32>
    %50 = vector.extract_strided_slice %24 {offsets = [0, 8], sizes = [8, 8], strides = [1, 1]} : vector<8x24xf32> to vector<8x8xf32>
    %51 = vector.extract_strided_slice %27 {offsets = [0, 8], sizes = [8, 8], strides = [1, 1]} : vector<8x24xf32> to vector<8x8xf32>
    %cst_43 = arith.constant dense<0.000000e+00> : vector<8x8xf32>
    %52 = tpu.matmul %49, %50, %cst_43 {dimension_numbers = #tpu.dot_dimension_numbers<[1], [1], [0], [0], [0, 0, 1, 0], [], []>} : vector<8x8xf32>, vector<8x8xf32>, vector<8x8xf32> -> vector<8x8xf32>
    %cst_44 = arith.constant 0.353553385 : f32
    %53 = vector.broadcast %cst_44 : f32 to vector<8x8xf32>
    %54 = arith.mulf %52, %53 : vector<8x8xf32>
    %cst_45 = arith.constant dense<0xFF800000> : vector<8xf32>
    %55 = vector.multi_reduction <maximumf>, %54, %cst_45 [1] : vector<8x8xf32> to vector<8xf32>
    %56 = vector.shape_cast %55 : vector<8xf32> to vector<8x1xf32>
    %57 = vector.broadcast %56 : vector<8x1xf32> to vector<8x8xf32>
    %58 = arith.subf %54, %57 : vector<8x8xf32>
    %59 = math.exp %58 : vector<8x8xf32>
    %cst_46 = arith.constant dense<0.000000e+00> : vector<8xf32>
    %60 = vector.multi_reduction <add>, %59, %cst_46 [1] : vector<8x8xf32> to vector<8xf32>
    %61 = vector.shape_cast %60 : vector<8xf32> to vector<8x1xf32>
    %62 = tpu.reciprocal %61 {approx = true} : vector<8x1xf32> -> vector<8x1xf32>
    %63 = vector.broadcast %62 : vector<8x1xf32> to vector<8x8xf32>
    %64 = arith.mulf %59, %63 : vector<8x8xf32>
    %cst_47 = arith.constant dense<0.000000e+00> : vector<8x8xf32>
    %65 = tpu.matmul %64, %51, %cst_47 {dimension_numbers = #tpu.dot_dimension_numbers<[1], [0], [0], [1], [0, 0, 1, 1], [], []>} : vector<8x8xf32>, vector<8x8xf32>, vector<8x8xf32> -> vector<8x8xf32>
    %66 = vector.extract_strided_slice %7 {offsets = [8, 0], sizes = [8, 24], strides = [1, 1]} : vector<24x24xf32> to vector<8x24xf32>
    %cst_48 = arith.constant dense<0.000000e+00> : vector<8x24xf32>
    %67 = tpu.matmul %65, %66, %cst_48 {dimension_numbers = #tpu.dot_dimension_numbers<[1], [0], [0], [1], [0, 0, 1, 1], [], []>} : vector<8x8xf32>, vector<8x24xf32>, vector<8x24xf32> -> vector<8x24xf32>
    %68 = arith.addf %48, %67 : vector<8x24xf32>
    %69 = vector.extract_strided_slice %21 {offsets = [0, 16], sizes = [8, 8], strides = [1, 1]} : vector<8x24xf32> to vector<8x8xf32>
    %70 = vector.extract_strided_slice %24 {offsets = [0, 16], sizes = [8, 8], strides = [1, 1]} : vector<8x24xf32> to vector<8x8xf32>
    %71 = vector.extract_strided_slice %27 {offsets = [0, 16], sizes = [8, 8], strides = [1, 1]} : vector<8x24xf32> to vector<8x8xf32>
    %cst_49 = arith.constant dense<0.000000e+00> : vector<8x8xf32>
    %72 = tpu.matmul %69, %70, %cst_49 {dimension_numbers = #tpu.dot_dimension_numbers<[1], [1], [0], [0], [0, 0, 1, 0], [], []>} : vector<8x8xf32>, vector<8x8xf32>, vector<8x8xf32> -> vector<8x8xf32>
    %cst_50 = arith.constant 0.353553385 : f32
    %73 = vector.broadcast %cst_50 : f32 to vector<8x8xf32>
    %74 = arith.mulf %72, %73 : vector<8x8xf32>
    %cst_51 = arith.constant dense<0xFF800000> : vector<8xf32>
    %75 = vector.multi_reduction <maximumf>, %74, %cst_51 [1] : vector<8x8xf32> to vector<8xf32>
    %76 = vector.shape_cast %75 : vector<8xf32> to vector<8x1xf32>
    %77 = vector.broadcast %76 : vector<8x1xf32> to vector<8x8xf32>
    %78 = arith.subf %74, %77 : vector<8x8xf32>
    %79 = math.exp %78 : vector<8x8xf32>
    %cst_52 = arith.constant dense<0.000000e+00> : vector<8xf32>
    %80 = vector.multi_reduction <add>, %79, %cst_52 [1] : vector<8x8xf32> to vector<8xf32>
    %81 = vector.shape_cast %80 : vector<8xf32> to vector<8x1xf32>
    %82 = tpu.reciprocal %81 {approx = true} : vector<8x1xf32> -> vector<8x1xf32>
    %83 = vector.broadcast %82 : vector<8x1xf32> to vector<8x8xf32>
    %84 = arith.mulf %79, %83 : vector<8x8xf32>
    %cst_53 = arith.constant dense<0.000000e+00> : vector<8x8xf32>
    %85 = tpu.matmul %84, %71, %cst_53 {dimension_numbers = #tpu.dot_dimension_numbers<[1], [0], [0], [1], [0, 0, 1, 1], [], []>} : vector<8x8xf32>, vector<8x8xf32>, vector<8x8xf32> -> vector<8x8xf32>
    %86 = vector.extract_strided_slice %7 {offsets = [16, 0], sizes = [8, 24], strides = [1, 1]} : vector<24x24xf32> to vector<8x24xf32>
    %cst_54 = arith.constant dense<0.000000e+00> : vector<8x24xf32>
    %87 = tpu.matmul %85, %86, %cst_54 {dimension_numbers = #tpu.dot_dimension_numbers<[1], [0], [0], [1], [0, 0, 1, 1], [], []>} : vector<8x8xf32>, vector<8x24xf32>, vector<8x24xf32> -> vector<8x24xf32>
    %88 = arith.addf %68, %87 : vector<8x24xf32>
    %89 = arith.addf %18, %88 : vector<8x24xf32>
    %90 = vector.broadcast %8 : vector<1x24xf32> to vector<8x24xf32>
    %91 = arith.addf %89, %90 : vector<8x24xf32>
    %92 = vector.extract_strided_slice %0 {offsets = [0, 1, 0], sizes = [8, 1, 24], strides = [1, 1, 1]} : vector<8x4x24xf32> to vector<8x1x24xf32>
    %93 = vector.shape_cast %92 : vector<8x1x24xf32> to vector<8x24xf32>
    %cst_55 = arith.constant dense<0.000000e+00> : vector<8x24xf32>
    %94 = tpu.matmul %93, %1, %cst_55 {dimension_numbers = #tpu.dot_dimension_numbers<[1], [0], [0], [1], [0, 0, 1, 1], [], []>} : vector<8x24xf32>, vector<24x24xf32>, vector<8x24xf32> -> vector<8x24xf32>
    %95 = vector.broadcast %2 : vector<1x24xf32> to vector<8x24xf32>
    %96 = arith.addf %94, %95 : vector<8x24xf32>
    %cst_56 = arith.constant dense<0.000000e+00> : vector<8x24xf32>
    %97 = tpu.matmul %93, %3, %cst_56 {dimension_numbers = #tpu.dot_dimension_numbers<[1], [0], [0], [1], [0, 0, 1, 1], [], []>} : vector<8x24xf32>, vector<24x24xf32>, vector<8x24xf32> -> vector<8x24xf32>
    %98 = vector.broadcast %4 : vector<1x24xf32> to vector<8x24xf32>
    %99 = arith.addf %97, %98 : vector<8x24xf32>
    %cst_57 = arith.constant dense<0.000000e+00> : vector<8x24xf32>
    %100 = tpu.matmul %93, %5, %cst_57 {dimension_numbers = #tpu.dot_dimension_numbers<[1], [0], [0], [1], [0, 0, 1, 1], [], []>} : vector<8x24xf32>, vector<24x24xf32>, vector<8x24xf32> -> vector<8x24xf32>
    %101 = vector.broadcast %6 : vector<1x24xf32> to vector<8x24xf32>
    %102 = arith.addf %100, %101 : vector<8x24xf32>
    %cst_58 = arith.constant 0.000000e+00 : f32
    %103 = vector.broadcast %cst_58 : f32 to vector<8x24xf32>
    %104 = vector.extract_strided_slice %96 {offsets = [0, 0], sizes = [8, 8], strides = [1, 1]} : vector<8x24xf32> to vector<8x8xf32>
    %105 = vector.extract_strided_slice %99 {offsets = [0, 0], sizes = [8, 8], strides = [1, 1]} : vector<8x24xf32> to vector<8x8xf32>
    %106 = vector.extract_strided_slice %102 {offsets = [0, 0], sizes = [8, 8], strides = [1, 1]} : vector<8x24xf32> to vector<8x8xf32>
    %cst_59 = arith.constant dense<0.000000e+00> : vector<8x8xf32>
    %107 = tpu.matmul %104, %105, %cst_59 {dimension_numbers = #tpu.dot_dimension_numbers<[1], [1], [0], [0], [0, 0, 1, 0], [], []>} : vector<8x8xf32>, vector<8x8xf32>, vector<8x8xf32> -> vector<8x8xf32>
    %cst_60 = arith.constant 0.353553385 : f32
    %108 = vector.broadcast %cst_60 : f32 to vector<8x8xf32>
    %109 = arith.mulf %107, %108 : vector<8x8xf32>
    %cst_61 = arith.constant dense<0xFF800000> : vector<8xf32>
    %110 = vector.multi_reduction <maximumf>, %109, %cst_61 [1] : vector<8x8xf32> to vector<8xf32>
    %111 = vector.shape_cast %110 : vector<8xf32> to vector<8x1xf32>
    %112 = vector.broadcast %111 : vector<8x1xf32> to vector<8x8xf32>
    %113 = arith.subf %109, %112 : vector<8x8xf32>
    %114 = math.exp %113 : vector<8x8xf32>
    %cst_62 = arith.constant dense<0.000000e+00> : vector<8xf32>
    %115 = vector.multi_reduction <add>, %114, %cst_62 [1] : vector<8x8xf32> to vector<8xf32>
    %116 = vector.shape_cast %115 : vector<8xf32> to vector<8x1xf32>
    %117 = tpu.reciprocal %116 {approx = true} : vector<8x1xf32> -> vector<8x1xf32>
    %118 = vector.broadcast %117 : vector<8x1xf32> to vector<8x8xf32>
    %119 = arith.mulf %114, %118 : vector<8x8xf32>
    %cst_63 = arith.constant dense<0.000000e+00> : vector<8x8xf32>
    %120 = tpu.matmul %119, %106, %cst_63 {dimension_numbers = #tpu.dot_dimension_numbers<[1], [0], [0], [1], [0, 0, 1, 1], [], []>} : vector<8x8xf32>, vector<8x8xf32>, vector<8x8xf32> -> vector<8x8xf32>
    %121 = vector.extract_strided_slice %7 {offsets = [0, 0], sizes = [8, 24], strides = [1, 1]} : vector<24x24xf32> to vector<8x24xf32>
    %cst_64 = arith.constant dense<0.000000e+00> : vector<8x24xf32>
    %122 = tpu.matmul %120, %121, %cst_64 {dimension_numbers = #tpu.dot_dimension_numbers<[1], [0], [0], [1], [0, 0, 1, 1], [], []>} : vector<8x8xf32>, vector<8x24xf32>, vector<8x24xf32> -> vector<8x24xf32>
    %123 = arith.addf %103, %122 : vector<8x24xf32>
    %124 = vector.extract_strided_slice %96 {offsets = [0, 8], sizes = [8, 8], strides = [1, 1]} : vector<8x24xf32> to vector<8x8xf32>
    %125 = vector.extract_strided_slice %99 {offsets = [0, 8], sizes = [8, 8], strides = [1, 1]} : vector<8x24xf32> to vector<8x8xf32>
    %126 = vector.extract_strided_slice %102 {offsets = [0, 8], sizes = [8, 8], strides = [1, 1]} : vector<8x24xf32> to vector<8x8xf32>
    %cst_65 = arith.constant dense<0.000000e+00> : vector<8x8xf32>
    %127 = tpu.matmul %124, %125, %cst_65 {dimension_numbers = #tpu.dot_dimension_numbers<[1], [1], [0], [0], [0, 0, 1, 0], [], []>} : vector<8x8xf32>, vector<8x8xf32>, vector<8x8xf32> -> vector<8x8xf32>
    %cst_66 = arith.constant 0.353553385 : f32
    %128 = vector.broadcast %cst_66 : f32 to vector<8x8xf32>
    %129 = arith.mulf %127, %128 : vector<8x8xf32>
    %cst_67 = arith.constant dense<0xFF800000> : vector<8xf32>
    %130 = vector.multi_reduction <maximumf>, %129, %cst_67 [1] : vector<8x8xf32> to vector<8xf32>
    %131 = vector.shape_cast %130 : vector<8xf32> to vector<8x1xf32>
    %132 = vector.broadcast %131 : vector<8x1xf32> to vector<8x8xf32>
    %133 = arith.subf %129, %132 : vector<8x8xf32>
    %134 = math.exp %133 : vector<8x8xf32>
    %cst_68 = arith.constant dense<0.000000e+00> : vector<8xf32>
    %135 = vector.multi_reduction <add>, %134, %cst_68 [1] : vector<8x8xf32> to vector<8xf32>
    %136 = vector.shape_cast %135 : vector<8xf32> to vector<8x1xf32>
    %137 = tpu.reciprocal %136 {approx = true} : vector<8x1xf32> -> vector<8x1xf32>
    %138 = vector.broadcast %137 : vector<8x1xf32> to vector<8x8xf32>
    %139 = arith.mulf %134, %138 : vector<8x8xf32>
    %cst_69 = arith.constant dense<0.000000e+00> : vector<8x8xf32>
    %140 = tpu.matmul %139, %126, %cst_69 {dimension_numbers = #tpu.dot_dimension_numbers<[1], [0], [0], [1], [0, 0, 1, 1], [], []>} : vector<8x8xf32>, vector<8x8xf32>, vector<8x8xf32> -> vector<8x8xf32>
    %141 = vector.extract_strided_slice %7 {offsets = [8, 0], sizes = [8, 24], strides = [1, 1]} : vector<24x24xf32> to vector<8x24xf32>
    %cst_70 = arith.constant dense<0.000000e+00> : vector<8x24xf32>
    %142 = tpu.matmul %140, %141, %cst_70 {dimension_numbers = #tpu.dot_dimension_numbers<[1], [0], [0], [1], [0, 0, 1, 1], [], []>} : vector<8x8xf32>, vector<8x24xf32>, vector<8x24xf32> -> vector<8x24xf32>
    %143 = arith.addf %123, %142 : vector<8x24xf32>
    %144 = vector.extract_strided_slice %96 {offsets = [0, 16], sizes = [8, 8], strides = [1, 1]} : vector<8x24xf32> to vector<8x8xf32>
    %145 = vector.extract_strided_slice %99 {offsets = [0, 16], sizes = [8, 8], strides = [1, 1]} : vector<8x24xf32> to vector<8x8xf32>
    %146 = vector.extract_strided_slice %102 {offsets = [0, 16], sizes = [8, 8], strides = [1, 1]} : vector<8x24xf32> to vector<8x8xf32>
    %cst_71 = arith.constant dense<0.000000e+00> : vector<8x8xf32>
    %147 = tpu.matmul %144, %145, %cst_71 {dimension_numbers = #tpu.dot_dimension_numbers<[1], [1], [0], [0], [0, 0, 1, 0], [], []>} : vector<8x8xf32>, vector<8x8xf32>, vector<8x8xf32> -> vector<8x8xf32>
    %cst_72 = arith.constant 0.353553385 : f32
    %148 = vector.broadcast %cst_72 : f32 to vector<8x8xf32>
    %149 = arith.mulf %147, %148 : vector<8x8xf32>
    %cst_73 = arith.constant dense<0xFF800000> : vector<8xf32>
    %150 = vector.multi_reduction <maximumf>, %149, %cst_73 [1] : vector<8x8xf32> to vector<8xf32>
    %151 = vector.shape_cast %150 : vector<8xf32> to vector<8x1xf32>
    %152 = vector.broadcast %151 : vector<8x1xf32> to vector<8x8xf32>
    %153 = arith.subf %149, %152 : vector<8x8xf32>
    %154 = math.exp %153 : vector<8x8xf32>
    %cst_74 = arith.constant dense<0.000000e+00> : vector<8xf32>
    %155 = vector.multi_reduction <add>, %154, %cst_74 [1] : vector<8x8xf32> to vector<8xf32>
    %156 = vector.shape_cast %155 : vector<8xf32> to vector<8x1xf32>
    %157 = tpu.reciprocal %156 {approx = true} : vector<8x1xf32> -> vector<8x1xf32>
    %158 = vector.broadcast %157 : vector<8x1xf32> to vector<8x8xf32>
    %159 = arith.mulf %154, %158 : vector<8x8xf32>
    %cst_75 = arith.constant dense<0.000000e+00> : vector<8x8xf32>
    %160 = tpu.matmul %159, %146, %cst_75 {dimension_numbers = #tpu.dot_dimension_numbers<[1], [0], [0], [1], [0, 0, 1, 1], [], []>} : vector<8x8xf32>, vector<8x8xf32>, vector<8x8xf32> -> vector<8x8xf32>
    %161 = vector.extract_strided_slice %7 {offsets = [16, 0], sizes = [8, 24], strides = [1, 1]} : vector<24x24xf32> to vector<8x24xf32>
    %cst_76 = arith.constant dense<0.000000e+00> : vector<8x24xf32>
    %162 = tpu.matmul %160, %161, %cst_76 {dimension_numbers = #tpu.dot_dimension_numbers<[1], [0], [0], [1], [0, 0, 1, 1], [], []>} : vector<8x8xf32>, vector<8x24xf32>, vector<8x24xf32> -> vector<8x24xf32>
    %163 = arith.addf %143, %162 : vector<8x24xf32>
    %164 = arith.addf %93, %163 : vector<8x24xf32>
    %165 = vector.broadcast %8 : vector<1x24xf32> to vector<8x24xf32>
    %166 = arith.addf %164, %165 : vector<8x24xf32>
    %167 = vector.extract_strided_slice %0 {offsets = [0, 2, 0], sizes = [8, 1, 24], strides = [1, 1, 1]} : vector<8x4x24xf32> to vector<8x1x24xf32>
    %168 = vector.shape_cast %167 : vector<8x1x24xf32> to vector<8x24xf32>
    %cst_77 = arith.constant dense<0.000000e+00> : vector<8x24xf32>
    %169 = tpu.matmul %168, %1, %cst_77 {dimension_numbers = #tpu.dot_dimension_numbers<[1], [0], [0], [1], [0, 0, 1, 1], [], []>} : vector<8x24xf32>, vector<24x24xf32>, vector<8x24xf32> -> vector<8x24xf32>
    %170 = vector.broadcast %2 : vector<1x24xf32> to vector<8x24xf32>
    %171 = arith.addf %169, %170 : vector<8x24xf32>
    %cst_78 = arith.constant dense<0.000000e+00> : vector<8x24xf32>
    %172 = tpu.matmul %168, %3, %cst_78 {dimension_numbers = #tpu.dot_dimension_numbers<[1], [0], [0], [1], [0, 0, 1, 1], [], []>} : vector<8x24xf32>, vector<24x24xf32>, vector<8x24xf32> -> vector<8x24xf32>
    %173 = vector.broadcast %4 : vector<1x24xf32> to vector<8x24xf32>
    %174 = arith.addf %172, %173 : vector<8x24xf32>
    %cst_79 = arith.constant dense<0.000000e+00> : vector<8x24xf32>
    %175 = tpu.matmul %168, %5, %cst_79 {dimension_numbers = #tpu.dot_dimension_numbers<[1], [0], [0], [1], [0, 0, 1, 1], [], []>} : vector<8x24xf32>, vector<24x24xf32>, vector<8x24xf32> -> vector<8x24xf32>
    %176 = vector.broadcast %6 : vector<1x24xf32> to vector<8x24xf32>
    %177 = arith.addf %175, %176 : vector<8x24xf32>
    %cst_80 = arith.constant 0.000000e+00 : f32
    %178 = vector.broadcast %cst_80 : f32 to vector<8x24xf32>
    %179 = vector.extract_strided_slice %171 {offsets = [0, 0], sizes = [8, 8], strides = [1, 1]} : vector<8x24xf32> to vector<8x8xf32>
    %180 = vector.extract_strided_slice %174 {offsets = [0, 0], sizes = [8, 8], strides = [1, 1]} : vector<8x24xf32> to vector<8x8xf32>
    %181 = vector.extract_strided_slice %177 {offsets = [0, 0], sizes = [8, 8], strides = [1, 1]} : vector<8x24xf32> to vector<8x8xf32>
    %cst_81 = arith.constant dense<0.000000e+00> : vector<8x8xf32>
    %182 = tpu.matmul %179, %180, %cst_81 {dimension_numbers = #tpu.dot_dimension_numbers<[1], [1], [0], [0], [0, 0, 1, 0], [], []>} : vector<8x8xf32>, vector<8x8xf32>, vector<8x8xf32> -> vector<8x8xf32>
    %cst_82 = arith.constant 0.353553385 : f32
    %183 = vector.broadcast %cst_82 : f32 to vector<8x8xf32>
    %184 = arith.mulf %182, %183 : vector<8x8xf32>
    %cst_83 = arith.constant dense<0xFF800000> : vector<8xf32>
    %185 = vector.multi_reduction <maximumf>, %184, %cst_83 [1] : vector<8x8xf32> to vector<8xf32>
    %186 = vector.shape_cast %185 : vector<8xf32> to vector<8x1xf32>
    %187 = vector.broadcast %186 : vector<8x1xf32> to vector<8x8xf32>
    %188 = arith.subf %184, %187 : vector<8x8xf32>
    %189 = math.exp %188 : vector<8x8xf32>
    %cst_84 = arith.constant dense<0.000000e+00> : vector<8xf32>
    %190 = vector.multi_reduction <add>, %189, %cst_84 [1] : vector<8x8xf32> to vector<8xf32>
    %191 = vector.shape_cast %190 : vector<8xf32> to vector<8x1xf32>
    %192 = tpu.reciprocal %191 {approx = true} : vector<8x1xf32> -> vector<8x1xf32>
    %193 = vector.broadcast %192 : vector<8x1xf32> to vector<8x8xf32>
    %194 = arith.mulf %189, %193 : vector<8x8xf32>
    %cst_85 = arith.constant dense<0.000000e+00> : vector<8x8xf32>
    %195 = tpu.matmul %194, %181, %cst_85 {dimension_numbers = #tpu.dot_dimension_numbers<[1], [0], [0], [1], [0, 0, 1, 1], [], []>} : vector<8x8xf32>, vector<8x8xf32>, vector<8x8xf32> -> vector<8x8xf32>
    %196 = vector.extract_strided_slice %7 {offsets = [0, 0], sizes = [8, 24], strides = [1, 1]} : vector<24x24xf32> to vector<8x24xf32>
    %cst_86 = arith.constant dense<0.000000e+00> : vector<8x24xf32>
    %197 = tpu.matmul %195, %196, %cst_86 {dimension_numbers = #tpu.dot_dimension_numbers<[1], [0], [0], [1], [0, 0, 1, 1], [], []>} : vector<8x8xf32>, vector<8x24xf32>, vector<8x24xf32> -> vector<8x24xf32>
    %198 = arith.addf %178, %197 : vector<8x24xf32>
    %199 = vector.extract_strided_slice %171 {offsets = [0, 8], sizes = [8, 8], strides = [1, 1]} : vector<8x24xf32> to vector<8x8xf32>
    %200 = vector.extract_strided_slice %174 {offsets = [0, 8], sizes = [8, 8], strides = [1, 1]} : vector<8x24xf32> to vector<8x8xf32>
    %201 = vector.extract_strided_slice %177 {offsets = [0, 8], sizes = [8, 8], strides = [1, 1]} : vector<8x24xf32> to vector<8x8xf32>
    %cst_87 = arith.constant dense<0.000000e+00> : vector<8x8xf32>
    %202 = tpu.matmul %199, %200, %cst_87 {dimension_numbers = #tpu.dot_dimension_numbers<[1], [1], [0], [0], [0, 0, 1, 0], [], []>} : vector<8x8xf32>, vector<8x8xf32>, vector<8x8xf32> -> vector<8x8xf32>
    %cst_88 = arith.constant 0.353553385 : f32
    %203 = vector.broadcast %cst_88 : f32 to vector<8x8xf32>
    %204 = arith.mulf %202, %203 : vector<8x8xf32>
    %cst_89 = arith.constant dense<0xFF800000> : vector<8xf32>
    %205 = vector.multi_reduction <maximumf>, %204, %cst_89 [1] : vector<8x8xf32> to vector<8xf32>
    %206 = vector.shape_cast %205 : vector<8xf32> to vector<8x1xf32>
    %207 = vector.broadcast %206 : vector<8x1xf32> to vector<8x8xf32>
    %208 = arith.subf %204, %207 : vector<8x8xf32>
    %209 = math.exp %208 : vector<8x8xf32>
    %cst_90 = arith.constant dense<0.000000e+00> : vector<8xf32>
    %210 = vector.multi_reduction <add>, %209, %cst_90 [1] : vector<8x8xf32> to vector<8xf32>
    %211 = vector.shape_cast %210 : vector<8xf32> to vector<8x1xf32>
    %212 = tpu.reciprocal %211 {approx = true} : vector<8x1xf32> -> vector<8x1xf32>
    %213 = vector.broadcast %212 : vector<8x1xf32> to vector<8x8xf32>
    %214 = arith.mulf %209, %213 : vector<8x8xf32>
    %cst_91 = arith.constant dense<0.000000e+00> : vector<8x8xf32>
    %215 = tpu.matmul %214, %201, %cst_91 {dimension_numbers = #tpu.dot_dimension_numbers<[1], [0], [0], [1], [0, 0, 1, 1], [], []>} : vector<8x8xf32>, vector<8x8xf32>, vector<8x8xf32> -> vector<8x8xf32>
    %216 = vector.extract_strided_slice %7 {offsets = [8, 0], sizes = [8, 24], strides = [1, 1]} : vector<24x24xf32> to vector<8x24xf32>
    %cst_92 = arith.constant dense<0.000000e+00> : vector<8x24xf32>
    %217 = tpu.matmul %215, %216, %cst_92 {dimension_numbers = #tpu.dot_dimension_numbers<[1], [0], [0], [1], [0, 0, 1, 1], [], []>} : vector<8x8xf32>, vector<8x24xf32>, vector<8x24xf32> -> vector<8x24xf32>
    %218 = arith.addf %198, %217 : vector<8x24xf32>
    %219 = vector.extract_strided_slice %171 {offsets = [0, 16], sizes = [8, 8], strides = [1, 1]} : vector<8x24xf32> to vector<8x8xf32>
    %220 = vector.extract_strided_slice %174 {offsets = [0, 16], sizes = [8, 8], strides = [1, 1]} : vector<8x24xf32> to vector<8x8xf32>
    %221 = vector.extract_strided_slice %177 {offsets = [0, 16], sizes = [8, 8], strides = [1, 1]} : vector<8x24xf32> to vector<8x8xf32>
    %cst_93 = arith.constant dense<0.000000e+00> : vector<8x8xf32>
    %222 = tpu.matmul %219, %220, %cst_93 {dimension_numbers = #tpu.dot_dimension_numbers<[1], [1], [0], [0], [0, 0, 1, 0], [], []>} : vector<8x8xf32>, vector<8x8xf32>, vector<8x8xf32> -> vector<8x8xf32>
    %cst_94 = arith.constant 0.353553385 : f32
    %223 = vector.broadcast %cst_94 : f32 to vector<8x8xf32>
    %224 = arith.mulf %222, %223 : vector<8x8xf32>
    %cst_95 = arith.constant dense<0xFF800000> : vector<8xf32>
    %225 = vector.multi_reduction <maximumf>, %224, %cst_95 [1] : vector<8x8xf32> to vector<8xf32>
    %226 = vector.shape_cast %225 : vector<8xf32> to vector<8x1xf32>
    %227 = vector.broadcast %226 : vector<8x1xf32> to vector<8x8xf32>
    %228 = arith.subf %224, %227 : vector<8x8xf32>
    %229 = math.exp %228 : vector<8x8xf32>
    %cst_96 = arith.constant dense<0.000000e+00> : vector<8xf32>
    %230 = vector.multi_reduction <add>, %229, %cst_96 [1] : vector<8x8xf32> to vector<8xf32>
    %231 = vector.shape_cast %230 : vector<8xf32> to vector<8x1xf32>
    %232 = tpu.reciprocal %231 {approx = true} : vector<8x1xf32> -> vector<8x1xf32>
    %233 = vector.broadcast %232 : vector<8x1xf32> to vector<8x8xf32>
    %234 = arith.mulf %229, %233 : vector<8x8xf32>
    %cst_97 = arith.constant dense<0.000000e+00> : vector<8x8xf32>
    %235 = tpu.matmul %234, %221, %cst_97 {dimension_numbers = #tpu.dot_dimension_numbers<[1], [0], [0], [1], [0, 0, 1, 1], [], []>} : vector<8x8xf32>, vector<8x8xf32>, vector<8x8xf32> -> vector<8x8xf32>
    %236 = vector.extract_strided_slice %7 {offsets = [16, 0], sizes = [8, 24], strides = [1, 1]} : vector<24x24xf32> to vector<8x24xf32>
    %cst_98 = arith.constant dense<0.000000e+00> : vector<8x24xf32>
    %237 = tpu.matmul %235, %236, %cst_98 {dimension_numbers = #tpu.dot_dimension_numbers<[1], [0], [0], [1], [0, 0, 1, 1], [], []>} : vector<8x8xf32>, vector<8x24xf32>, vector<8x24xf32> -> vector<8x24xf32>
    %238 = arith.addf %218, %237 : vector<8x24xf32>
    %239 = arith.addf %168, %238 : vector<8x24xf32>
    %240 = vector.broadcast %8 : vector<1x24xf32> to vector<8x24xf32>
    %241 = arith.addf %239, %240 : vector<8x24xf32>
    %242 = vector.extract_strided_slice %0 {offsets = [0, 3, 0], sizes = [8, 1, 24], strides = [1, 1, 1]} : vector<8x4x24xf32> to vector<8x1x24xf32>
    %243 = vector.shape_cast %242 : vector<8x1x24xf32> to vector<8x24xf32>
    %cst_99 = arith.constant dense<0.000000e+00> : vector<8x24xf32>
    %244 = tpu.matmul %243, %1, %cst_99 {dimension_numbers = #tpu.dot_dimension_numbers<[1], [0], [0], [1], [0, 0, 1, 1], [], []>} : vector<8x24xf32>, vector<24x24xf32>, vector<8x24xf32> -> vector<8x24xf32>
    %245 = vector.broadcast %2 : vector<1x24xf32> to vector<8x24xf32>
    %246 = arith.addf %244, %245 : vector<8x24xf32>
    %cst_100 = arith.constant dense<0.000000e+00> : vector<8x24xf32>
    %247 = tpu.matmul %243, %3, %cst_100 {dimension_numbers = #tpu.dot_dimension_numbers<[1], [0], [0], [1], [0, 0, 1, 1], [], []>} : vector<8x24xf32>, vector<24x24xf32>, vector<8x24xf32> -> vector<8x24xf32>
    %248 = vector.broadcast %4 : vector<1x24xf32> to vector<8x24xf32>
    %249 = arith.addf %247, %248 : vector<8x24xf32>
    %cst_101 = arith.constant dense<0.000000e+00> : vector<8x24xf32>
    %250 = tpu.matmul %243, %5, %cst_101 {dimension_numbers = #tpu.dot_dimension_numbers<[1], [0], [0], [1], [0, 0, 1, 1], [], []>} : vector<8x24xf32>, vector<24x24xf32>, vector<8x24xf32> -> vector<8x24xf32>
    %251 = vector.broadcast %6 : vector<1x24xf32> to vector<8x24xf32>
    %252 = arith.addf %250, %251 : vector<8x24xf32>
    %cst_102 = arith.constant 0.000000e+00 : f32
    %253 = vector.broadcast %cst_102 : f32 to vector<8x24xf32>
    %254 = vector.extract_strided_slice %246 {offsets = [0, 0], sizes = [8, 8], strides = [1, 1]} : vector<8x24xf32> to vector<8x8xf32>
    %255 = vector.extract_strided_slice %249 {offsets = [0, 0], sizes = [8, 8], strides = [1, 1]} : vector<8x24xf32> to vector<8x8xf32>
    %256 = vector.extract_strided_slice %252 {offsets = [0, 0], sizes = [8, 8], strides = [1, 1]} : vector<8x24xf32> to vector<8x8xf32>
    %cst_103 = arith.constant dense<0.000000e+00> : vector<8x8xf32>
    %257 = tpu.matmul %254, %255, %cst_103 {dimension_numbers = #tpu.dot_dimension_numbers<[1], [1], [0], [0], [0, 0, 1, 0], [], []>} : vector<8x8xf32>, vector<8x8xf32>, vector<8x8xf32> -> vector<8x8xf32>
    %cst_104 = arith.constant 0.353553385 : f32
    %258 = vector.broadcast %cst_104 : f32 to vector<8x8xf32>
    %259 = arith.mulf %257, %258 : vector<8x8xf32>
    %cst_105 = arith.constant dense<0xFF800000> : vector<8xf32>
    %260 = vector.multi_reduction <maximumf>, %259, %cst_105 [1] : vector<8x8xf32> to vector<8xf32>
    %261 = vector.shape_cast %260 : vector<8xf32> to vector<8x1xf32>
    %262 = vector.broadcast %261 : vector<8x1xf32> to vector<8x8xf32>
    %263 = arith.subf %259, %262 : vector<8x8xf32>
    %264 = math.exp %263 : vector<8x8xf32>
    %cst_106 = arith.constant dense<0.000000e+00> : vector<8xf32>
    %265 = vector.multi_reduction <add>, %264, %cst_106 [1] : vector<8x8xf32> to vector<8xf32>
    %266 = vector.shape_cast %265 : vector<8xf32> to vector<8x1xf32>
    %267 = tpu.reciprocal %266 {approx = true} : vector<8x1xf32> -> vector<8x1xf32>
    %268 = vector.broadcast %267 : vector<8x1xf32> to vector<8x8xf32>
    %269 = arith.mulf %264, %268 : vector<8x8xf32>
    %cst_107 = arith.constant dense<0.000000e+00> : vector<8x8xf32>
    %270 = tpu.matmul %269, %256, %cst_107 {dimension_numbers = #tpu.dot_dimension_numbers<[1], [0], [0], [1], [0, 0, 1, 1], [], []>} : vector<8x8xf32>, vector<8x8xf32>, vector<8x8xf32> -> vector<8x8xf32>
    %271 = vector.extract_strided_slice %7 {offsets = [0, 0], sizes = [8, 24], strides = [1, 1]} : vector<24x24xf32> to vector<8x24xf32>
    %cst_108 = arith.constant dense<0.000000e+00> : vector<8x24xf32>
    %272 = tpu.matmul %270, %271, %cst_108 {dimension_numbers = #tpu.dot_dimension_numbers<[1], [0], [0], [1], [0, 0, 1, 1], [], []>} : vector<8x8xf32>, vector<8x24xf32>, vector<8x24xf32> -> vector<8x24xf32>
    %273 = arith.addf %253, %272 : vector<8x24xf32>
    %274 = vector.extract_strided_slice %246 {offsets = [0, 8], sizes = [8, 8], strides = [1, 1]} : vector<8x24xf32> to vector<8x8xf32>
    %275 = vector.extract_strided_slice %249 {offsets = [0, 8], sizes = [8, 8], strides = [1, 1]} : vector<8x24xf32> to vector<8x8xf32>
    %276 = vector.extract_strided_slice %252 {offsets = [0, 8], sizes = [8, 8], strides = [1, 1]} : vector<8x24xf32> to vector<8x8xf32>
    %cst_109 = arith.constant dense<0.000000e+00> : vector<8x8xf32>
    %277 = tpu.matmul %274, %275, %cst_109 {dimension_numbers = #tpu.dot_dimension_numbers<[1], [1], [0], [0], [0, 0, 1, 0], [], []>} : vector<8x8xf32>, vector<8x8xf32>, vector<8x8xf32> -> vector<8x8xf32>
    %cst_110 = arith.constant 0.353553385 : f32
    %278 = vector.broadcast %cst_110 : f32 to vector<8x8xf32>
    %279 = arith.mulf %277, %278 : vector<8x8xf32>
    %cst_111 = arith.constant dense<0xFF800000> : vector<8xf32>
    %280 = vector.multi_reduction <maximumf>, %279, %cst_111 [1] : vector<8x8xf32> to vector<8xf32>
    %281 = vector.shape_cast %280 : vector<8xf32> to vector<8x1xf32>
    %282 = vector.broadcast %281 : vector<8x1xf32> to vector<8x8xf32>
    %283 = arith.subf %279, %282 : vector<8x8xf32>
    %284 = math.exp %283 : vector<8x8xf32>
    %cst_112 = arith.constant dense<0.000000e+00> : vector<8xf32>
    %285 = vector.multi_reduction <add>, %284, %cst_112 [1] : vector<8x8xf32> to vector<8xf32>
    %286 = vector.shape_cast %285 : vector<8xf32> to vector<8x1xf32>
    %287 = tpu.reciprocal %286 {approx = true} : vector<8x1xf32> -> vector<8x1xf32>
    %288 = vector.broadcast %287 : vector<8x1xf32> to vector<8x8xf32>
    %289 = arith.mulf %284, %288 : vector<8x8xf32>
    %cst_113 = arith.constant dense<0.000000e+00> : vector<8x8xf32>
    %290 = tpu.matmul %289, %276, %cst_113 {dimension_numbers = #tpu.dot_dimension_numbers<[1], [0], [0], [1], [0, 0, 1, 1], [], []>} : vector<8x8xf32>, vector<8x8xf32>, vector<8x8xf32> -> vector<8x8xf32>
    %291 = vector.extract_strided_slice %7 {offsets = [8, 0], sizes = [8, 24], strides = [1, 1]} : vector<24x24xf32> to vector<8x24xf32>
    %cst_114 = arith.constant dense<0.000000e+00> : vector<8x24xf32>
    %292 = tpu.matmul %290, %291, %cst_114 {dimension_numbers = #tpu.dot_dimension_numbers<[1], [0], [0], [1], [0, 0, 1, 1], [], []>} : vector<8x8xf32>, vector<8x24xf32>, vector<8x24xf32> -> vector<8x24xf32>
    %293 = arith.addf %273, %292 : vector<8x24xf32>
    %294 = vector.extract_strided_slice %246 {offsets = [0, 16], sizes = [8, 8], strides = [1, 1]} : vector<8x24xf32> to vector<8x8xf32>
    %295 = vector.extract_strided_slice %249 {offsets = [0, 16], sizes = [8, 8], strides = [1, 1]} : vector<8x24xf32> to vector<8x8xf32>
    %296 = vector.extract_strided_slice %252 {offsets = [0, 16], sizes = [8, 8], strides = [1, 1]} : vector<8x24xf32> to vector<8x8xf32>
    %cst_115 = arith.constant dense<0.000000e+00> : vector<8x8xf32>
    %297 = tpu.matmul %294, %295, %cst_115 {dimension_numbers = #tpu.dot_dimension_numbers<[1], [1], [0], [0], [0, 0, 1, 0], [], []>} : vector<8x8xf32>, vector<8x8xf32>, vector<8x8xf32> -> vector<8x8xf32>
    %cst_116 = arith.constant 0.353553385 : f32
    %298 = vector.broadcast %cst_116 : f32 to vector<8x8xf32>
    %299 = arith.mulf %297, %298 : vector<8x8xf32>
    %cst_117 = arith.constant dense<0xFF800000> : vector<8xf32>
    %300 = vector.multi_reduction <maximumf>, %299, %cst_117 [1] : vector<8x8xf32> to vector<8xf32>
    %301 = vector.shape_cast %300 : vector<8xf32> to vector<8x1xf32>
    %302 = vector.broadcast %301 : vector<8x1xf32> to vector<8x8xf32>
    %303 = arith.subf %299, %302 : vector<8x8xf32>
    %304 = math.exp %303 : vector<8x8xf32>
    %cst_118 = arith.constant dense<0.000000e+00> : vector<8xf32>
    %305 = vector.multi_reduction <add>, %304, %cst_118 [1] : vector<8x8xf32> to vector<8xf32>
    %306 = vector.shape_cast %305 : vector<8xf32> to vector<8x1xf32>
    %307 = tpu.reciprocal %306 {approx = true} : vector<8x1xf32> -> vector<8x1xf32>
    %308 = vector.broadcast %307 : vector<8x1xf32> to vector<8x8xf32>
    %309 = arith.mulf %304, %308 : vector<8x8xf32>
    %cst_119 = arith.constant dense<0.000000e+00> : vector<8x8xf32>
    %310 = tpu.matmul %309, %296, %cst_119 {dimension_numbers = #tpu.dot_dimension_numbers<[1], [0], [0], [1], [0, 0, 1, 1], [], []>} : vector<8x8xf32>, vector<8x8xf32>, vector<8x8xf32> -> vector<8x8xf32>
    %311 = vector.extract_strided_slice %7 {offsets = [16, 0], sizes = [8, 24], strides = [1, 1]} : vector<24x24xf32> to vector<8x24xf32>
    %cst_120 = arith.constant dense<0.000000e+00> : vector<8x24xf32>
    %312 = tpu.matmul %310, %311, %cst_120 {dimension_numbers = #tpu.dot_dimension_numbers<[1], [0], [0], [1], [0, 0, 1, 1], [], []>} : vector<8x8xf32>, vector<8x24xf32>, vector<8x24xf32> -> vector<8x24xf32>
    %313 = arith.addf %293, %312 : vector<8x24xf32>
    %314 = arith.addf %243, %313 : vector<8x24xf32>
    %315 = vector.broadcast %8 : vector<1x24xf32> to vector<8x24xf32>
    %316 = arith.addf %314, %315 : vector<8x24xf32>
    %cst_121 = arith.constant dense<0.000000e+00> : vector<8xf32>
    %317 = vector.multi_reduction <add>, %91, %cst_121 [1] : vector<8x24xf32> to vector<8xf32>
    %318 = vector.shape_cast %317 : vector<8xf32> to vector<8x1xf32>
    %cst_122 = arith.constant 0.000000e+00 : f32
    %319 = vector.broadcast %cst_122 : f32 to vector<8x1xf32>
    %320 = arith.addf %319, %318 : vector<8x1xf32>
    %cst_123 = arith.constant dense<0.000000e+00> : vector<8xf32>
    %321 = vector.multi_reduction <add>, %166, %cst_123 [1] : vector<8x24xf32> to vector<8xf32>
    %322 = vector.shape_cast %321 : vector<8xf32> to vector<8x1xf32>
    %323 = arith.addf %320, %322 : vector<8x1xf32>
    %cst_124 = arith.constant dense<0.000000e+00> : vector<8xf32>
    %324 = vector.multi_reduction <add>, %241, %cst_124 [1] : vector<8x24xf32> to vector<8xf32>
    %325 = vector.shape_cast %324 : vector<8xf32> to vector<8x1xf32>
    %326 = arith.addf %323, %325 : vector<8x1xf32>
    %cst_125 = arith.constant dense<0.000000e+00> : vector<8xf32>
    %327 = vector.multi_reduction <add>, %316, %cst_125 [1] : vector<8x24xf32> to vector<8xf32>
    %328 = vector.shape_cast %327 : vector<8xf32> to vector<8x1xf32>
    %329 = arith.addf %326, %328 : vector<8x1xf32>
    %cst_126 = arith.constant 9.600000e+01 : f32
    %330 = vector.broadcast %cst_126 : f32 to vector<8x1xf32>
    %331 = arith.divf %329, %330 : vector<8x1xf32>
    %332 = vector.broadcast %331 : vector<8x1xf32> to vector<8x24xf32>
    %333 = arith.subf %91, %332 : vector<8x24xf32>
    %334 = arith.mulf %333, %333 : vector<8x24xf32>
    %cst_127 = arith.constant dense<0.000000e+00> : vector<8xf32>
    %335 = vector.multi_reduction <add>, %334, %cst_127 [1] : vector<8x24xf32> to vector<8xf32>
    %336 = vector.shape_cast %335 : vector<8xf32> to vector<8x1xf32>
    %cst_128 = arith.constant 0.000000e+00 : f32
    %337 = vector.broadcast %cst_128 : f32 to vector<8x1xf32>
    %338 = arith.addf %337, %336 : vector<8x1xf32>
    %339 = vector.broadcast %331 : vector<8x1xf32> to vector<8x24xf32>
    %340 = arith.subf %166, %339 : vector<8x24xf32>
    %341 = arith.mulf %340, %340 : vector<8x24xf32>
    %cst_129 = arith.constant dense<0.000000e+00> : vector<8xf32>
    %342 = vector.multi_reduction <add>, %341, %cst_129 [1] : vector<8x24xf32> to vector<8xf32>
    %343 = vector.shape_cast %342 : vector<8xf32> to vector<8x1xf32>
    %344 = arith.addf %338, %343 : vector<8x1xf32>
    %345 = vector.broadcast %331 : vector<8x1xf32> to vector<8x24xf32>
    %346 = arith.subf %241, %345 : vector<8x24xf32>
    %347 = arith.mulf %346, %346 : vector<8x24xf32>
    %cst_130 = arith.constant dense<0.000000e+00> : vector<8xf32>
    %348 = vector.multi_reduction <add>, %347, %cst_130 [1] : vector<8x24xf32> to vector<8xf32>
    %349 = vector.shape_cast %348 : vector<8xf32> to vector<8x1xf32>
    %350 = arith.addf %344, %349 : vector<8x1xf32>
    %351 = vector.broadcast %331 : vector<8x1xf32> to vector<8x24xf32>
    %352 = arith.subf %316, %351 : vector<8x24xf32>
    %353 = arith.mulf %352, %352 : vector<8x24xf32>
    %cst_131 = arith.constant dense<0.000000e+00> : vector<8xf32>
    %354 = vector.multi_reduction <add>, %353, %cst_131 [1] : vector<8x24xf32> to vector<8xf32>
    %355 = vector.shape_cast %354 : vector<8xf32> to vector<8x1xf32>
    %356 = arith.addf %350, %355 : vector<8x1xf32>
    %cst_132 = arith.constant 9.600000e+01 : f32
    %357 = vector.broadcast %cst_132 : f32 to vector<8x1xf32>
    %358 = arith.divf %356, %357 : vector<8x1xf32>
    %cst_133 = arith.constant 9.99999974E-6 : f32
    %359 = vector.broadcast %cst_133 : f32 to vector<8x1xf32>
    %360 = arith.addf %358, %359 : vector<8x1xf32>
    %361 = math.rsqrt %360 : vector<8x1xf32>
    %362 = vector.broadcast %331 : vector<8x1xf32> to vector<8x24xf32>
    %363 = arith.subf %91, %362 : vector<8x24xf32>
    %364 = vector.broadcast %361 : vector<8x1xf32> to vector<8x24xf32>
    %365 = arith.mulf %363, %364 : vector<8x24xf32>
    %366 = vector.extract_strided_slice %9 {offsets = [0, 0], sizes = [1, 24], strides = [1, 1]} : vector<4x24xf32> to vector<1x24xf32>
    %367 = vector.broadcast %366 : vector<1x24xf32> to vector<8x24xf32>
    %368 = arith.mulf %365, %367 : vector<8x24xf32>
    %369 = vector.extract_strided_slice %10 {offsets = [0, 0], sizes = [1, 24], strides = [1, 1]} : vector<4x24xf32> to vector<1x24xf32>
    %370 = vector.broadcast %369 : vector<1x24xf32> to vector<8x24xf32>
    %371 = arith.addf %368, %370 : vector<8x24xf32>
    %372 = vector.broadcast %331 : vector<8x1xf32> to vector<8x24xf32>
    %373 = arith.subf %166, %372 : vector<8x24xf32>
    %374 = vector.broadcast %361 : vector<8x1xf32> to vector<8x24xf32>
    %375 = arith.mulf %373, %374 : vector<8x24xf32>
    %376 = vector.extract_strided_slice %9 {offsets = [1, 0], sizes = [1, 24], strides = [1, 1]} : vector<4x24xf32> to vector<1x24xf32>
    %377 = vector.broadcast %376 : vector<1x24xf32> to vector<8x24xf32>
    %378 = arith.mulf %375, %377 : vector<8x24xf32>
    %379 = vector.extract_strided_slice %10 {offsets = [1, 0], sizes = [1, 24], strides = [1, 1]} : vector<4x24xf32> to vector<1x24xf32>
    %380 = vector.broadcast %379 : vector<1x24xf32> to vector<8x24xf32>
    %381 = arith.addf %378, %380 : vector<8x24xf32>
    %382 = vector.broadcast %331 : vector<8x1xf32> to vector<8x24xf32>
    %383 = arith.subf %241, %382 : vector<8x24xf32>
    %384 = vector.broadcast %361 : vector<8x1xf32> to vector<8x24xf32>
    %385 = arith.mulf %383, %384 : vector<8x24xf32>
    %386 = vector.extract_strided_slice %9 {offsets = [2, 0], sizes = [1, 24], strides = [1, 1]} : vector<4x24xf32> to vector<1x24xf32>
    %387 = vector.broadcast %386 : vector<1x24xf32> to vector<8x24xf32>
    %388 = arith.mulf %385, %387 : vector<8x24xf32>
    %389 = vector.extract_strided_slice %10 {offsets = [2, 0], sizes = [1, 24], strides = [1, 1]} : vector<4x24xf32> to vector<1x24xf32>
    %390 = vector.broadcast %389 : vector<1x24xf32> to vector<8x24xf32>
    %391 = arith.addf %388, %390 : vector<8x24xf32>
    %392 = vector.broadcast %331 : vector<8x1xf32> to vector<8x24xf32>
    %393 = arith.subf %316, %392 : vector<8x24xf32>
    %394 = vector.broadcast %361 : vector<8x1xf32> to vector<8x24xf32>
    %395 = arith.mulf %393, %394 : vector<8x24xf32>
    %396 = vector.extract_strided_slice %9 {offsets = [3, 0], sizes = [1, 24], strides = [1, 1]} : vector<4x24xf32> to vector<1x24xf32>
    %397 = vector.broadcast %396 : vector<1x24xf32> to vector<8x24xf32>
    %398 = arith.mulf %395, %397 : vector<8x24xf32>
    %399 = vector.extract_strided_slice %10 {offsets = [3, 0], sizes = [1, 24], strides = [1, 1]} : vector<4x24xf32> to vector<1x24xf32>
    %400 = vector.broadcast %399 : vector<1x24xf32> to vector<8x24xf32>
    %401 = arith.addf %398, %400 : vector<8x24xf32>
    %cst_134 = arith.constant dense<0.000000e+00> : vector<8x32xf32>
    %402 = tpu.matmul %371, %11, %cst_134 {dimension_numbers = #tpu.dot_dimension_numbers<[1], [0], [0], [1], [0, 0, 1, 1], [], []>} : vector<8x24xf32>, vector<24x32xf32>, vector<8x32xf32> -> vector<8x32xf32>
    %403 = vector.broadcast %12 : vector<1x32xf32> to vector<8x32xf32>
    %404 = arith.addf %402, %403 : vector<8x32xf32>
    %cst_135 = arith.constant 0.000000e+00 : f32
    %405 = vector.broadcast %cst_135 : f32 to vector<8x32xf32>
    %406 = arith.maximumf %404, %405 : vector<8x32xf32>
    %cst_136 = arith.constant dense<0.000000e+00> : vector<8x24xf32>
    %407 = tpu.matmul %406, %13, %cst_136 {dimension_numbers = #tpu.dot_dimension_numbers<[1], [0], [0], [1], [0, 0, 1, 1], [], []>} : vector<8x32xf32>, vector<32x24xf32>, vector<8x24xf32> -> vector<8x24xf32>
    %408 = vector.broadcast %14 : vector<1x24xf32> to vector<8x24xf32>
    %409 = arith.addf %407, %408 : vector<8x24xf32>
    %410 = arith.addf %371, %409 : vector<8x24xf32>
    %cst_137 = arith.constant dense<0.000000e+00> : vector<8x32xf32>
    %411 = tpu.matmul %381, %11, %cst_137 {dimension_numbers = #tpu.dot_dimension_numbers<[1], [0], [0], [1], [0, 0, 1, 1], [], []>} : vector<8x24xf32>, vector<24x32xf32>, vector<8x32xf32> -> vector<8x32xf32>
    %412 = vector.broadcast %12 : vector<1x32xf32> to vector<8x32xf32>
    %413 = arith.addf %411, %412 : vector<8x32xf32>
    %cst_138 = arith.constant 0.000000e+00 : f32
    %414 = vector.broadcast %cst_138 : f32 to vector<8x32xf32>
    %415 = arith.maximumf %413, %414 : vector<8x32xf32>
    %cst_139 = arith.constant dense<0.000000e+00> : vector<8x24xf32>
    %416 = tpu.matmul %415, %13, %cst_139 {dimension_numbers = #tpu.dot_dimension_numbers<[1], [0], [0], [1], [0, 0, 1, 1], [], []>} : vector<8x32xf32>, vector<32x24xf32>, vector<8x24xf32> -> vector<8x24xf32>
    %417 = vector.broadcast %14 : vector<1x24xf32> to vector<8x24xf32>
    %418 = arith.addf %416, %417 : vector<8x24xf32>
    %419 = arith.addf %381, %418 : vector<8x24xf32>
    %cst_140 = arith.constant dense<0.000000e+00> : vector<8x32xf32>
    %420 = tpu.matmul %391, %11, %cst_140 {dimension_numbers = #tpu.dot_dimension_numbers<[1], [0], [0], [1], [0, 0, 1, 1], [], []>} : vector<8x24xf32>, vector<24x32xf32>, vector<8x32xf32> -> vector<8x32xf32>
    %421 = vector.broadcast %12 : vector<1x32xf32> to vector<8x32xf32>
    %422 = arith.addf %420, %421 : vector<8x32xf32>
    %cst_141 = arith.constant 0.000000e+00 : f32
    %423 = vector.broadcast %cst_141 : f32 to vector<8x32xf32>
    %424 = arith.maximumf %422, %423 : vector<8x32xf32>
    %cst_142 = arith.constant dense<0.000000e+00> : vector<8x24xf32>
    %425 = tpu.matmul %424, %13, %cst_142 {dimension_numbers = #tpu.dot_dimension_numbers<[1], [0], [0], [1], [0, 0, 1, 1], [], []>} : vector<8x32xf32>, vector<32x24xf32>, vector<8x24xf32> -> vector<8x24xf32>
    %426 = vector.broadcast %14 : vector<1x24xf32> to vector<8x24xf32>
    %427 = arith.addf %425, %426 : vector<8x24xf32>
    %428 = arith.addf %391, %427 : vector<8x24xf32>
    %cst_143 = arith.constant dense<0.000000e+00> : vector<8x32xf32>
    %429 = tpu.matmul %401, %11, %cst_143 {dimension_numbers = #tpu.dot_dimension_numbers<[1], [0], [0], [1], [0, 0, 1, 1], [], []>} : vector<8x24xf32>, vector<24x32xf32>, vector<8x32xf32> -> vector<8x32xf32>
    %430 = vector.broadcast %12 : vector<1x32xf32> to vector<8x32xf32>
    %431 = arith.addf %429, %430 : vector<8x32xf32>
    %cst_144 = arith.constant 0.000000e+00 : f32
    %432 = vector.broadcast %cst_144 : f32 to vector<8x32xf32>
    %433 = arith.maximumf %431, %432 : vector<8x32xf32>
    %cst_145 = arith.constant dense<0.000000e+00> : vector<8x24xf32>
    %434 = tpu.matmul %433, %13, %cst_145 {dimension_numbers = #tpu.dot_dimension_numbers<[1], [0], [0], [1], [0, 0, 1, 1], [], []>} : vector<8x32xf32>, vector<32x24xf32>, vector<8x24xf32> -> vector<8x24xf32>
    %435 = vector.broadcast %14 : vector<1x24xf32> to vector<8x24xf32>
    %436 = arith.addf %434, %435 : vector<8x24xf32>
    %437 = arith.addf %401, %436 : vector<8x24xf32>
    %cst_146 = arith.constant dense<0.000000e+00> : vector<8xf32>
    %438 = vector.multi_reduction <add>, %410, %cst_146 [1] : vector<8x24xf32> to vector<8xf32>
    %439 = vector.shape_cast %438 : vector<8xf32> to vector<8x1xf32>
    %cst_147 = arith.constant 0.000000e+00 : f32
    %440 = vector.broadcast %cst_147 : f32 to vector<8x1xf32>
    %441 = arith.addf %440, %439 : vector<8x1xf32>
    %cst_148 = arith.constant dense<0.000000e+00> : vector<8xf32>
    %442 = vector.multi_reduction <add>, %419, %cst_148 [1] : vector<8x24xf32> to vector<8xf32>
    %443 = vector.shape_cast %442 : vector<8xf32> to vector<8x1xf32>
    %444 = arith.addf %441, %443 : vector<8x1xf32>
    %cst_149 = arith.constant dense<0.000000e+00> : vector<8xf32>
    %445 = vector.multi_reduction <add>, %428, %cst_149 [1] : vector<8x24xf32> to vector<8xf32>
    %446 = vector.shape_cast %445 : vector<8xf32> to vector<8x1xf32>
    %447 = arith.addf %444, %446 : vector<8x1xf32>
    %cst_150 = arith.constant dense<0.000000e+00> : vector<8xf32>
    %448 = vector.multi_reduction <add>, %437, %cst_150 [1] : vector<8x24xf32> to vector<8xf32>
    %449 = vector.shape_cast %448 : vector<8xf32> to vector<8x1xf32>
    %450 = arith.addf %447, %449 : vector<8x1xf32>
    %cst_151 = arith.constant 9.600000e+01 : f32
    %451 = vector.broadcast %cst_151 : f32 to vector<8x1xf32>
    %452 = arith.divf %450, %451 : vector<8x1xf32>
    %453 = vector.broadcast %452 : vector<8x1xf32> to vector<8x24xf32>
    %454 = arith.subf %410, %453 : vector<8x24xf32>
    %455 = arith.mulf %454, %454 : vector<8x24xf32>
    %cst_152 = arith.constant dense<0.000000e+00> : vector<8xf32>
    %456 = vector.multi_reduction <add>, %455, %cst_152 [1] : vector<8x24xf32> to vector<8xf32>
    %457 = vector.shape_cast %456 : vector<8xf32> to vector<8x1xf32>
    %cst_153 = arith.constant 0.000000e+00 : f32
    %458 = vector.broadcast %cst_153 : f32 to vector<8x1xf32>
    %459 = arith.addf %458, %457 : vector<8x1xf32>
    %460 = vector.broadcast %452 : vector<8x1xf32> to vector<8x24xf32>
    %461 = arith.subf %419, %460 : vector<8x24xf32>
    %462 = arith.mulf %461, %461 : vector<8x24xf32>
    %cst_154 = arith.constant dense<0.000000e+00> : vector<8xf32>
    %463 = vector.multi_reduction <add>, %462, %cst_154 [1] : vector<8x24xf32> to vector<8xf32>
    %464 = vector.shape_cast %463 : vector<8xf32> to vector<8x1xf32>
    %465 = arith.addf %459, %464 : vector<8x1xf32>
    %466 = vector.broadcast %452 : vector<8x1xf32> to vector<8x24xf32>
    %467 = arith.subf %428, %466 : vector<8x24xf32>
    %468 = arith.mulf %467, %467 : vector<8x24xf32>
    %cst_155 = arith.constant dense<0.000000e+00> : vector<8xf32>
    %469 = vector.multi_reduction <add>, %468, %cst_155 [1] : vector<8x24xf32> to vector<8xf32>
    %470 = vector.shape_cast %469 : vector<8xf32> to vector<8x1xf32>
    %471 = arith.addf %465, %470 : vector<8x1xf32>
    %472 = vector.broadcast %452 : vector<8x1xf32> to vector<8x24xf32>
    %473 = arith.subf %437, %472 : vector<8x24xf32>
    %474 = arith.mulf %473, %473 : vector<8x24xf32>
    %cst_156 = arith.constant dense<0.000000e+00> : vector<8xf32>
    %475 = vector.multi_reduction <add>, %474, %cst_156 [1] : vector<8x24xf32> to vector<8xf32>
    %476 = vector.shape_cast %475 : vector<8xf32> to vector<8x1xf32>
    %477 = arith.addf %471, %476 : vector<8x1xf32>
    %cst_157 = arith.constant 9.600000e+01 : f32
    %478 = vector.broadcast %cst_157 : f32 to vector<8x1xf32>
    %479 = arith.divf %477, %478 : vector<8x1xf32>
    %cst_158 = arith.constant 9.99999974E-6 : f32
    %480 = vector.broadcast %cst_158 : f32 to vector<8x1xf32>
    %481 = arith.addf %479, %480 : vector<8x1xf32>
    %482 = math.rsqrt %481 : vector<8x1xf32>
    %483 = vector.broadcast %452 : vector<8x1xf32> to vector<8x24xf32>
    %484 = arith.subf %410, %483 : vector<8x24xf32>
    %485 = vector.broadcast %482 : vector<8x1xf32> to vector<8x24xf32>
    %486 = arith.mulf %484, %485 : vector<8x24xf32>
    %487 = vector.extract_strided_slice %15 {offsets = [0, 0], sizes = [1, 24], strides = [1, 1]} : vector<4x24xf32> to vector<1x24xf32>
    %488 = vector.broadcast %487 : vector<1x24xf32> to vector<8x24xf32>
    %489 = arith.mulf %486, %488 : vector<8x24xf32>
    %490 = vector.extract_strided_slice %16 {offsets = [0, 0], sizes = [1, 24], strides = [1, 1]} : vector<4x24xf32> to vector<1x24xf32>
    %491 = vector.broadcast %490 : vector<1x24xf32> to vector<8x24xf32>
    %492 = arith.addf %489, %491 : vector<8x24xf32>
    %493 = vector.broadcast %452 : vector<8x1xf32> to vector<8x24xf32>
    %494 = arith.subf %419, %493 : vector<8x24xf32>
    %495 = vector.broadcast %482 : vector<8x1xf32> to vector<8x24xf32>
    %496 = arith.mulf %494, %495 : vector<8x24xf32>
    %497 = vector.extract_strided_slice %15 {offsets = [1, 0], sizes = [1, 24], strides = [1, 1]} : vector<4x24xf32> to vector<1x24xf32>
    %498 = vector.broadcast %497 : vector<1x24xf32> to vector<8x24xf32>
    %499 = arith.mulf %496, %498 : vector<8x24xf32>
    %500 = vector.extract_strided_slice %16 {offsets = [1, 0], sizes = [1, 24], strides = [1, 1]} : vector<4x24xf32> to vector<1x24xf32>
    %501 = vector.broadcast %500 : vector<1x24xf32> to vector<8x24xf32>
    %502 = arith.addf %499, %501 : vector<8x24xf32>
    %503 = vector.broadcast %452 : vector<8x1xf32> to vector<8x24xf32>
    %504 = arith.subf %428, %503 : vector<8x24xf32>
    %505 = vector.broadcast %482 : vector<8x1xf32> to vector<8x24xf32>
    %506 = arith.mulf %504, %505 : vector<8x24xf32>
    %507 = vector.extract_strided_slice %15 {offsets = [2, 0], sizes = [1, 24], strides = [1, 1]} : vector<4x24xf32> to vector<1x24xf32>
    %508 = vector.broadcast %507 : vector<1x24xf32> to vector<8x24xf32>
    %509 = arith.mulf %506, %508 : vector<8x24xf32>
    %510 = vector.extract_strided_slice %16 {offsets = [2, 0], sizes = [1, 24], strides = [1, 1]} : vector<4x24xf32> to vector<1x24xf32>
    %511 = vector.broadcast %510 : vector<1x24xf32> to vector<8x24xf32>
    %512 = arith.addf %509, %511 : vector<8x24xf32>
    %513 = vector.broadcast %452 : vector<8x1xf32> to vector<8x24xf32>
    %514 = arith.subf %437, %513 : vector<8x24xf32>
    %515 = vector.broadcast %482 : vector<8x1xf32> to vector<8x24xf32>
    %516 = arith.mulf %514, %515 : vector<8x24xf32>
    %517 = vector.extract_strided_slice %15 {offsets = [3, 0], sizes = [1, 24], strides = [1, 1]} : vector<4x24xf32> to vector<1x24xf32>
    %518 = vector.broadcast %517 : vector<1x24xf32> to vector<8x24xf32>
    %519 = arith.mulf %516, %518 : vector<8x24xf32>
    %520 = vector.extract_strided_slice %16 {offsets = [3, 0], sizes = [1, 24], strides = [1, 1]} : vector<4x24xf32> to vector<1x24xf32>
    %521 = vector.broadcast %520 : vector<1x24xf32> to vector<8x24xf32>
    %522 = arith.addf %519, %521 : vector<8x24xf32>
    %523 = vector.shape_cast %492 : vector<8x24xf32> to vector<8x1x24xf32>
    %524 = vector.shape_cast %502 : vector<8x24xf32> to vector<8x1x24xf32>
    %525 = vector.shape_cast %512 : vector<8x24xf32> to vector<8x1x24xf32>
    %526 = vector.shape_cast %522 : vector<8x24xf32> to vector<8x1x24xf32>
    %527 = tpu.concatenate %523, %524, %525, %526 in 1 : vector<8x1x24xf32>, vector<8x1x24xf32>, vector<8x1x24xf32>, vector<8x1x24xf32> -> vector<8x4x24xf32>
    %c0_159 = arith.constant 0 : index
    %c0_160 = arith.constant 0 : index
    %c0_161 = arith.constant 0 : index
    %528 = vector.load %arg17[%c0_159, %c0_160, %c0_161] : memref<8x4x24xf32, #tpu.memory_space<vmem>>, vector<8x4x24xf32>
    tpu.vector_store %arg17[%c0_159, %c0_160, %c0_161], %527 {strides = array<i32>} : memref<8x4x24xf32, #tpu.memory_space<vmem>>, vector<8x4x24xf32>,
    return
  }
}

</mosaic_0001>

<bundles_post_ra>
// kernel: tpu_custom_call.1
= control target key start
LH: loop header
LB: loop body
LE: loop exit
PB: predicated region body
PF: predicated region fallthrough
CT: control target
= control target key end

     0   :  { %s5505_s0 = inlined_call_operand.vmem [shape: f32[8,4,24], index: 0, kind: input, shape index: {}]   ;;  %s5506_s1 = inlined_call_operand.vmem [shape: f32[24,24], index: 1, kind: input, shape index: {}]   ;;  %s5507_s2 = inlined_call_operand.hbm [shape: f32[1,24], index: 2, kind: input, shape index: {}]   ;;  %s5508_s3 = inlined_call_operand.hbm [shape: f32[24,24], index: 3, kind: input, shape index: {}]   ;;  %s5509_s4 = inlined_call_operand.hbm [shape: f32[1,24], index: 4, kind: input, shape index: {}]   ;;  %s5510_s5 = inlined_call_operand.hbm [shape: f32[24,24], index: 5, kind: input, shape index: {}]   ;;  %s5511_s6 = inlined_call_operand.hbm [shape: f32[1,24], index: 6, kind: input, shape index: {}]   ;;  %s5512_s7 = inlined_call_operand.hbm [shape: f32[24,24], index: 7, kind: input, shape index: {}]   ;;  %s5513_s8 = inlined_call_operand.hbm [shape: f32[1,24], index: 8, kind: input, shape index: {}]   ;;  %s5514_s9 = inlined_call_operand.vmem [shape: f32[4,24], index: 9, kind: input, shape index: {}]   ;;  %s5515_s10 = inlined_call_operand.vmem [shape: f32[4,24], index: 10, kind: input, shape index: {}]   ;;  %s5516_s11 = inlined_call_operand.hbm [shape: f32[24,32], index: 11, kind: input, shape index: {}]   ;;  %s5517_s12 = inlined_call_operand.hbm [shape: f32[1,32], index: 12, kind: input, shape index: {}]   ;;  %s5518_s13 = inlined_call_operand.vmem [shape: f32[32,24], index: 13, kind: input, shape index: {}]   ;;  %s5519_s14 = inlined_call_operand.vmem [shape: f32[1,24], index: 14, kind: input, shape index: {}]   ;;  %s5520_s15 = inlined_call_operand.vmem [shape: f32[4,24], index: 15, kind: input, shape index: {}]   ;;  %s5521_s16 = inlined_call_operand.hbm [shape: f32[4,24], index: 16, kind: input, shape index: {}]   ;;  %s5522_s17 = inlined_call_operand.hbm [shape: f32[8,4,24], index: 17, kind: output, shape index: {}]  }
   0x1   :  { %5533 = sst [smem:[#allocation30_spill]] %s5505_s0 }
   0x2   :  { %5534 = sst [smem:[#allocation31_spill]] %s5506_s1 }
   0x3   :  { %22 = vsyncpa [#allocation3], 0 }
   0x4   :  { %23 = vsyncpa [#allocation6], 0 }
   0x5   :  { %24 = vsyncpa [#allocation9], 0 }
   0x6   :  { %25 = vsyncpa [#allocation12], 0 }
   0x7   :  { %26 = vsyncpa [#allocation15], 0 }
   0x8   :  { %27 = vsyncpa [#allocation18], 0  ;;  %s48_s26 = sshll.u32 %s5508_s3, 4  ;;  %s49_s26 = int_to_ptr.hbm [resolvable:$true] %s48_s26 }
   0x9   :  { %28 = vsyncpa [#allocation4], 0  ;;  %s3620_s27 = smov [#allocation5]   ;;  %s72_s30 = sshll.u32 %s5510_s5, 4  ;;  %s73_s30 = int_to_ptr.hbm [resolvable:$true] %s72_s30 }
   0xa   :  { %s50_s28 = sshll.u32 %s3620_s27, 4  ;;  %s3621_s18 = smov 128   ;;  %s51_s28 = int_to_ptr.vmem [resolvable:$true] %s50_s28 }
   0xb   :  { %s3622_s19 = smov 8   ;;  %s3623_s1 = smov [#allocation8]  }
   0xc   :  { %56 = dma.hbm_to_vmem [thread:$0]  %s49_s26, 384, %s51_s28, [#allocation6], %s3621_s18, %s3621_s18, %s3622_s19  }
   0xd   :  { %s74_s20 = sshll.u32 %s3623_s1, 4  ;;  %s96_s23 = sshll.u32 %s5512_s7, 4  ;;  %s75_s20 = int_to_ptr.vmem [resolvable:$true] %s74_s20  ;;  %s97_s23 = int_to_ptr.hbm [resolvable:$true] %s96_s23 }
   0xe   :  { %80 = dma.hbm_to_vmem [thread:$0]  %s73_s30, 384, %s75_s20, [#allocation9], %s3621_s18, %s3621_s18, %s3622_s19  }
   0xf   :  { %s124_s25 = sshll.u32 %s5516_s11, 4  ;;  %s3624_s27 = smov [#allocation11]   ;;  %s125_s25 = int_to_ptr.hbm [resolvable:$true] %s124_s25 }
  0x10   :  { %s98_s29 = sshll.u32 %s3624_s27, 4  ;;  %s3625_s5 = smov [#allocation14]   ;;  %s99_s29 = int_to_ptr.vmem [resolvable:$true] %s98_s29 }
  0x11   :  { %104 = dma.hbm_to_vmem [thread:$0]  %s97_s23, 384, %s99_s29, [#allocation12], %s3621_s18, %s3621_s18, %s3622_s19  }
  0x12   :  { %s126_s26 = sshll.u32 %s3625_s5, 4  ;;  %s38_s1 = sshll.u32 %s5507_s2, 4  ;;  %s127_s26 = int_to_ptr.vmem [resolvable:$true] %s126_s26  ;;  %s39_s1 = int_to_ptr.hbm [resolvable:$true] %s38_s1 }
  0x13   :  { %132 = dma.hbm_to_vmem [thread:$0]  %s125_s25, 384, %s127_s26, [#allocation15], %s3621_s18, %s3621_s18, %s3622_s19  }
  0x14   :  { %s62_s20 = sshll.u32 %s5509_s4, 4  ;;  %s3626_s21 = smov [#allocation2]   ;;  %s63_s20 = int_to_ptr.hbm [resolvable:$true] %s62_s20 }
  0x15   :  { %s40_s11 = sshll.u32 %s3626_s21, 4  ;;  %s3627_s22 = smov [#allocation7]   ;;  %s41_s11 = int_to_ptr.vmem [resolvable:$true] %s40_s11 }
  0x16   :  { %43 = dma.hbm_to_vmem [thread:$0]  %s39_s1, 16, %s41_s11, [#allocation3]  }
  0x17   :  { %s64_s23 = sshll.u32 %s3627_s22, 4  ;;  %s86_s27 = sshll.u32 %s5511_s6, 4  ;;  %s65_s23 = int_to_ptr.vmem [resolvable:$true] %s64_s23  ;;  %s87_s27 = int_to_ptr.hbm [resolvable:$true] %s86_s27 }
  0x18   :  { %67 = dma.hbm_to_vmem [thread:$0]  %s63_s20, 16, %s65_s23, [#allocation6]  }
  0x19   :  { %s110_s19 = sshll.u32 %s5513_s8, 4  ;;  %s3628_s25 = smov [#allocation10]   ;;  %s111_s19 = int_to_ptr.hbm [resolvable:$true] %s110_s19 }
  0x1a   :  { %s88_s4 = sshll.u32 %s3628_s25, 4  ;;  %s3629_s29 = smov [#allocation13]   ;;  %s89_s4 = int_to_ptr.vmem [resolvable:$true] %s88_s4 }
  0x1b   :  { %91 = dma.hbm_to_vmem [thread:$0]  %s87_s27, 16, %s89_s4, [#allocation9]  }
  0x1c   :  { %s112_s5 = sshll.u32 %s3629_s29, 4  ;;  %s138_s0 = sshll.u32 %s5517_s12, 4  ;;  %s113_s5 = int_to_ptr.vmem [resolvable:$true] %s112_s5  ;;  %s139_s0 = int_to_ptr.hbm [resolvable:$true] %s138_s0 }
  0x1d   :  { %115 = dma.hbm_to_vmem [thread:$0]  %s111_s19, 16, %s113_s5, [#allocation12]  }
  0x1e   :  { %s155_s7 = sshll.u32 %s5521_s16, 4  ;;  %s3630_s30 = smov [#allocation16]   ;;  %s156_s7 = int_to_ptr.hbm [resolvable:$true] %s155_s7 }
  0x1f   :  { %s140_s8 = sshll.u32 %s3630_s30, 4  ;;  %s3631_s20 = smov [#allocation17]   ;;  %s141_s8 = int_to_ptr.vmem [resolvable:$true] %s140_s8 }
  0x20   :  { %143 = dma.hbm_to_vmem [thread:$0]  %s139_s0, 16, %s141_s8, [#allocation15]  }
  0x21   :  { %s157_s21 = sshll.u32 %s3631_s20, 4  ;;  %s158_s21 = int_to_ptr.vmem [resolvable:$true] %s157_s21 }
  0x22   :  { %160 = dma.hbm_to_vmem [thread:$0]  %s156_s7, 64, %s158_s21, [#allocation18]  }
  0x23   :  { %3606 = dma.done.wait [#allocation3], 16  }
  0x24   :  { %3607 = vsyncadd [#allocation3], 4294967280 }
  0x25   :  { %3608 = dma.done.wait [#allocation6], 400  }
  0x26   :  { %3609 = vsyncadd [#allocation6], 4294966896 }
  0x27   :  { %3610 = dma.done.wait [#allocation9], 400  }
  0x28   :  { %3611 = vsyncadd [#allocation9], 4294966896 }
  0x29   :  { %3612 = dma.done.wait [#allocation12], 400  }
  0x2a   :  { %3613 = vsyncadd [#allocation12], 4294966896 }
  0x2b   :  { %3614 = dma.done.wait [#allocation15], 400  }
  0x2c   :  { %3615 = vsyncadd [#allocation15], 4294966896 }
  0x2d   :  { %3616 = dma.done.wait [#allocation18], 64  }
  0x2e   :  { %3617 = vsyncadd [#allocation18], 4294967232  ;;  %v3759_v0 = vld [vmem:[#allocation5 + $0x10] sm:$0xff]  ;;  %v3761_v1 = vld [vmem:[#allocation5 + $0x8] sm:$0xff]  ;;  %s5535_s11 = sld [smem:[#allocation31_spill]]  ;;  %vm250_vm0 = vcmask 1041409  }
  0x2f   :  { %vm253_vm1 = vcmask 1042434   ;;  %309 = vmatpush.msra.mxu1 %v3759_v0  ;;  %v3770_v3 = vld [vmem:[#allocation5] sm:$0xff]  ;;  %s5536_s27 = sld [smem:[#allocation30_spill]]  ;;  %vm256_vm2 = vcmask 1043459   ;;  %vm259_vm3 = vcmask 1044484   ;;  %vm262_vm4 = vcmask 1045509  }
  0x30   :  { %vm265_vm5 = vcmask 1046534   ;;  %vm268_vm6 = vcmask 1047559   ;;  %vm270_vm7 = vcmask 195584   ;;  %v3843_v28 = vld [vmem:[#allocation7] ss:$0 sm:$0xff]  ;;  %vm339_vm8 = vcmask 64512  }
  0x31   :  { %310 = vmatpush.msra.mxu1 %v3761_v1  ;;  %v3845_v29 = vld [vmem:[#allocation2] ss:$0 sm:$0xff]  ;;  %s3632_s21 = smov 112   ;;  %s3633_s12 = smov 120   ;;  %v3855_v34 = vld [vmem:[#allocation8 + $0x10] sm:$0xff]  ;;  %v3857_v35 = vld [vmem:[#allocation8 + $0x8] sm:$0xff] }
  0x32   :  { %332 = vmatpush.msra.mxu2 %v3855_v34  ;;  %v3860_v36 = vld [vmem:[#allocation8] sm:$0xff]  ;;  %v3873_v44 = vld [vmem:[#allocation10] ss:$0 sm:$0xff]  ;;  %vm1805_vm9 = vcmask 195585   ;;  %vm1809_vm10 = vcmask 188416   ;;  %vm5527_vm11 = vcmask 195586  }
  0x33   :  { %311 = vmatpush.msra.mxu1 %v3770_v3  ;;  %vm1848_vm12 = vcmask 189440   ;;  %vm5526_vm13 = vcmask 190464   ;;  %vm5525_vm14 = vcmask 195587   ;;  %vm1815_vm15 = vcmask 1046528   ;;  %s3166_s2 = sshll.u32 %s5522_s17, 4  ;;  %s3637_s17 = smov 64   ;;  %s3167_s2 = int_to_ptr.hbm [resolvable:$true] %s3166_s2 }
  0x34   :  { %v3766_v2 = vld [vmem:[%s5535_s11 + $0x10] sm:$0xff]  ;;  %v3775_v4 = vld [vmem:[%s5535_s11 + $0x8] sm:$0xff]  ;;  %v3827_v17 = vld [vmem:[%s5535_s11] sm:$0xff]  ;;  %333 = vmatpush.msra.mxu2 %v3857_v35  ;;  %s3638_s18 = smov 4  }
  0x35   :  { %286 = vmatpush.msra.mxu0 %v3766_v2  ;;  %v3780_v5 = vld [vmem:[%s5536_s27] sm:$0xf]  ;;  %v3785_v6 = vld [vmem:[%s5536_s27 + $0x4] sm:$0xf]  ;;  %v3790_v7 = vld [vmem:[%s5536_s27 + $0x8] sm:$0xf] }
  0x36   :  { %v3795_v8 = vld [vmem:[%s5536_s27 + $0xc] sm:$0xf]  ;;  %v3802_v9 = vld [vmem:[%s5536_s27 + $0x10] sm:$0xf]  ;;  %v3807_v10 = vld [vmem:[%s5536_s27 + $0x14] sm:$0xf]  ;;  %334 = vmatpush.msra.mxu2 %v3860_v36 }
  0x37   :  { %287 = vmatpush.msra.mxu0 %v3775_v4  ;;  %v3812_v11 = vld [vmem:[%s5536_s27 + $0x18] sm:$0xf]  ;;  %v249_v12 = vrot.slane %v3785_v6, 7  ;;  %v252_v13 = vrot.slane %v3790_v7, 6  ;;  %v255_v14 = vrot.slane %v3795_v8, 5  ;;  %v258_v16 = vrot.slane %v3802_v9, 4 }
  0x38   :  { %v3821_v15 = vld [vmem:[%s5536_s27 + $0x1c] sm:$0xf]  ;;  %v261_v19 = vrot.slane %v3807_v10, 3  ;;  %v264_v20 = vrot.slane %v3812_v11, 2 }
  0x39   :  { %v251_v18 = vsel %vm250_vm0, %v249_v12, %v3780_v5  ;;  %288 = vmatpush.msra.mxu0 %v3827_v17  ;;  %v267_v23 = vrot.slane %v3821_v15, 1 }
  0x3a   :  { %v254_v21 = vsel %vm253_vm1, %v252_v13, %v251_v18 }
  0x3b   :  { %v257_v22 = vsel %vm256_vm2, %v255_v14, %v254_v21 }
  0x3c   :  { %v260_v24 = vsel %vm259_vm3, %v258_v16, %v257_v22  ;;  %v639_v22 = vrot.slane %v3780_v5, 1 }
  0x3d   :  { %v263_v25 = vsel %vm262_vm4, %v261_v19, %v260_v24 }
  0x3e   :  { %v266_v26 = vsel %vm265_vm5, %v264_v20, %v263_v25  ;;  %v640_v24 = vsel %vm250_vm0, %v3785_v6, %v639_v22  ;;  %v643_v25 = vrot.slane %v3795_v8, 6 }
  0x3f   :  { %v269_v27 = vsel %vm268_vm6, %v267_v23, %v266_v26  ;;  %v641_v23 = vrot.slane %v3790_v7, 7 }
  0x40   :  { %3185 = vmatmul.msk.f32.vlgmr.msra.gmra.mxu1 %vm270_vm7, %v269_v27  ;;  %3184 = vmatmul.msk.f32.vlgmr.msra.gmra.mxu0 %vm270_vm7, %v269_v27 }
  0x41   :  { %3186 = vmatmul.msk.f32.vlgmr.msra.gmra.mxu2 %vm270_vm7, %v269_v27  ;;  %v642_v26 = vsel %vm253_vm1, %v641_v23, %v640_v24  ;;  %v645_v27 = vrot.slane %v3802_v9, 5 }
  0xbd   :  { %v313_v30 = vpop.f32.mrf.mxu1  ;;  %v290_v31 = vpop.f32.mrf.mxu0 }
  0xbe   :  { %v314_v32 = vadd.f32 %v3843_v28, %v313_v30  ;;  %v291_v33 = vadd.f32 %v3845_v29, %v290_v31  ;;  %v644_v30 = vsel %vm256_vm2, %v643_v25, %v642_v26  ;;  %v647_v31 = vrot.slane %v3807_v10, 4 }
  0xc0   :  { %516 = vrot.lane.b32.xlu1 %v314_v32, %s3632_s21  ;;  %403 = vrot.lane.b32.xlu0 %v314_v32, %s3633_s12 }
  0xc1   :  { %3187 = vmatpush.xpose.msk.msra.mxu3 %vm339_vm8, %v314_v32  ;;  %v646_v32 = vsel %vm259_vm3, %v645_v27, %v644_v30 }
  0xc4   :  { %3188 = vmatmul.msk.f32.vlgmr.msra.gmra.mxu3 %vm339_vm8, %v291_v33  ;;  %v336_v45 = vpop.f32.mrf.mxu2 }
  0xc5   :  { %v337_v46 = vadd.f32 %v3873_v44, %v336_v45 }
  0xc7   :  { %396 = vmatpush.msrb.mxu3 %v337_v46 }
  0xc8   :  { %514 = vrot.lane.b32.xlu1 %v291_v33, %s3632_s21  ;;  %401 = vrot.lane.b32.xlu0 %v291_v33, %s3633_s12  ;;  %v649_v33 = vrot.slane %v3812_v11, 3 }
 0x132   :  { %v517_v37 = vpop.permute.xlu1 %516  ;;  %v404_v38 = vpop.permute.xlu0 %403 }
 0x133   :  { %3190 = vmatpush.xpose.msk.msrb.mxu0 %vm339_vm8, %v404_v38  ;;  %v651_v38 = vrot.slane %v3821_v15, 2 }
 0x137   :  { %3195 = vmatpush.xpose.msk.msra.mxu0 %vm339_vm8, %v517_v37  ;;  %v648_v37 = vsel %vm262_vm4, %v647_v31, %v646_v32 }
 0x13a   :  { %v402_v39 = vpop.permute.xlu0 %401  ;;  %v515_v40 = vpop.permute.xlu1 %514 }
 0x13b   :  { %3191 = vmatmul.msk.f32.vlgmr.msrb.gmra.mxu0 %vm339_vm8, %v402_v39  ;;  %v650_v39 = vsel %vm265_vm5, %v649_v33, %v648_v37 }
 0x13c   :  { %688 = vmatpush.msrb.mxu0 %v3759_v0 }
 0x13e   :  { %689 = vmatpush.msrb.mxu0 %v3761_v1 }
 0x140   :  { %690 = vmatpush.msrb.mxu0 %v3770_v3 }
 0x143   :  { %3196 = vmatmul.msk.f32.vlgmr.msra.gmra.mxu0 %vm339_vm8, %v515_v40  ;;  %v652_v40 = vsel %vm268_vm6, %v651_v38, %v650_v39 }
 0x147   :  { %v363_v41 = vpop.f32.mrf.mxu3 }
 0x148   :  { %v366_v42 = vmul.f32 0.35355338, %v363_v41  ;;  %v3900_v41 = vld [vmem:[#allocation11] sm:$0xff] }
 0x149   :  { %509 = vmatpush.msra.mxu3 %v3900_v41 }
 0x14a   :  { %v367_v43 = vsel %vm339_vm8, %v366_v42, -inf }
 0x14b   :  { %368 = vmax.xlane.f32.xlu2 %v367_v43  ;;  %3200 = vmatmul.msk.f32.vlgmr.msrb.gmra.mxu0 %vm270_vm7, %v652_v40 }
 0x1b8   :  { %v426_v47 = vpop.f32.mrf.mxu0 }
 0x1b9   :  { %v429_v48 = vmul.f32 0.35355338, %v426_v47 }
 0x1bb   :  { %v430_v49 = vsel %vm339_vm8, %v429_v48, -inf }
 0x1bc   :  { %431 = vmax.xlane.f32.xlu0 %v430_v49 }
 0x1be   :  { %v369_v50 = vpop.xlane.xlu2 %368 }
 0x1bf   :  { %v370_v51 = vsub.f32 %v366_v42, %v369_v50 }
 0x1c0   :  { %v539_v52 = vpop.f32.mrf.mxu0 }
 0x1c1   :  { %v371_v53 = vmul.f32 1.442695, %v370_v51  ;;  %v542_v54 = vmul.f32 0.35355338, %v539_v52  ;;  %v3914_v51 = vld [vmem:[#allocation11 + $0x8] sm:$0xff] }
 0x1c2   :  { %486 = vmatpush.msrb.mxu2 %v3914_v51 }
 0x1c3   :  { %3280 = vpow2.f32 %v371_v53  ;;  %v543_v55 = vsel %vm339_vm8, %v542_v54, -inf }
 0x1c4   :  { %544 = vmax.xlane.f32.xlu1 %v543_v55 }
 0x1c8   :  { %v692_v52 = vpop.f32.mrf.mxu0 }
 0x1c9   :  { %v3281_v56 = vpop.eup %3280  ;;  %v693_v53 = vadd.f32 %v3843_v28, %v692_v52 }
 0x1ca   :  { %v373_v57 = vsel %vm339_vm8, %v3281_v56, 0.0 }
 0x1cb   :  { %374 = vadd.xlane.f32.xlu2 %v373_v57 }
 0x1d0   :  { %778 = vrot.lane.b32.xlu0 %v693_v53, %s3633_s12 }
 0x1e3   :  { %442 = vrot.lane.b32.xlu2 %v337_v46, %s3633_s12 }
 0x22f   :  { %v432_v58 = vpop.xlane.xlu0 %431 }
 0x230   :  { %v433_v59 = vsub.f32 %v429_v48, %v432_v58 }
 0x232   :  { %v434_v60 = vmul.f32 1.442695, %v433_v59 }
 0x234   :  { %3282 = vpow2.f32 %v434_v60 }
 0x237   :  { %v545_v61 = vpop.xlane.xlu1 %544 }
 0x238   :  { %v546_v62 = vsub.f32 %v542_v54, %v545_v61  ;;  %v3919_v54 = vld [vmem:[#allocation11 + $0x10] sm:$0xff] }
 0x239   :  { %598 = vmatpush.msra.mxu2 %v3919_v54 }
 0x23a   :  { %v3283_v63 = vpop.eup %3282  ;;  %v547_v12 = vmul.f32 1.442695, %v546_v62 }
 0x23b   :  { %v436_v13 = vsel %vm339_vm8, %v3283_v63, 0.0 }
 0x23c   :  { %3284 = vpow2.f32 %v547_v12  ;;  %437 = vadd.xlane.f32.xlu2 %v436_v13 }
 0x23e   :  { %v375_v14 = vpop.xlane.xlu2 %374 }
 0x23f   :  { %3286 = vrcp.f32 %v375_v14 }
 0x242   :  { %v3285_v16 = vpop.eup %3284  ;;  %v779_v60 = vpop.permute.xlu0 %778 }
 0x243   :  { %v549_v18 = vsel %vm339_vm8, %v3285_v16, 0.0  ;;  %3205 = vmatpush.xpose.msk.msra.mxu0 %vm339_vm8, %v779_v60 }
 0x244   :  { %550 = vadd.xlane.f32.xlu2 %v549_v18 }
 0x245   :  { %v3287_v19 = vpop.eup %3286 }
 0x246   :  { %v377_v20 = vmul.f32 %v3287_v19, %v3281_v56  ;;  %v443_v21 = vpop.permute.xlu2 %442 }
 0x247   :  { %463 = vmatpush.msrb.mxu1 %v443_v21 }
 0x248   :  { %3189 = vmatmul.msk.f32.vlgmr.msrb.gmra.mxu3 %vm339_vm8, %v377_v20 }
 0x249   :  { %668 = vmatpush.msrb.mxu3 %v3766_v2 }
 0x24b   :  { %669 = vmatpush.msrb.mxu3 %v3775_v4 }
 0x24d   :  { %670 = vmatpush.msrb.mxu3 %v3827_v17 }
 0x25c   :  { %554 = vrot.lane.b32.xlu2 %v337_v46, %s3632_s21 }
 0x264   :  { %891 = vrot.lane.b32.xlu2 %v693_v53, %s3632_s21 }
 0x2af   :  { %v438_v42 = vpop.xlane.xlu2 %437 }
 0x2b0   :  { %3288 = vrcp.f32 %v438_v42 }
 0x2b6   :  { %v3289_v43 = vpop.eup %3288 }
 0x2b7   :  { %v551_v45 = vpop.xlane.xlu2 %550  ;;  %v440_v46 = vmul.f32 %v3289_v43, %v3283_v63 }
 0x2b8   :  { %3290 = vrcp.f32 %v551_v45 }
 0x2b9   :  { %3192 = vmatmul.msk.f32.vlgmr.msrb.gmra.mxu1 %vm339_vm8, %v440_v46 }
 0x2be   :  { %v3291_v47 = vpop.eup %3290 }
 0x2bf   :  { %v553_v48 = vmul.f32 %v3291_v47, %v3285_v16  ;;  %v555_v49 = vpop.permute.xlu2 %554 }
 0x2c0   :  { %575 = vmatpush.msra.mxu1 %v555_v49 }
 0x2c1   :  { %3197 = vmatmul.msk.f32.vlgmr.msra.gmra.mxu1 %vm339_vm8, %v553_v48 }
 0x2c2   :  { %708 = vmatpush.msrb.mxu1 %v3855_v34 }
 0x2c4   :  { %709 = vmatpush.msrb.mxu1 %v3857_v35 }
 0x2c6   :  { %710 = vmatpush.msrb.mxu1 %v3860_v36 }
 0x2c7   :  { %v892_v61 = vpop.permute.xlu2 %891 }
 0x2c8   :  { %3210 = vmatpush.xpose.msk.msrb.mxu0 %vm339_vm8, %v892_v61  ;;  %v1015_v61 = vrot.slane %v3795_v8, 7 }
 0x2c9   :  { %3201 = vmatmul.msk.f32.vlgmr.msrb.gmra.mxu1 %vm270_vm7, %v652_v40 }
 0x2cb   :  { %v398_v50 = vpop.f32.mrf.mxu3 }
 0x2cc   :  { %3194 = vmatmul.msk.f32.vlgmr.msra.gmra.mxu3 %vm339_vm8, %v398_v50 }
 0x2d4   :  { %3199 = vmatmul.msk.f32.vlgmr.msrb.gmra.mxu3 %vm270_vm7, %v652_v40 }
 0x336   :  { %v465_v55 = vpop.f32.mrf.mxu1 }
 0x337   :  { %3193 = vmatmul.msk.f32.vlgmr.msrb.gmra.mxu2 %vm339_vm8, %v465_v55 }
 0x338   :  { %3202 = vmatpush.xpose.msk.msrb.mxu2 %vm339_vm8, %v693_v53 }
 0x33e   :  { %v577_v56 = vpop.f32.mrf.mxu1 }
 0x33f   :  { %3198 = vmatmul.msk.f32.vlgmr.msra.gmra.mxu2 %vm339_vm8, %v577_v56 }
 0x340   :  { %861 = vmatpush.msra.mxu2 %v3914_v51 }
 0x346   :  { %v712_v37 = vpop.f32.mrf.mxu1 }
 0x347   :  { %v713_v38 = vadd.f32 %v3873_v44, %v712_v37 }
 0x349   :  { %771 = vmatpush.msra.mxu3 %v713_v38 }
 0x34b   :  { %884 = vmatpush.msrb.mxu3 %v3900_v41 }
 0x34f   :  { %v511_v57 = vpop.f32.mrf.mxu3 }
 0x357   :  { %v672_v58 = vpop.f32.mrf.mxu3 }
 0x358   :  { %v673_v59 = vadd.f32 %v3845_v29, %v672_v58  ;;  %v1012_v58 = vrot.slane %v3785_v6, 1 }
 0x35a   :  { %889 = vrot.lane.b32.xlu2 %v673_v59, %s3632_s21  ;;  %776 = vrot.lane.b32.xlu1 %v673_v59, %s3633_s12 }
 0x35b   :  { %3203 = vmatmul.msk.f32.vlgmr.msrb.gmra.mxu2 %vm339_vm8, %v673_v59 }
 0x35c   :  { %973 = vmatpush.msrb.mxu2 %v3919_v54 }
 0x3b4   :  { %v890_v16 = vpop.permute.xlu2 %889 }
 0x3ba   :  { %v488_v62 = vpop.f32.mrf.mxu2 }
 0x3bb   :  { %v512_v63 = vadd.f32 %v511_v57, %v488_v62  ;;  %v1011_v57 = vrot.slane %v3780_v5, 2 }
 0x3bd   :  { %v1013_v60 = vsel %vm250_vm0, %v1012_v58, %v1011_v57 }
 0x3be   :  { %v1014_v62 = vsel %vm253_vm1, %v3790_v7, %v1013_v60 }
 0x3c2   :  { %v600_v12 = vpop.f32.mrf.mxu2 }
 0x3c3   :  { %v3934_v13 = vadd.f32 %v600_v12, %v512_v63  ;;  %v1017_v63 = vrot.slane %v3802_v9, 6  ;;  %v1019_v12 = vrot.slane %v3807_v10, 5 }
 0x3cc   :  { %v777_v14 = vpop.permute.xlu1 %776 }
 0x3cd   :  { %3206 = vmatmul.msk.f32.vlgmr.msra.gmra.mxu0 %vm339_vm8, %v777_v14  ;;  %v1021_v14 = vrot.slane %v3812_v11, 4 }
 0x3ce   :  { %1060 = vmatpush.msra.mxu0 %v3759_v0 }
 0x3d0   :  { %1061 = vmatpush.msra.mxu0 %v3761_v1 }
 0x3d2   :  { %1062 = vmatpush.msra.mxu0 %v3770_v3 }
 0x3d5   :  { %3211 = vmatmul.msk.f32.vlgmr.msrb.gmra.mxu0 %vm339_vm8, %v890_v16  ;;  %v1016_v16 = vsel %vm256_vm2, %v1015_v61, %v1014_v62 }
 0x3de   :  { %v738_v18 = vpop.f32.mrf.mxu2 }
 0x3df   :  { %v741_v19 = vmul.f32 0.35355338, %v738_v18  ;;  %v1023_v18 = vrot.slane %v3821_v15, 3 }
 0x3e1   :  { %v742_v20 = vsel %vm339_vm8, %v741_v19, -inf }
 0x3e2   :  { %743 = vmax.xlane.f32.xlu0 %v742_v20 }
 0x44a   :  { %v801_v21 = vpop.f32.mrf.mxu0 }
 0x44b   :  { %v804_v22 = vmul.f32 0.35355338, %v801_v21 }
 0x44d   :  { %v805_v23 = vsel %vm339_vm8, %v804_v22, -inf }
 0x44e   :  { %806 = vmax.xlane.f32.xlu1 %v805_v23 }
 0x452   :  { %v914_v24 = vpop.f32.mrf.mxu0 }
 0x453   :  { %v917_v25 = vmul.f32 0.35355338, %v914_v24 }
 0x455   :  { %v744_v26 = vpop.xlane.xlu0 %743  ;;  %v918_v27 = vsel %vm339_vm8, %v917_v25, -inf }
 0x456   :  { %v745_v30 = vsub.f32 %v741_v19, %v744_v26  ;;  %919 = vmax.xlane.f32.xlu0 %v918_v27  ;;  %v1018_v19 = vsel %vm259_vm3, %v1017_v63, %v1016_v16 }
 0x457   :  { %v1020_v20 = vsel %vm262_vm4, %v1019_v12, %v1018_v19 }
 0x458   :  { %v746_v31 = vmul.f32 1.442695, %v745_v30  ;;  %v1022_v21 = vsel %vm265_vm5, %v1021_v14, %v1020_v20 }
 0x459   :  { %v1024_v23 = vsel %vm268_vm6, %v1023_v18, %v1022_v21 }
 0x45a   :  { %3292 = vpow2.f32 %v746_v31  ;;  %3215 = vmatmul.msk.f32.vlgmr.msra.gmra.mxu0 %vm270_vm7, %v1024_v23 }
 0x460   :  { %v3293_v32 = vpop.eup %3292 }
 0x461   :  { %v748_v33 = vsel %vm339_vm8, %v3293_v32, 0.0 }
 0x462   :  { %749 = vadd.xlane.f32.xlu2 %v748_v33 }
 0x46a   :  { %817 = vrot.lane.b32.xlu0 %v713_v38, %s3633_s12 }
 0x4c1   :  { %v807_v39 = vpop.xlane.xlu1 %806 }
 0x4c2   :  { %v808_v40 = vsub.f32 %v804_v22, %v807_v39 }
 0x4c4   :  { %v809_v42 = vmul.f32 1.442695, %v808_v40 }
 0x4c6   :  { %3294 = vpow2.f32 %v809_v42 }
 0x4c9   :  { %v920_v43 = vpop.xlane.xlu0 %919 }
 0x4ca   :  { %v921_v45 = vsub.f32 %v917_v25, %v920_v43 }
 0x4cc   :  { %v3295_v46 = vpop.eup %3294  ;;  %v922_v47 = vmul.f32 1.442695, %v921_v45 }
 0x4cd   :  { %v811_v48 = vsel %vm339_vm8, %v3295_v46, 0.0 }
 0x4ce   :  { %3296 = vpow2.f32 %v922_v47  ;;  %812 = vadd.xlane.f32.xlu2 %v811_v48 }
 0x4d4   :  { %v3297_v49 = vpop.eup %3296 }
 0x4d5   :  { %v750_v50 = vpop.xlane.xlu2 %749  ;;  %v924_v52 = vsel %vm339_vm8, %v3297_v49, 0.0 }
 0x4d6   :  { %3298 = vrcp.f32 %v750_v50  ;;  %925 = vadd.xlane.f32.xlu1 %v924_v52 }
 0x4dc   :  { %v3299_v53 = vpop.eup %3298  ;;  %v818_v56 = vpop.permute.xlu0 %817 }
 0x4dd   :  { %v752_v55 = vmul.f32 %v3299_v53, %v3293_v32  ;;  %838 = vmatpush.msra.mxu1 %v818_v56  ;;  %v1064_v32 = vpop.f32.mrf.mxu0 }
 0x4de   :  { %v1065_v33 = vadd.f32 %v3843_v28, %v1064_v32 }
 0x4df   :  { %3204 = vmatmul.msk.f32.vlgmr.msra.gmra.mxu3 %vm339_vm8, %v752_v55 }
 0x4e0   :  { %1040 = vmatpush.msra.mxu3 %v3766_v2 }
 0x4e2   :  { %1041 = vmatpush.msra.mxu3 %v3775_v4 }
 0x4e4   :  { %1042 = vmatpush.msra.mxu3 %v3827_v17 }
 0x4e6   :  { %929 = vrot.lane.b32.xlu2 %v713_v38, %s3632_s21 }
 0x4ef   :  { %1150 = vrot.lane.b32.xlu1 %v1065_v33, %s3633_s12 }
 0x541   :  { %v813_v59 = vpop.xlane.xlu2 %812 }
 0x542   :  { %3300 = vrcp.f32 %v813_v59 }
 0x548   :  { %v3301_v22 = vpop.eup %3300 }
 0x549   :  { %v815_v24 = vmul.f32 %v3301_v22, %v3295_v46  ;;  %v926_v25 = vpop.xlane.xlu1 %925  ;;  %v930_v26 = vpop.permute.xlu2 %929 }
 0x54a   :  { %3302 = vrcp.f32 %v926_v25  ;;  %950 = vmatpush.msrb.mxu1 %v930_v26 }
 0x54b   :  { %3207 = vmatmul.msk.f32.vlgmr.msra.gmra.mxu1 %vm339_vm8, %v815_v24 }
 0x54c   :  { %1080 = vmatpush.msra.mxu1 %v3855_v34 }
 0x54e   :  { %1081 = vmatpush.msra.mxu1 %v3857_v35 }
 0x550   :  { %v3303_v27 = vpop.eup %3302  ;;  %1082 = vmatpush.msra.mxu1 %v3860_v36 }
 0x551   :  { %v928_v30 = vmul.f32 %v3303_v27, %v3297_v49 }
 0x553   :  { %3212 = vmatmul.msk.f32.vlgmr.msrb.gmra.mxu1 %vm339_vm8, %v928_v30 }
 0x55b   :  { %3216 = vmatmul.msk.f32.vlgmr.msra.gmra.mxu1 %vm270_vm7, %v1024_v23 }
 0x561   :  { %v1151_v43 = vpop.permute.xlu1 %1150 }
 0x562   :  { %v773_v31 = vpop.f32.mrf.mxu3  ;;  %3220 = vmatpush.xpose.msk.msrb.mxu0 %vm339_vm8, %v1151_v43 }
 0x563   :  { %3209 = vmatmul.msk.f32.vlgmr.msrb.gmra.mxu3 %vm339_vm8, %v773_v31 }
 0x56b   :  { %3214 = vmatmul.msk.f32.vlgmr.msra.gmra.mxu3 %vm270_vm7, %v1024_v23 }
 0x5c8   :  { %v840_v37 = vpop.f32.mrf.mxu1 }
 0x5c9   :  { %3208 = vmatmul.msk.f32.vlgmr.msra.gmra.mxu2 %vm339_vm8, %v840_v37  ;;  %v1383_v37 = vrot.slane %v3780_v5, 3 }
 0x5ca   :  { %3217 = vmatpush.xpose.msk.msra.mxu2 %vm339_vm8, %v1065_v33 }
 0x5d0   :  { %v952_v38 = vpop.f32.mrf.mxu1 }
 0x5d1   :  { %3213 = vmatmul.msk.f32.vlgmr.msrb.gmra.mxu2 %vm339_vm8, %v952_v38  ;;  %v1384_v38 = vrot.slane %v3785_v6, 2 }
 0x5d2   :  { %1233 = vmatpush.msrb.mxu2 %v3914_v51 }
 0x5d8   :  { %v1084_v14 = vpop.f32.mrf.mxu1 }
 0x5d9   :  { %v1085_v16 = vadd.f32 %v3873_v44, %v1084_v14 }
 0x5db   :  { %1143 = vmatpush.msrb.mxu3 %v1085_v16 }
 0x5dd   :  { %1256 = vmatpush.msra.mxu3 %v3900_v41 }
 0x5e6   :  { %v886_v39 = vpop.f32.mrf.mxu3 }
 0x5ee   :  { %v1044_v40 = vpop.f32.mrf.mxu3 }
 0x5ef   :  { %v1045_v42 = vadd.f32 %v3845_v29, %v1044_v40  ;;  %v1389_v40 = vrot.slane %v3802_v9, 7 }
 0x5f1   :  { %1261 = vrot.lane.b32.xlu1 %v1045_v42, %s3632_s21  ;;  %1148 = vrot.lane.b32.xlu0 %v1045_v42, %s3633_s12 }
 0x5f2   :  { %3218 = vmatmul.msk.f32.vlgmr.msra.gmra.mxu2 %vm339_vm8, %v1045_v42  ;;  %v1385_v42 = vsel %vm250_vm0, %v1384_v38, %v1383_v37 }
 0x5f3   :  { %1345 = vmatpush.msra.mxu2 %v3919_v54 }
 0x5f9   :  { %1263 = vrot.lane.b32.xlu0 %v1065_v33, %s3632_s21 }
 0x64c   :  { %v863_v45 = vpop.f32.mrf.mxu2 }
 0x64d   :  { %v887_v46 = vadd.f32 %v886_v39, %v863_v45  ;;  %v1386_v39 = vrot.slane %v3790_v7, 1  ;;  %v1395_v45 = vrot.slane %v3821_v15, 4 }
 0x654   :  { %v975_v47 = vpop.f32.mrf.mxu2 }
 0x655   :  { %v3992_v48 = vadd.f32 %v975_v47, %v887_v46 }
 0x657   :  { %v981_v38 = vrot.slane %v3992_v48, 1 }
 0x663   :  { %v1149_v49 = vpop.permute.xlu0 %1148  ;;  %v1262_v52 = vpop.permute.xlu1 %1261 }
 0x664   :  { %3221 = vmatmul.msk.f32.vlgmr.msrb.gmra.mxu0 %vm339_vm8, %v1149_v49 }
 0x66b   :  { %v1264_v50 = vpop.permute.xlu0 %1263 }
 0x66c   :  { %3225 = vmatpush.xpose.msk.msra.mxu0 %vm339_vm8, %v1264_v50 }
 0x66f   :  { %3226 = vmatmul.msk.f32.vlgmr.msra.gmra.mxu0 %vm339_vm8, %v1262_v52 }
 0x670   :  { %1432 = vmatpush.msrb.mxu0 %v3759_v0 }
 0x672   :  { %1433 = vmatpush.msrb.mxu0 %v3761_v1 }
 0x674   :  { %1434 = vmatpush.msrb.mxu0 %v3770_v3 }
 0x675   :  { %v1110_v53 = vpop.f32.mrf.mxu2 }
 0x676   :  { %v1113_v55 = vmul.f32 0.35355338, %v1110_v53 }
 0x678   :  { %v1114_v56 = vsel %vm339_vm8, %v1113_v55, -inf }
 0x679   :  { %1115 = vmax.xlane.f32.xlu2 %v1114_v56 }
 0x6e1   :  { %v1173_v57 = vpop.f32.mrf.mxu0 }
 0x6e2   :  { %v1176_v58 = vmul.f32 0.35355338, %v1173_v57 }
 0x6e4   :  { %v1177_v59 = vsel %vm339_vm8, %v1176_v58, -inf }
 0x6e5   :  { %1178 = vmax.xlane.f32.xlu1 %v1177_v59 }
 0x6ec   :  { %v1116_v60 = vpop.xlane.xlu2 %1115  ;;  %v1286_v61 = vpop.f32.mrf.mxu0 }
 0x6ed   :  { %v1117_v0 = vsub.f32 %v1113_v55, %v1116_v60  ;;  %v1289_v62 = vmul.f32 0.35355338, %v1286_v61 }
 0x6ef   :  { %v1118_v63 = vmul.f32 1.442695, %v1117_v0  ;;  %v1290_v12 = vsel %vm339_vm8, %v1289_v62, -inf }
 0x6f0   :  { %1291 = vmax.xlane.f32.xlu2 %v1290_v12 }
 0x6f1   :  { %3304 = vpow2.f32 %v1118_v63 }
 0x6f7   :  { %v3305_v1 = vpop.eup %3304 }
 0x6f8   :  { %v1120_v3 = vsel %vm339_vm8, %v3305_v1, 0.0 }
 0x6f9   :  { %1121 = vadd.xlane.f32.xlu0 %v1120_v3 }
 0x6fe   :  { %1189 = vrot.lane.b32.xlu1 %v1085_v16, %s3633_s12 }
 0x758   :  { %v1179_v18 = vpop.xlane.xlu1 %1178 }
 0x759   :  { %v1180_v19 = vsub.f32 %v1176_v58, %v1179_v18 }
 0x75b   :  { %v1181_v20 = vmul.f32 1.442695, %v1180_v19 }
 0x75d   :  { %3306 = vpow2.f32 %v1181_v20 }
 0x763   :  { %v3307_v21 = vpop.eup %3306  ;;  %v1292_v22 = vpop.xlane.xlu2 %1291 }
 0x764   :  { %v1293_v23 = vsub.f32 %v1289_v62, %v1292_v22  ;;  %v1183_v24 = vsel %vm339_vm8, %v3307_v21, 0.0 }
 0x765   :  { %1184 = vadd.xlane.f32.xlu2 %v1183_v24 }
 0x766   :  { %v1294_v25 = vmul.f32 1.442695, %v1293_v23 }
 0x768   :  { %3308 = vpow2.f32 %v1294_v25 }
 0x76c   :  { %v1122_v26 = vpop.xlane.xlu0 %1121 }
 0x76d   :  { %3310 = vrcp.f32 %v1122_v26 }
 0x76e   :  { %v3309_v27 = vpop.eup %3308 }
 0x76f   :  { %v1296_v30 = vsel %vm339_vm8, %v3309_v27, 0.0 }
 0x770   :  { %1297 = vadd.xlane.f32.xlu0 %v1296_v30  ;;  %v1190_v33 = vpop.permute.xlu1 %1189 }
 0x771   :  { %1210 = vmatpush.msrb.mxu1 %v1190_v33 }
 0x773   :  { %v3311_v31 = vpop.eup %3310 }
 0x774   :  { %v1124_v32 = vmul.f32 %v3311_v31, %v3305_v1 }
 0x776   :  { %3219 = vmatmul.msk.f32.vlgmr.msrb.gmra.mxu3 %vm339_vm8, %v1124_v32 }
 0x777   :  { %1412 = vmatpush.msrb.mxu3 %v3766_v2  ;;  %v1391_v2 = vrot.slane %v3807_v10, 6 }
 0x779   :  { %1413 = vmatpush.msrb.mxu3 %v3775_v4  ;;  %v1387_v4 = vsel %vm253_vm1, %v1386_v39, %v1385_v42  ;;  %v980_v39 = vrot.slane %v3992_v48, 7 }
 0x77a   :  { %v1388_v43 = vsel %vm256_vm2, %v3795_v8, %v1387_v4 }
 0x77b   :  { %1414 = vmatpush.msrb.mxu3 %v3827_v17  ;;  %v1393_v17 = vrot.slane %v3812_v11, 5  ;;  %v1390_v46 = vsel %vm259_vm3, %v1389_v40, %v1388_v43  ;;  %v996_v40 = vadd.f32 %v3992_v48, %v3785_v6  ;;  %v995_v43 = vadd.f32 %v980_v39, %v3780_v5 }
 0x77c   :  { %v1392_v47 = vsel %vm262_vm4, %v1391_v2, %v1390_v46  ;;  %v4074_v2 = vld [vmem:[#allocation13] ss:$0 sm:$0xff] }
 0x77d   :  { %1301 = vrot.lane.b32.xlu2 %v1085_v16, %s3632_s21  ;;  %v1394_v49 = vsel %vm265_vm5, %v1393_v17, %v1392_v47  ;;  %v997_v17 = vadd.f32 %v981_v38, %v3790_v7  ;;  %v983_v47 = vrot.slane %v3992_v48, 3 }
 0x77e   :  { %v1396_v50 = vsel %vm268_vm6, %v1395_v45, %v1394_v49  ;;  %v4080_v45 = vadd.f32 %v4074_v2, %v996_v40 }
 0x77f   :  { %3230 = vmatmul.msk.f32.vlgmr.msrb.gmra.mxu0 %vm270_vm7, %v1396_v50  ;;  %v4085_v49 = vadd.f32 %v4074_v2, %v997_v17 }
 0x7d8   :  { %v1185_v52 = vpop.xlane.xlu2 %1184 }
 0x7d9   :  { %3312 = vrcp.f32 %v1185_v52  ;;  %v1790_v52 = vrot.slane %v4080_v45, 7 }
 0x7df   :  { %v3313_v53 = vpop.eup %3312 }
 0x7e0   :  { %v1187_v55 = vmul.f32 %v3313_v53, %v3307_v21  ;;  %v1302_v56 = vpop.permute.xlu2 %1301 }
 0x7e1   :  { %1322 = vmatpush.msra.mxu1 %v1302_v56 }
 0x7e2   :  { %3222 = vmatmul.msk.f32.vlgmr.msrb.gmra.mxu1 %vm339_vm8, %v1187_v55  ;;  %v984_v55 = vrot.slane %v3992_v48, 4 }
 0x7e3   :  { %v1298_v57 = vpop.xlane.xlu0 %1297  ;;  %1452 = vmatpush.msrb.mxu1 %v3855_v34 }
 0x7e4   :  { %3314 = vrcp.f32 %v1298_v57 }
 0x7e5   :  { %1453 = vmatpush.msrb.mxu1 %v3857_v35 }
 0x7e7   :  { %1454 = vmatpush.msrb.mxu1 %v3860_v36 }
 0x7ea   :  { %v3315_v58 = vpop.eup %3314 }
 0x7eb   :  { %v1300_v59 = vmul.f32 %v3315_v58, %v3309_v27  ;;  %v999_v58 = vadd.f32 %v983_v47, %v3802_v9 }
 0x7ed   :  { %3227 = vmatmul.msk.f32.vlgmr.msra.gmra.mxu1 %vm339_vm8, %v1300_v59  ;;  %v1792_v59 = vrot.slane %v4085_v49, 6  ;;  %v4107_v9 = vadd.f32 %v4074_v2, %v999_v58  ;;  %v4179_v58 = vld [vmem:[%s5536_s27 + $0x10] sm:$0xf] }
 0x7f5   :  { %3231 = vmatmul.msk.f32.vlgmr.msrb.gmra.mxu1 %vm270_vm7, %v1396_v50 }
 0x7f9   :  { %v1145_v60 = vpop.f32.mrf.mxu3 }
 0x7fa   :  { %3224 = vmatmul.msk.f32.vlgmr.msra.gmra.mxu3 %vm339_vm8, %v1145_v60 }
 0x7fc   :  { %v1436_v61 = vpop.f32.mrf.mxu0 }
 0x7fd   :  { %v1437_v0 = vadd.f32 %v3843_v28, %v1436_v61 }
 0x7ff   :  { %1522 = vrot.lane.b32.xlu0 %v1437_v0, %s3633_s12 }
 0x802   :  { %3229 = vmatmul.msk.f32.vlgmr.msrb.gmra.mxu3 %vm270_vm7, %v1396_v50  ;;  %v4088_v50 = vadd.f32 %v4074_v2, %v995_v43  ;;  %v608_v43 = vrot.slane %v3934_v13, 4 }
 0x804   :  { %v1791_v60 = vsel %vm253_vm1, %v1790_v52, %v4088_v50 }
 0x807   :  { %1635 = vrot.lane.b32.xlu0 %v1437_v0, %s3632_s21 }
 0x85f   :  { %v1212_v34 = vpop.f32.mrf.mxu1 }
 0x860   :  { %3223 = vmatmul.msk.f32.vlgmr.msrb.gmra.mxu2 %vm339_vm8, %v1212_v34  ;;  %v985_v34 = vrot.slane %v3992_v48, 5 }
 0x861   :  { %3232 = vmatpush.xpose.msk.msrb.mxu2 %vm339_vm8, %v1437_v0 }
 0x86a   :  { %v1324_v35 = vpop.f32.mrf.mxu1 }
 0x86b   :  { %3228 = vmatmul.msk.f32.vlgmr.msra.gmra.mxu2 %vm339_vm8, %v1324_v35 }
 0x86c   :  { %1605 = vmatpush.msra.mxu2 %v3914_v51 }
 0x871   :  { %v1523_v28 = vpop.permute.xlu0 %1522 }
 0x872   :  { %3235 = vmatpush.xpose.msk.msra.mxu0 %vm339_vm8, %v1523_v28  ;;  %v1456_v33 = vpop.f32.mrf.mxu1 }
 0x873   :  { %v4064_v37 = vadd.f32 %v3873_v44, %v1456_v33  ;;  %v982_v44 = vrot.slane %v3992_v48, 2 }
 0x875   :  { %1515 = vmatpush.msra.mxu3 %v4064_v37  ;;  %v998_v46 = vadd.f32 %v982_v44, %v3795_v8 }
 0x877   :  { %1628 = vmatpush.msrb.mxu3 %v3900_v41  ;;  %v4093_v56 = vadd.f32 %v4074_v2, %v998_v46 }
 0x879   :  { %v1636_v12 = vpop.permute.xlu0 %1635 }
 0x87a   :  { %3240 = vmatpush.xpose.msk.msrb.mxu0 %vm339_vm8, %v1636_v12  ;;  %v1001_v12 = vadd.f32 %v985_v34, %v3812_v11 }
 0x87d   :  { %v1258_v36 = vpop.f32.mrf.mxu3 }
 0x885   :  { %v1416_v62 = vpop.f32.mrf.mxu3 }
 0x886   :  { %v1417_v63 = vadd.f32 %v3845_v29, %v1416_v62  ;;  %v1794_v62 = vrot.slane %v4093_v56, 5 }
 0x888   :  { %1633 = vrot.lane.b32.xlu2 %v1417_v63, %s3632_s21  ;;  %1520 = vrot.lane.b32.xlu1 %v1417_v63, %s3633_s12 }
 0x889   :  { %3233 = vmatmul.msk.f32.vlgmr.msrb.gmra.mxu2 %vm339_vm8, %v1417_v63  ;;  %v1793_v63 = vsel %vm256_vm2, %v1792_v59, %v1791_v60 }
 0x88a   :  { %1717 = vmatpush.msrb.mxu2 %v3919_v54 }
 0x8e2   :  { %v1634_v16 = vpop.permute.xlu2 %1633 }
 0x8e3   :  { %v1235_v1 = vpop.f32.mrf.mxu2 }
 0x8e4   :  { %v1259_v51 = vadd.f32 %v1258_v36, %v1235_v1  ;;  %v1000_v36 = vadd.f32 %v984_v55, %v3807_v10  ;;  %v605_v1 = vrot.slane %v3934_v13, 1  ;;  %v1795_v10 = vsel %vm259_vm3, %v1794_v62, %v1793_v63  ;;  %v4198_v63 = vld [vmem:[%s5536_s27 + $0x14] sm:$0xf] }
 0x8ee   :  { %v1347_v3 = vpop.f32.mrf.mxu2 }
 0x8ef   :  { %v4052_v14 = vadd.f32 %v1347_v3, %v1259_v51  ;;  %v4114_v51 = vadd.f32 %v4074_v2, %v1000_v36  ;;  %v1796_v3 = vrot.slane %v4107_v9, 4  ;;  %v624_v36 = vadd.f32 %v4179_v58, %v608_v43 }
 0x8f1   :  { %v1353_v28 = vrot.slane %v4052_v14, 7  ;;  %v1797_v11 = vsel %vm262_vm4, %v1796_v3, %v1795_v10  ;;  %v1355_v40 = vrot.slane %v4052_v14, 2  ;;  %v1356_v46 = vrot.slane %v4052_v14, 3 }
 0x8f3   :  { %v1371_v59 = vadd.f32 %v4179_v58, %v1355_v40 }
 0x8f5   :  { %v4208_v3 = vadd.f32 %v4074_v2, %v1371_v59 }
 0x8fa   :  { %v1521_v29 = vpop.permute.xlu1 %1520 }
 0x8fb   :  { %3236 = vmatmul.msk.f32.vlgmr.msra.gmra.mxu0 %vm339_vm8, %v1521_v29  ;;  %v1368_v29 = vadd.f32 %v1353_v28, %v3785_v6  ;;  %v1372_v28 = vadd.f32 %v4198_v63, %v1356_v46 }
 0x903   :  { %3241 = vmatmul.msk.f32.vlgmr.msrb.gmra.mxu0 %vm339_vm8, %v1634_v16  ;;  %v606_v16 = vrot.slane %v3934_v13, 2 }
 0x90c   :  { %v1482_v18 = vpop.f32.mrf.mxu2 }
 0x90d   :  { %v1485_v19 = vmul.f32 0.35355338, %v1482_v18 }
 0x90f   :  { %v1486_v54 = vsel %vm339_vm8, %v1485_v19, -inf }
 0x910   :  { %1487 = vmax.xlane.f32.xlu1 %v1486_v54  ;;  %v1352_v54 = vrot.slane %v4052_v14, 6 }
 0x912   :  { %v1367_v33 = vadd.f32 %v1352_v54, %v3780_v5 }
 0x978   :  { %v1545_v20 = vpop.f32.mrf.mxu0 }
 0x979   :  { %v1548_v21 = vmul.f32 0.35355338, %v1545_v20  ;;  %v621_v20 = vadd.f32 %v605_v1, %v3785_v6  ;;  %v1369_v6 = vadd.f32 %v4052_v14, %v3790_v7 }
 0x97b   :  { %v1549_v22 = vsel %vm339_vm8, %v1548_v21, -inf  ;;  %v4144_v38 = vadd.f32 %v4074_v2, %v621_v20  ;;  %v4154_v17 = vadd.f32 %v4074_v2, %v1369_v6  ;;  %v4215_v20 = vadd.f32 %v4074_v2, %v624_v36 }
 0x97c   :  { %1550 = vmax.xlane.f32.xlu0 %v1549_v22  ;;  %v1835_v6 = vrot.slane %v4208_v3, 4 }
 0x97d   :  { %v1763_v52 = vrot.slane %v4144_v38, 7 }
 0x980   :  { %v1658_v23 = vpop.f32.mrf.mxu0 }
 0x981   :  { %v1661_v24 = vmul.f32 0.35355338, %v1658_v23  ;;  %v1798_v23 = vrot.slane %v4114_v51, 3 }
 0x983   :  { %v1488_v25 = vpop.xlane.xlu1 %1487  ;;  %v1662_v26 = vsel %vm339_vm8, %v1661_v24, -inf }
 0x984   :  { %v1489_v27 = vsub.f32 %v1485_v19, %v1488_v25  ;;  %1663 = vmax.xlane.f32.xlu2 %v1662_v26  ;;  %v4123_v19 = vadd.f32 %v4074_v2, %v1001_v12  ;;  %v1354_v25 = vrot.slane %v4052_v14, 1  ;;  %v4134_v26 = vadd.f32 %v4074_v2, %v1368_v29 }
 0x986   :  { %v1490_v30 = vmul.f32 1.442695, %v1489_v27  ;;  %v1799_v27 = vsel %vm265_vm5, %v1798_v23, %v1797_v11 }
 0x988   :  { %3316 = vpow2.f32 %v1490_v30  ;;  %v622_v30 = vadd.f32 %v606_v16, %v3790_v7  ;;  %v1370_v7 = vadd.f32 %v1354_v25, %v3795_v8  ;;  %v4167_v8 = vld [vmem:[%s5536_s27 + $0xc] sm:$0xf]  ;;  %v610_v16 = vrot.slane %v3934_v13, 6 }
 0x98a   :  { %v4183_v60 = vadd.f32 %v4074_v2, %v1370_v7 }
 0x98c   :  { %v1833_v11 = vrot.slane %v4183_v60, 5 }
 0x98e   :  { %v4059_v31 = vpop.eup %3316 }
 0x98f   :  { %v1492_v32 = vsel %vm339_vm8, %v4059_v31, 0.0 }
 0x990   :  { %1493 = vadd.xlane.f32.xlu1 %v1492_v32  ;;  %v1800_v32 = vrot.slane %v4123_v19, 2 }
 0x992   :  { %v1801_v44 = vsel %vm268_vm6, %v1800_v32, %v1799_v27 }
 0x993   :  { %v1806_v55 = vsel %vm1805_vm9, %v1801_v44, 0.0 }
 0x9a9   :  { %1561 = vrot.lane.b32.xlu1 %v4064_v37, %s3633_s12 }
 0x9ef   :  { %v1551_v42 = vpop.xlane.xlu0 %1550 }
 0x9f0   :  { %v1552_v4 = vsub.f32 %v1548_v21, %v1551_v42  ;;  %v620_v42 = vadd.f32 %v3934_v13, %v3780_v5  ;;  %v4162_v5 = vadd.f32 %v4074_v2, %v1367_v33 }
 0x9f2   :  { %v1553_v41 = vmul.f32 1.442695, %v1552_v4  ;;  %v1829_v4 = vrot.slane %v4134_v26, 7  ;;  %v4189_v34 = vadd.f32 %v4074_v2, %v620_v42  ;;  %v4244_v42 = vld [vmem:[%s5536_s27 + $0x1c] sm:$0xf] }
 0x9f4   :  { %3318 = vpow2.f32 %v1553_v41  ;;  %v4158_v41 = vadd.f32 %v4074_v2, %v622_v30  ;;  %v1764_v1 = vsel %vm250_vm0, %v1763_v52, %v4189_v34  ;;  %v4229_v30 = vld [vmem:[%s5536_s27 + $0x18] sm:$0xf] }
 0x9f5   :  { %v626_v32 = vadd.f32 %v4229_v30, %v610_v16 }
 0x9f6   :  { %v1765_v62 = vrot.slane %v4158_v41, 6 }
 0x9f7   :  { %v1664_v53 = vpop.xlane.xlu2 %1663 }
 0x9f8   :  { %v1665_v57 = vsub.f32 %v1661_v24, %v1664_v53  ;;  %v986_v24 = vrot.slane %v3992_v48, 6  ;;  %v607_v48 = vrot.slane %v3934_v13, 3 }
 0x9fa   :  { %v4099_v61 = vpop.eup %3318  ;;  %v1666_v0 = vmul.f32 1.442695, %v1665_v57  ;;  %v1002_v39 = vadd.f32 %v986_v24, %v3821_v15  ;;  %v623_v47 = vadd.f32 %v4167_v8, %v607_v48  ;;  %v611_v24 = vrot.slane %v3934_v13, 7 }
 0x9fb   :  { %v1555_v35 = vsel %vm339_vm8, %v4099_v61, 0.0 }
 0x9fc   :  { %3320 = vpow2.f32 %v1666_v0  ;;  %1556 = vadd.xlane.f32.xlu2 %v1555_v35  ;;  %v4174_v57 = vadd.f32 %v4074_v2, %v1002_v39  ;;  %v1830_v0 = vsel %vm256_vm2, %v1829_v4, %v4162_v5  ;;  %v1831_v35 = vrot.slane %v4154_v17, 6 }
 0x9fd   :  { %v4202_v12 = vadd.f32 %v4074_v2, %v623_v47  ;;  %v1769_v39 = vrot.slane %v4215_v20, 4  ;;  %v627_v44 = vadd.f32 %v4244_v42, %v611_v24 }
 0x9fe   :  { %v1802_v10 = vrot.slane %v4174_v57, 1  ;;  %v1832_v29 = vsel %vm259_vm3, %v1831_v35, %v1830_v0  ;;  %v1358_v35 = vrot.slane %v4052_v14, 5 }
 0x9ff   :  { %v1834_v23 = vsel %vm262_vm4, %v1833_v11, %v1832_v29  ;;  %v1767_v25 = vrot.slane %v4202_v12, 5 }
 0xa00   :  { %v1810_v27 = vsel %vm1809_vm10, %v1802_v10, 0.0  ;;  %v1836_v48 = vsel %vm265_vm5, %v1835_v6, %v1834_v23 }
 0xa02   :  { %v4120_v18 = vpop.eup %3320 }
 0xa03   :  { %v1494_v21 = vpop.xlane.xlu1 %1493  ;;  %v1668_v22 = vsel %vm339_vm8, %v4120_v18, 0.0 }
 0xa04   :  { %3322 = vrcp.f32 %v1494_v21  ;;  %1669 = vadd.xlane.f32.xlu0 %v1668_v22  ;;  %v1766_v21 = vsel %vm253_vm1, %v1765_v62, %v1764_v1  ;;  %v4219_v22 = vadd.f32 %v4074_v2, %v1372_v28  ;;  %v1374_v62 = vadd.f32 %v4244_v42, %v1358_v35  ;;  %v3339_v35 = vld [vmem:[%s5536_s27] sm:$0xf] }
 0xa06   :  { %v1837_v40 = vrot.slane %v4219_v22, 3  ;;  %v4271_v1 = vadd.f32 %v4074_v2, %v1374_v62  ;;  %v3340_v62 = vld [vmem:[%s5536_s27 + $0x4] sm:$0xf] }
 0xa08   :  { %v1838_v4 = vsel %vm268_vm6, %v1837_v40, %v1836_v48  ;;  %v1840_v29 = vrot.slane %v4271_v1, 1 }
 0xa09   :  { %v1845_v47 = vsel %vm5527_vm11, %v1838_v4, 0.0 }
 0xa0a   :  { %v3323_v15 = vpop.eup %3322 }
 0xa0b   :  { %v1496_v53 = vmul.f32 %v3323_v15, %v4059_v31  ;;  %v609_v31 = vrot.slane %v3934_v13, 5  ;;  %v1768_v13 = vsel %vm256_vm2, %v1767_v25, %v1766_v21  ;;  %v4254_v15 = vadd.f32 %v4074_v2, %v627_v44 }
 0xa0c   :  { %1807 = vadd.xlane.f32.xlu0 %v1806_v55  ;;  %v1770_v7 = vsel %vm259_vm3, %v1769_v39, %v1768_v13 }
 0xa0d   :  { %3234 = vmatmul.msk.f32.vlgmr.msra.gmra.mxu3 %vm339_vm8, %v1496_v53  ;;  %v625_v54 = vadd.f32 %v4198_v63, %v609_v31  ;;  %v1775_v55 = vrot.slane %v4254_v15, 1  ;;  %v1357_v31 = vrot.slane %v4052_v14, 4 }
 0xa0f   :  { %v4235_v33 = vadd.f32 %v4074_v2, %v625_v54  ;;  %v1373_v36 = vadd.f32 %v4229_v30, %v1357_v31 }
 0xa11   :  { %v1771_v43 = vrot.slane %v4235_v33, 3  ;;  %v4268_v28 = vadd.f32 %v4074_v2, %v1373_v36 }
 0xa13   :  { %v1772_v46 = vsel %vm262_vm4, %v1771_v43, %v1770_v7  ;;  %v1839_v10 = vrot.slane %v4268_v28, 2 }
 0xa14   :  { %1673 = vrot.lane.b32.xlu2 %v4064_v37, %s3632_s21  ;;  %1811 = vadd.xlane.f32.xlu0 %v1810_v27  ;;  %v4248_v37 = vadd.f32 %v4074_v2, %v626_v32 }
 0xa15   :  { %v1841_v16 = vsel %vm250_vm0, %v1840_v29, %v1839_v10 }
 0xa16   :  { %v1773_v52 = vrot.slane %v4248_v37, 2  ;;  %v1849_v11 = vsel %vm1848_vm12, %v1841_v16, 0.0 }
 0xa18   :  { %v1774_v53 = vsel %vm265_vm5, %v1773_v52, %v1772_v46 }
 0xa19   :  { %v1776_v59 = vsel %vm268_vm6, %v1775_v55, %v1774_v53 }
 0xa1a   :  { %v1778_v0 = vsel %vm270_vm7, %v1776_v59, 0.0 }
 0xa1b   :  { %v1562_v14 = vpop.permute.xlu1 %1561 }
 0xa1c   :  { %1846 = vadd.xlane.f32.xlu0 %v1845_v47  ;;  %1582 = vmatpush.msra.mxu1 %v1562_v14 }
 0xa24   :  { %1779 = vadd.xlane.f32.xlu0 %v1778_v0 }
 0xa3d   :  { %1850 = vadd.xlane.f32.xlu2 %v1849_v11 }
 0xa6f   :  { %v1557_v54 = vpop.xlane.xlu2 %1556 }
 0xa70   :  { %3324 = vrcp.f32 %v1557_v54 }
 0xa76   :  { %v3325_v21 = vpop.eup %3324 }
 0xa77   :  { %v1559_v23 = vmul.f32 %v3325_v21, %v4099_v61  ;;  %v1670_v24 = vpop.xlane.xlu0 %1669  ;;  %v1674_v25 = vpop.permute.xlu2 %1673 }
 0xa78   :  { %3326 = vrcp.f32 %v1670_v24  ;;  %1694 = vmatpush.msrb.mxu1 %v1674_v25 }
 0xa79   :  { %3237 = vmatmul.msk.f32.vlgmr.msra.gmra.mxu1 %vm339_vm8, %v1559_v23 }
 0xa7e   :  { %v3327_v27 = vpop.eup %3326 }
 0xa7f   :  { %v1672_v6 = vmul.f32 %v3327_v27, %v4120_v18 }
 0xa81   :  { %3242 = vmatmul.msk.f32.vlgmr.msrb.gmra.mxu1 %vm339_vm8, %v1672_v6 }
 0xa90   :  { %v1517_v32 = vpop.f32.mrf.mxu3 }
 0xa91   :  { %3239 = vmatmul.msk.f32.vlgmr.msrb.gmra.mxu3 %vm339_vm8, %v1517_v32 }
 0xaf6   :  { %v1584_v13 = vpop.f32.mrf.mxu1 }
 0xaf7   :  { %3238 = vmatmul.msk.f32.vlgmr.msra.gmra.mxu2 %vm339_vm8, %v1584_v13 }
 0xafe   :  { %v1696_v48 = vpop.f32.mrf.mxu1 }
 0xaff   :  { %3243 = vmatmul.msk.f32.vlgmr.msrb.gmra.mxu2 %vm339_vm8, %v1696_v48  ;;  %vm5528_vm8 = vcmask 1045504  }
 0xb14   :  { %v1630_v39 = vpop.f32.mrf.mxu3 }
 0xb7a   :  { %v1607_v61 = vpop.f32.mrf.mxu2 }
 0xb7b   :  { %v1631_v40 = vadd.f32 %v1630_v39, %v1607_v61 }
 0xb82   :  { %v1719_v44 = vpop.f32.mrf.mxu2 }
 0xb83   :  { %v1722_v7 = vadd.f32 %v1719_v44, %v1631_v40 }
 0xb85   :  { %v1728_v4 = vrot.slane %v1722_v7, 2  ;;  %v1729_v43 = vrot.slane %v1722_v7, 3  ;;  %v1730_v46 = vrot.slane %v1722_v7, 4  ;;  %v1724_v18 = vrot.slane %v1722_v7, 5 }
 0xb86   :  { %v1725_v47 = vrot.slane %v1722_v7, 6  ;;  %v1726_v52 = vrot.slane %v1722_v7, 7  ;;  %v1727_v53 = vrot.slane %v1722_v7, 1  ;;  %v1742_v55 = vadd.f32 %v4167_v8, %v1722_v7  ;;  %v3341_v8 = vld [vmem:[%s5536_s27 + $0x8] sm:$0xf] }
 0xb87   :  { %v1744_v59 = vadd.f32 %v4198_v63, %v1728_v4  ;;  %v1745_v0 = vadd.f32 %v4229_v30, %v1729_v43  ;;  %v1746_v31 = vadd.f32 %v4244_v42, %v1730_v46  ;;  %v1739_v36 = vadd.f32 %v3339_v35, %v1724_v18  ;;  %v1808_v43 = vpop.xlane.xlu0 %1807 }
 0xb88   :  { %v1740_v10 = vadd.f32 %v3340_v62, %v1725_v47  ;;  %v1741_v29 = vadd.f32 %v3341_v8, %v1726_v52  ;;  %v1743_v63 = vadd.f32 %v4179_v58, %v1727_v53  ;;  %v4314_v54 = vadd.f32 %v4074_v2, %v1742_v55 }
 0xb89   :  { %v4299_v30 = vadd.f32 %v4074_v2, %v1744_v59  ;;  %v4302_v42 = vadd.f32 %v4074_v2, %v1745_v0  ;;  %v4305_v16 = vadd.f32 %v4074_v2, %v1746_v31  ;;  %v4323_v25 = vadd.f32 %v4074_v2, %v1739_v36  ;;  %v1851_v31 = vpop.xlane.xlu2 %1850 }
 0xb8a   :  { %v4308_v11 = vadd.f32 %v4074_v2, %v1740_v10  ;;  %v4311_v14 = vadd.f32 %v4074_v2, %v1741_v29  ;;  %v4320_v24 = vadd.f32 %v4074_v2, %v1743_v63  ;;  %v1872_v61 = vrot.slane %v4314_v54, 5 }
 0xb8b   :  { %v1876_v58 = vrot.slane %v4299_v30, 3  ;;  %v1877_v21 = vrot.slane %v4302_v42, 2  ;;  %v1879_v23 = vrot.slane %v4305_v16, 1  ;;  %v3634_v18 = vmov 0  }
 0xb8c   :  { %v1868_v27 = vrot.slane %v4308_v11, 7  ;;  %v1870_v6 = vrot.slane %v4311_v14, 6  ;;  %v1874_v2 = vrot.slane %v4320_v24, 4  ;;  %3271 = vset.pattern.permute.xlu0 %v3634_v18  ;;  %3272 = vset.pattern.permute.xlu2 %v3634_v18  ;;  %v3635_v47 = vmov 96.0  }
 0xb8d   :  { %v1878_v32 = vsel %vm250_vm0, %v1877_v21, %v1876_v58  ;;  %3273 = vset.pattern.permute.xlu1 %v3634_v18  ;;  %3328 = vrcp.f32 %v3635_v47  ;;  %v1856_v36 = vrot.slane %v1851_v31, 2  ;;  %v1816_v10 = vrot.slane %v1808_v43, 1 }
 0xb8e   :  { %v1880_v13 = vsel %vm253_vm1, %v1879_v23, %v1878_v32  ;;  %v1869_v48 = vsel %vm259_vm3, %v1868_v27, %v4323_v25 }
 0xb8f   :  { %v1888_v39 = vsel %vm5526_vm13, %v1880_v13, 0.0  ;;  %v1871_v40 = vsel %vm262_vm4, %v1870_v6, %v1869_v48  ;;  %v1812_v46 = vpop.xlane.xlu0 %1811 }
 0xb90   :  { %1889 = vadd.xlane.f32.xlu0 %v1888_v39  ;;  %v1873_v44 = vsel %vm265_vm5, %v1872_v61, %v1871_v40  ;;  %v1817_v35 = vrot.slane %v1812_v46, 1 }
 0xb91   :  { %v1875_v7 = vsel %vm268_vm6, %v1874_v2, %v1873_v44 }
 0xb92   :  { %v1884_v4 = vsel %vm5525_vm14, %v1875_v7, 0.0  ;;  %v1818_v63 = vsel %vm1815_vm15, %v1816_v10, %v1817_v35  ;;  %vm1893_vm14 = vcmask 1044480  }
 0xb93   :  { %1885 = vadd.xlane.f32.xlu1 %v1884_v4  ;;  %v3329_v53 = vpop.eup %3328 }
 0xb94   :  { %v1900_v55 = vmul.f32 96.0, %v3329_v53  ;;  %vm1904_vm13 = vweird.f32 %v3329_v53 }
 0xb96   :  { %v1901_v0 = vsub.f32 1.0, %v1900_v55 }
 0xb97   :  { %v1847_v52 = vpop.xlane.xlu0 %1846 }
 0xb98   :  { %v1902_v62 = vmul.f32 %v3329_v53, %v1901_v0  ;;  %v1855_v8 = vrot.slane %v1847_v52, 2 }
 0xb9a   :  { %v1857_v58 = vsel %vm5528_vm8, %v1855_v8, %v1856_v36  ;;  %v1903_v21 = vadd.f32 %v3329_v53, %v1902_v62 }
 0xb9c   :  { %v4341_v61 = vsel %vm1904_vm13, %v3329_v53, %v1903_v21  ;;  %vm5538_vm13 = vcmask 190464  }
 0xb9d   :  { %5537 = vst [vmem:[#allocation27_spill] sm:$0xff] %v4341_v61 }
 0xb9f   :  { %v1780_v59 = vpop.xlane.xlu0 %1779 }
 0xba0   :  { %v1820_v23 = vadd.f32 %v1818_v63, %v1780_v59 }
 0xba2   :  { %v1859_v13 = vadd.f32 %v1857_v58, %v1820_v23 }
 0xc03   :  { %v1890_v29 = vpop.xlane.xlu0 %1889 }
 0xc04   :  { %v1895_v6 = vrot.slane %v1890_v29, 3 }
 0xc06   :  { %v1886_v27 = vpop.xlane.xlu1 %1885 }
 0xc07   :  { %v1894_v32 = vrot.slane %v1886_v27, 3 }
 0xc09   :  { %v1896_v48 = vsel %vm1893_vm14, %v1894_v32, %v1895_v6 }
 0xc0a   :  { %v1898_v39 = vadd.f32 %v1896_v48, %v1859_v13 }
 0xc0c   :  { %v1906_v40 = vmul.f32 %v4341_v61, %v1898_v39 }
 0xc0e   :  { %1909 = vperm.xlu0 %3271, %v1906_v40  }
 0xc80   :  { %v4344_v2 = vpop.permute.xlu0 %1909 }
 0xc81   :  { %v4347_v44 = vrot.slane %v4344_v2, 6  ;;  %v4350_v7 = vrot.slane %v4344_v2, 1  ;;  %v4353_v4 = vrot.slane %v4344_v2, 2  ;;  %v4356_v43 = vrot.slane %v4344_v2, 3 }
 0xc82   :  { %v4359_v46 = vrot.slane %v4344_v2, 4  ;;  %v4362_v18 = vrot.slane %v4344_v2, 5  ;;  %v4365_v47 = vrot.slane %v4344_v2, 7  ;;  %v4369_v52 = vsub.f32 %v4080_v45, %v4344_v2 }
 0xc83   :  { %v4373_v53 = vsub.f32 %v4174_v57, %v4347_v44  ;;  %v4377_v55 = vsub.f32 %v4085_v49, %v4350_v7  ;;  %v4381_v59 = vsub.f32 %v4093_v56, %v4353_v4  ;;  %v4385_v0 = vsub.f32 %v4107_v9, %v4356_v43 }
 0xc84   :  { %v4389_v45 = vsub.f32 %v4088_v50, %v4365_v47  ;;  %v4393_v57 = vsub.f32 %v4114_v51, %v4359_v46  ;;  %v4397_v49 = vsub.f32 %v4123_v19, %v4362_v18  ;;  %v1978_v56 = vmul.f32 %v4369_v52, %v4369_v52 }
 0xc85   :  { %v1984_v31 = vmul.f32 %v4373_v53, %v4373_v53  ;;  %v1979_v9 = vmul.f32 %v4377_v55, %v4377_v55  ;;  %v1980_v50 = vmul.f32 %v4381_v59, %v4381_v59  ;;  %v1981_v51 = vmul.f32 %v4385_v0, %v4385_v0 }
 0xc86   :  { %v1977_v35 = vmul.f32 %v4389_v45, %v4389_v45  ;;  %v1982_v19 = vmul.f32 %v4393_v57, %v4393_v57  ;;  %v1983_v36 = vmul.f32 %v4397_v49, %v4397_v49  ;;  %v1993_v62 = vrot.slane %v1978_v56, 7 }
 0xc87   :  { %v2005_v10 = vrot.slane %v1984_v31, 1  ;;  %v1995_v8 = vrot.slane %v1979_v9, 6  ;;  %v1997_v29 = vrot.slane %v1980_v50, 5  ;;  %v1999_v63 = vrot.slane %v1981_v51, 4 }
 0xc88   :  { %v1994_v58 = vsel %vm253_vm1, %v1993_v62, %v1977_v35  ;;  %v2001_v21 = vrot.slane %v1982_v19, 3  ;;  %v2003_v23 = vrot.slane %v1983_v36, 2  ;;  %v4418_v27 = vsub.f32 %v4189_v34, %v4344_v2 }
 0xc89   :  { %v2011_v6 = vsel %vm1809_vm10, %v2005_v10, 0.0  ;;  %v1996_v32 = vsel %vm256_vm2, %v1995_v8, %v1994_v58  ;;  %v4424_v13 = vsub.f32 %v4144_v38, %v4350_v7  ;;  %v4428_v48 = vsub.f32 %v4158_v41, %v4353_v4 }
 0xc8a   :  { %2012 = vadd.xlane.f32.xlu1 %v2011_v6  ;;  %v1998_v39 = vsel %vm259_vm3, %v1997_v29, %v1996_v32  ;;  %v4433_v40 = vsub.f32 %v4202_v12, %v4356_v43  ;;  %v4437_v34 = vsub.f32 %v4215_v20, %v4359_v46  ;;  %v4441_v56 = vsub.f32 %v4235_v33, %v4362_v18 }
 0xc8b   :  { %v2000_v38 = vsel %vm262_vm4, %v1999_v63, %v1998_v39  ;;  %v4446_v41 = vsub.f32 %v4248_v37, %v4347_v44  ;;  %v4450_v31 = vsub.f32 %v4254_v15, %v4365_v47  ;;  %v1934_v12 = vmul.f32 %v4418_v27, %v4418_v27 }
 0xc8c   :  { %v2002_v20 = vsel %vm265_vm5, %v2001_v21, %v2000_v38  ;;  %v1935_v9 = vmul.f32 %v4424_v13, %v4424_v13  ;;  %v1936_v33 = vmul.f32 %v4428_v48, %v4428_v48  ;;  %v1937_v50 = vmul.f32 %v4433_v40, %v4433_v40 }
 0xc8d   :  { %v2004_v37 = vsel %vm268_vm6, %v2003_v23, %v2002_v20  ;;  %v1938_v15 = vmul.f32 %v4437_v34, %v4437_v34  ;;  %v1939_v51 = vmul.f32 %v4441_v56, %v4441_v56  ;;  %v1940_v35 = vmul.f32 %v4446_v41, %v4446_v41 }
 0xc8e   :  { %v2008_v19 = vsel %vm1805_vm9, %v2004_v37, 0.0  ;;  %v1941_v36 = vmul.f32 %v4450_v31, %v4450_v31  ;;  %v1950_v62 = vrot.slane %v1935_v9, 7  ;;  %v1952_v10 = vrot.slane %v1936_v33, 6 }
 0xc8f   :  { %2009 = vadd.xlane.f32.xlu2 %v2008_v19  ;;  %v1954_v8 = vrot.slane %v1937_v50, 5  ;;  %v1956_v29 = vrot.slane %v1938_v15, 4  ;;  %v1958_v63 = vrot.slane %v1939_v51, 3  ;;  %v1960_v58 = vrot.slane %v1940_v35, 2 }
 0xc90   :  { %v1951_v21 = vsel %vm250_vm0, %v1950_v62, %v1934_v12  ;;  %v1962_v23 = vrot.slane %v1941_v36, 1  ;;  %v4474_v6 = vsub.f32 %v4268_v28, %v4359_v46  ;;  %v4478_v32 = vsub.f32 %v4271_v1, %v4362_v18 }
 0xc91   :  { %v1953_v39 = vsel %vm253_vm1, %v1952_v10, %v1951_v21  ;;  %v4483_v38 = vsub.f32 %v4162_v5, %v4347_v44  ;;  %v4487_v20 = vsub.f32 %v4134_v26, %v4365_v47  ;;  %v4491_v12 = vsub.f32 %v4154_v17, %v4344_v2 }
 0xc92   :  { %v1955_v28 = vsel %vm256_vm2, %v1954_v8, %v1953_v39  ;;  %v2035_v1 = vmul.f32 %v4474_v6, %v4474_v6  ;;  %v2036_v9 = vmul.f32 %v4478_v32, %v4478_v32  ;;  %v4500_v5 = vsub.f32 %v4183_v60, %v4350_v7 }
 0xc93   :  { %v1957_v33 = vsel %vm259_vm3, %v1956_v29, %v1955_v28  ;;  %v4505_v26 = vsub.f32 %v4208_v3, %v4353_v4  ;;  %v4509_v17 = vsub.f32 %v4219_v22, %v4356_v43  ;;  %v2029_v50 = vmul.f32 %v4483_v38, %v4483_v38 }
 0xc94   :  { %v1959_v37 = vsel %vm262_vm4, %v1958_v63, %v1957_v33  ;;  %v2055_v15 = vrot.slane %v2035_v1, 2  ;;  %v2056_v51 = vrot.slane %v2036_v9, 1  ;;  %v2030_v60 = vmul.f32 %v4487_v20, %v4487_v20 }
 0xc95   :  { %v1961_v35 = vsel %vm265_vm5, %v1960_v58, %v1959_v37  ;;  %v2031_v3 = vmul.f32 %v4491_v12, %v4491_v12  ;;  %v2032_v19 = vmul.f32 %v4500_v5, %v4500_v5  ;;  %v2033_v22 = vmul.f32 %v4505_v26, %v4505_v26 }
 0xc96   :  { %v1963_v36 = vsel %vm268_vm6, %v1962_v23, %v1961_v35  ;;  %v2057_v62 = vsel %vm250_vm0, %v2056_v51, %v2055_v15  ;;  %v2034_v10 = vmul.f32 %v4509_v17, %v4509_v17  ;;  %v2045_v8 = vrot.slane %v2030_v60, 7 }
 0xc97   :  { %v1965_v29 = vsel %vm270_vm7, %v1963_v36, 0.0  ;;  %v2063_v63 = vsel %vm1848_vm12, %v2057_v62, 0.0  ;;  %v2047_v58 = vrot.slane %v2031_v3, 6  ;;  %v2049_v21 = vrot.slane %v2032_v19, 5 }
 0xc98   :  { %1966 = vadd.xlane.f32.xlu0 %v1965_v29  ;;  %2064 = vadd.xlane.f32.xlu1 %v2063_v63  ;;  %v2046_v39 = vsel %vm256_vm2, %v2045_v8, %v2029_v50  ;;  %v2051_v28 = vrot.slane %v2033_v22, 4  ;;  %v2053_v1 = vrot.slane %v2034_v10, 3  ;;  %v4532_v23 = vsub.f32 %v4299_v30, %v4353_v4 }
 0xc99   :  { %v2048_v9 = vsel %vm259_vm3, %v2047_v58, %v2046_v39  ;;  %v4537_v33 = vsub.f32 %v4302_v42, %v4356_v43  ;;  %v4541_v37 = vsub.f32 %v4305_v16, %v4359_v46  ;;  %v4545_v15 = vsub.f32 %v4323_v25, %v4362_v18 }
 0xc9a   :  { %v2050_v50 = vsel %vm262_vm4, %v2049_v21, %v2048_v9  ;;  %v2086_v30 = vmul.f32 %v4532_v23, %v4532_v23  ;;  %v4552_v4 = vsub.f32 %v4308_v11, %v4347_v44  ;;  %v4556_v42 = vsub.f32 %v4311_v14, %v4365_v47 }
 0xc9b   :  { %v2052_v16 = vsel %vm265_vm5, %v2051_v28, %v2050_v50  ;;  %v2087_v43 = vmul.f32 %v4537_v33, %v4537_v33  ;;  %v2088_v25 = vmul.f32 %v4541_v37, %v4541_v37  ;;  %v4565_v46 = vsub.f32 %v4314_v54, %v4344_v2 }
 0xc9c   :  { %v2054_v18 = vsel %vm268_vm6, %v2053_v1, %v2052_v16  ;;  %v2105_v11 = vrot.slane %v2086_v30, 3  ;;  %v4570_v44 = vsub.f32 %v4320_v24, %v4350_v7  ;;  %v2082_v60 = vmul.f32 %v4552_v4, %v4552_v4 }
 0xc9d   :  { %v2060_v14 = vsel %vm5527_vm11, %v2054_v18, 0.0  ;;  %v2106_v47 = vrot.slane %v2087_v43, 2  ;;  %v2108_v51 = vrot.slane %v2088_v25, 1  ;;  %v2083_v35 = vmul.f32 %v4556_v42, %v4556_v42 }
 0xc9e   :  { %2061 = vadd.xlane.f32.xlu2 %v2060_v14  ;;  %v2084_v54 = vmul.f32 %v4565_v46, %v4565_v46  ;;  %v2085_v2 = vmul.f32 %v4570_v44, %v4570_v44  ;;  %v2081_v7 = vmul.f32 %v4545_v15, %v4545_v15  ;;  %v2097_v3 = vrot.slane %v2082_v60, 7 }
 0xc9f   :  { %v2107_v24 = vsel %vm250_vm0, %v2106_v47, %v2105_v11  ;;  %v2099_v22 = vrot.slane %v2083_v35, 6  ;;  %vm5539_vm11 = vcmask 195587  }
 0xca0   :  { %v2109_v19 = vsel %vm253_vm1, %v2108_v51, %v2107_v24  ;;  %v2098_v62 = vsel %vm259_vm3, %v2097_v3, %v2081_v7  ;;  %v2101_v10 = vrot.slane %v2084_v54, 5  ;;  %v2103_v29 = vrot.slane %v2085_v2, 4 }
 0xca1   :  { %v2115_v36 = vsel %vm5538_vm13, %v2109_v19, 0.0  ;;  %v2100_v8 = vsel %vm262_vm4, %v2099_v22, %v2098_v62 }
 0xca2   :  { %2116 = vadd.xlane.f32.xlu1 %v2115_v36  ;;  %v2102_v63 = vsel %vm265_vm5, %v2101_v10, %v2100_v8 }
 0xca3   :  { %v2104_v58 = vsel %vm268_vm6, %v2103_v29, %v2102_v63  ;;  %v229_v63 = vld [vmem:[#allocation14 + $0x10] sm:$0xff] }
 0xca4   :  { %v2112_v21 = vsel %vm5539_vm11, %v2104_v58, 0.0  ;;  %v228_v58 = vld [vmem:[#allocation14 + $0x8] sm:$0xff]  ;;  %2396 = vmatpush.msra.mxu1 %v229_v63  ;;  %2300 = vmatpush.msra.mxu3 %v229_v63 }
 0xca6   :  { %2113 = vadd.xlane.f32.xlu2 %v2112_v21  ;;  %v227_v21 = vld [vmem:[#allocation14] sm:$0xff]  ;;  %2397 = vmatpush.msra.mxu1 %v228_v58 }
 0xca7   :  { %2301 = vmatpush.msra.mxu3 %v228_v58 }
 0xca8   :  { %2398 = vmatpush.msra.mxu1 %v227_v21 }
 0xca9   :  { %2302 = vmatpush.msra.mxu3 %v227_v21 }
 0xcaa   :  { %2580 = vmatpush.msrb.mxu1 %v229_v63 }
 0xcab   :  { %2488 = vmatpush.msrb.mxu3 %v229_v63 }
 0xcac   :  { %2581 = vmatpush.msrb.mxu1 %v228_v58 }
 0xcad   :  { %2489 = vmatpush.msrb.mxu3 %v228_v58 }
 0xcae   :  { %2582 = vmatpush.msrb.mxu1 %v227_v21 }
 0xcaf   :  { %2490 = vmatpush.msrb.mxu3 %v227_v21 }
 0xcfd   :  { %v2013_v39 = vpop.xlane.xlu1 %2012 }
 0xcfe   :  { %v2017_v30 = vrot.slane %v2013_v39, 1  ;;  %v4598_v39 = vld [vmem:[%s5514_s9] sm:$0xf] }
 0xd02   :  { %v2010_v28 = vpop.xlane.xlu2 %2009 }
 0xd03   :  { %v2016_v50 = vrot.slane %v2010_v28, 1  ;;  %v4603_v28 = vld [vmem:[%s5515_s10] sm:$0xf] }
 0xd05   :  { %v2018_v43 = vsel %vm1815_vm15, %v2016_v50, %v2017_v30  ;;  %v2190_v30 = vperm.slane %v4598_v39, 1 }
 0xd0b   :  { %v2065_v1 = vpop.xlane.xlu1 %2064  ;;  %v1967_v25 = vpop.xlane.xlu0 %1966 }
 0xd0c   :  { %v2069_v18 = vrot.slane %v2065_v1, 2  ;;  %v2020_v47 = vadd.f32 %v2018_v43, %v1967_v25  ;;  %v2164_v1 = vperm.slane %v4598_v39, 0  ;;  %v4614_v43 = vperm.slane %v4598_v39, 2 }
 0xd0d   :  { %v4617_v25 = vperm.slane %v4603_v28, 2 }
 0xd11   :  { %v2062_v9 = vpop.xlane.xlu2 %2061 }
 0xd12   :  { %v2068_v16 = vrot.slane %v2062_v9, 2  ;;  %v2173_v9 = vperm.slane %v4603_v28, 0 }
 0xd14   :  { %v2070_v14 = vsel %vm5528_vm8, %v2068_v16, %v2069_v18  ;;  %v4611_v16 = vperm.slane %v4603_v28, 1 }
 0xd15   :  { %v2117_v11 = vpop.xlane.xlu1 %2116  ;;  %v2072_v54 = vadd.f32 %v2070_v14, %v2020_v47 }
 0xd16   :  { %v2121_v60 = vrot.slane %v2117_v11, 3 }
 0xd19   :  { %v2114_v51 = vpop.xlane.xlu2 %2113 }
 0xd1a   :  { %v2120_v35 = vrot.slane %v2114_v51, 3 }
 0xd1c   :  { %v2122_v2 = vsel %vm1893_vm14, %v2120_v35, %v2121_v60 }
 0xd1d   :  { %v2124_v24 = vadd.f32 %v2122_v2, %v2072_v54 }
 0xd1f   :  { %v2125_v7 = vmul.f32 %v2124_v24, %v4341_v61 }
 0xd21   :  { %v2126_v3 = vadd.f32 1e-05, %v2125_v7 }
 0xd23   :  { %3330 = vrsqrt.f32 %v2126_v3  ;;  %vm2133_vm13 = vweird.f32 %v2126_v3 }
 0xd29   :  { %v3331_v19 = vpop.eup %3330 }
 0xd2a   :  { %v2128_v22 = vmul.f32 %v3331_v19, %v2126_v3  ;;  %vm2134_vm11 = vweird.f32 %v3331_v19 }
 0xd2b   :  { %vm2135_vm8 = vmor %vm2133_vm13, %vm2134_vm11  ;;  %vm5544_vm11 = vcmask 195587   ;;  %vm5545_vm13 = vcmask 195586  }
 0xd2c   :  { %v2129_v36 = vmul.f32 %v3331_v19, %v2128_v22 }
 0xd2e   :  { %v2130_v62 = vmul.f32 0.5, %v2129_v36 }
 0xd30   :  { %v2131_v10 = vsub.f32 1.5, %v2130_v62 }
 0xd32   :  { %v2132_v8 = vmul.f32 %v3331_v19, %v2131_v10 }
 0xd34   :  { %v2136_v29 = vsel %vm2135_vm8, %v3331_v19, %v2132_v8  ;;  %vm2311_vm8 = vcmask 261120  }
 0xd35   :  { %2139 = vperm.xlu2 %3272, %v2136_v29  }
 0xd8f   :  { %v4607_v50 = vpop.permute.xlu2 %2139 }
 0xd90   :  { %v4620_v18 = vrot.slane %v4607_v50, 1  ;;  %v4623_v11 = vrot.slane %v4607_v50, 2  ;;  %v4626_v14 = vrot.slane %v4607_v50, 3  ;;  %v4629_v47 = vrot.slane %v4607_v50, 4 }
 0xd91   :  { %v4632_v51 = vrot.slane %v4607_v50, 5  ;;  %v4635_v60 = vrot.slane %v4607_v50, 6  ;;  %v4638_v35 = vrot.slane %v4607_v50, 7  ;;  %v2156_v54 = vmul.f32 %v4607_v50, %v4418_v27 }
 0xd92   :  { %v2157_v2 = vmul.f32 %v4620_v18, %v4424_v13  ;;  %v2158_v24 = vmul.f32 %v4623_v11, %v4428_v48  ;;  %v2159_v7 = vmul.f32 %v4626_v14, %v4433_v40  ;;  %v2160_v3 = vmul.f32 %v4629_v47, %v4437_v34 }
 0xd93   :  { %v2161_v19 = vmul.f32 %v4632_v51, %v4441_v56  ;;  %v2162_v22 = vmul.f32 %v4635_v60, %v4446_v41  ;;  %v2163_v27 = vmul.f32 %v4638_v35, %v4450_v31  ;;  %v2165_v36 = vmul.f32 %v2164_v1, %v2156_v54 }
 0xd94   :  { %v2166_v13 = vmul.f32 %v2164_v1, %v2157_v2  ;;  %v2167_v62 = vmul.f32 %v2164_v1, %v2158_v24  ;;  %v2168_v10 = vmul.f32 %v2164_v1, %v2159_v7  ;;  %v2169_v48 = vmul.f32 %v2164_v1, %v2160_v3 }
 0xd95   :  { %v2170_v8 = vmul.f32 %v2164_v1, %v2161_v19  ;;  %v2171_v29 = vmul.f32 %v2164_v1, %v2162_v22  ;;  %v2172_v40 = vmul.f32 %v2164_v1, %v2163_v27  ;;  %v4656_v63 = vadd.f32 %v2173_v9, %v2165_v36 }
 0xd96   :  { %v4658_v34 = vadd.f32 %v2173_v9, %v2166_v13  ;;  %v4660_v58 = vadd.f32 %v2173_v9, %v2167_v62  ;;  %v4662_v56 = vadd.f32 %v2173_v9, %v2168_v10  ;;  %v4664_v41 = vadd.f32 %v2173_v9, %v2169_v48 }
 0xd97   :  { %v4666_v21 = vadd.f32 %v2173_v9, %v2170_v8  ;;  %v4668_v31 = vadd.f32 %v2173_v9, %v2171_v29  ;;  %v4670_v54 = vadd.f32 %v2173_v9, %v2172_v40  ;;  %v2182_v2 = vmul.f32 %v4638_v35, %v4389_v45 }
 0xd98   :  { %v2271_v1 = vrot.slane %v4658_v34, 7  ;;  %v2273_v24 = vrot.slane %v4660_v58, 6  ;;  %v2275_v7 = vrot.slane %v4662_v56, 5  ;;  %v2277_v3 = vrot.slane %v4664_v41, 4 }
 0xd99   :  { %5540 = vst [vmem:[#allocation28_spill] sm:$0xff] %v4668_v31  ;;  %v2279_v19 = vrot.slane %v4666_v21, 3  ;;  %v2281_v22 = vrot.slane %v4668_v31, 2  ;;  %v2283_v27 = vrot.slane %v4670_v54, 1  ;;  %v2183_v9 = vmul.f32 %v4607_v50, %v4369_v52 }
 0xd9a   :  { %5541 = vst [vmem:[#allocation29_spill] sm:$0xff] %v4670_v54  ;;  %v2272_v45 = vsel %vm250_vm0, %v2271_v1, %v4656_v63  ;;  %v2184_v36 = vmul.f32 %v4620_v18, %v4377_v55  ;;  %v2185_v13 = vmul.f32 %v4623_v11, %v4381_v59  ;;  %v2186_v62 = vmul.f32 %v4626_v14, %v4385_v0 }
 0xd9b   :  { %v2274_v10 = vsel %vm253_vm1, %v2273_v24, %v2272_v45  ;;  %v2187_v48 = vmul.f32 %v4629_v47, %v4393_v57  ;;  %v2188_v52 = vmul.f32 %v4632_v51, %v4397_v49  ;;  %v2189_v8 = vmul.f32 %v4635_v60, %v4373_v53  ;;  %v4707_v53 = vld [vmem:[%s5518_s13 + $0x18] sm:$0xff]  ;;  %v4712_v49 = vld [vmem:[%s5518_s13 + $0x10] sm:$0xff] }
 0xd9c   :  { %v2276_v29 = vsel %vm256_vm2, %v2275_v7, %v2274_v10  ;;  %v2191_v55 = vmul.f32 %v2190_v30, %v2182_v2  ;;  %v2192_v40 = vmul.f32 %v2190_v30, %v2183_v9  ;;  %v2193_v1 = vmul.f32 %v2190_v30, %v2184_v36  ;;  %2419 = vmatpush.msra.mxu2 %v4707_v53 }
 0xd9d   :  { %v2278_v59 = vsel %vm259_vm3, %v2277_v3, %v2276_v29  ;;  %v2194_v61 = vmul.f32 %v2190_v30, %v2185_v13  ;;  %v2195_v0 = vmul.f32 %v2190_v30, %v2186_v62  ;;  %v2196_v54 = vmul.f32 %v2190_v30, %v2187_v48  ;;  %2327 = vmatpush.msra.mxu0 %v4707_v53 }
 0xd9e   :  { %v2280_v24 = vsel %vm262_vm4, %v2279_v19, %v2278_v59  ;;  %v2197_v45 = vmul.f32 %v2190_v30, %v2188_v52  ;;  %v2198_v57 = vmul.f32 %v2190_v30, %v2189_v8  ;;  %v4702_v31 = vadd.f32 %v4611_v16, %v2191_v55  ;;  %2420 = vmatpush.msra.mxu2 %v4712_v49 }
 0xd9f   :  { %v2282_v2 = vsel %vm265_vm5, %v2281_v22, %v2280_v24  ;;  %v4716_v7 = vadd.f32 %v4611_v16, %v2192_v40  ;;  %v4719_v30 = vadd.f32 %v4611_v16, %v2193_v1  ;;  %v4722_v3 = vadd.f32 %v4611_v16, %v2194_v61  ;;  %2328 = vmatpush.msra.mxu0 %v4712_v49 }
 0xda0   :  { %v2284_v19 = vsel %vm268_vm6, %v2283_v27, %v2282_v2  ;;  %v4727_v9 = vadd.f32 %v4611_v16, %v2195_v0  ;;  %v4730_v36 = vadd.f32 %v4611_v16, %v2196_v54  ;;  %v4733_v22 = vadd.f32 %v4611_v16, %v2197_v45 }
 0xda1   :  { %3244 = vmatmul.msk.f32.vlgmr.msra.gmra.mxu3 %vm270_vm7, %v2284_v19  ;;  %v4738_v61 = vadd.f32 %v4611_v16, %v2198_v57  ;;  %v2367_v13 = vrot.slane %v4702_v31, 1  ;;  %v2369_v27 = vrot.slane %v4719_v30, 7  ;;  %v2371_v62 = vrot.slane %v4722_v3, 6 }
 0xda2   :  { %v2373_v54 = vrot.slane %v4727_v9, 5  ;;  %v2375_v10 = vrot.slane %v4730_v36, 4  ;;  %v2377_v48 = vrot.slane %v4733_v22, 3  ;;  %v2208_v52 = vmul.f32 %v4635_v60, %v4483_v38 }
 0xda3   :  { %v2368_v16 = vsel %vm250_vm0, %v4716_v7, %v2367_v13  ;;  %v2379_v8 = vrot.slane %v4738_v61, 2  ;;  %v2209_v29 = vmul.f32 %v4638_v35, %v4487_v20  ;;  %v2210_v55 = vmul.f32 %v4607_v50, %v4491_v12 }
 0xda4   :  { %v2370_v40 = vsel %vm253_vm1, %v2369_v27, %v2368_v16  ;;  %v2211_v1 = vmul.f32 %v4620_v18, %v4500_v5  ;;  %v2212_v38 = vmul.f32 %v4623_v11, %v4505_v26  ;;  %v2213_v59 = vmul.f32 %v4626_v14, %v4509_v17 }
 0xda5   :  { %v2372_v0 = vsel %vm256_vm2, %v2371_v62, %v2370_v40  ;;  %v2214_v24 = vmul.f32 %v4629_v47, %v4474_v6  ;;  %v2215_v20 = vmul.f32 %v4632_v51, %v4478_v32  ;;  %v2217_v12 = vmul.f32 %v4614_v43, %v2208_v52 }
 0xda6   :  { %v2374_v45 = vsel %vm259_vm3, %v2373_v54, %v2372_v0  ;;  %v2218_v5 = vmul.f32 %v4614_v43, %v2209_v29  ;;  %v2219_v57 = vmul.f32 %v4614_v43, %v2210_v55  ;;  %v2220_v26 = vmul.f32 %v4614_v43, %v2211_v1 }
 0xda7   :  { %v2376_v17 = vsel %vm262_vm4, %v2375_v10, %v2374_v45  ;;  %v2221_v2 = vmul.f32 %v4614_v43, %v2212_v38  ;;  %v2222_v19 = vmul.f32 %v4614_v43, %v2213_v59  ;;  %v2223_v6 = vmul.f32 %v4614_v43, %v2214_v24 }
 0xda8   :  { %v2378_v32 = vsel %vm265_vm5, %v2377_v48, %v2376_v17  ;;  %v2224_v13 = vmul.f32 %v4614_v43, %v2215_v20  ;;  %v4781_v27 = vadd.f32 %v4617_v25, %v2217_v12  ;;  %v4784_v62 = vadd.f32 %v4617_v25, %v2218_v5 }
 0xda9   :  { %v2380_v54 = vsel %vm268_vm6, %v2379_v8, %v2378_v32  ;;  %v4788_v10 = vadd.f32 %v4617_v25, %v2220_v26  ;;  %v4791_v52 = vadd.f32 %v4617_v25, %v2221_v2  ;;  %v4795_v48 = vadd.f32 %v4617_v25, %v2219_v57 }
 0xdaa   :  { %3246 = vmatmul.msk.f32.vlgmr.msra.gmra.mxu1 %vm270_vm7, %v2380_v54  ;;  %v4798_v43 = vadd.f32 %v4617_v25, %v2222_v19  ;;  %v2459_v16 = vrot.slane %v4781_v27, 2  ;;  %v2242_v29 = vperm.slane %v4598_v39, 3  ;;  %v4803_v8 = vadd.f32 %v4617_v25, %v2223_v6 }
 0xdab   :  { %v4806_v55 = vadd.f32 %v4617_v25, %v2224_v13  ;;  %v2460_v40 = vrot.slane %v4784_v62, 1  ;;  %v2234_v1 = vmul.f32 %v4632_v51, %v4545_v15  ;;  %v2463_v38 = vrot.slane %v4788_v10, 7 }
 0xdac   :  { %v2465_v59 = vrot.slane %v4791_v52, 6  ;;  %v2467_v0 = vrot.slane %v4798_v43, 5  ;;  %v2235_v39 = vmul.f32 %v4635_v60, %v4552_v4  ;;  %v2236_v25 = vmul.f32 %v4638_v35, %v4556_v42 }
 0xdad   :  { %v2461_v24 = vsel %vm250_vm0, %v2460_v40, %v2459_v16  ;;  %v2237_v20 = vmul.f32 %v4607_v50, %v4565_v46  ;;  %v2238_v15 = vmul.f32 %v4620_v18, %v4570_v44  ;;  %v2239_v12 = vmul.f32 %v4623_v11, %v4532_v23 }
 0xdae   :  { %v2462_v51 = vsel %vm253_vm1, %v4795_v48, %v2461_v24  ;;  %v2240_v4 = vmul.f32 %v4626_v14, %v4537_v33  ;;  %v2241_v60 = vmul.f32 %v4629_v47, %v4541_v37  ;;  %v2243_v35 = vmul.f32 %v2242_v29, %v2234_v1 }
 0xdaf   :  { %v2464_v42 = vsel %vm256_vm2, %v2463_v38, %v2462_v51  ;;  %v2244_v45 = vmul.f32 %v2242_v29, %v2235_v39  ;;  %v2245_v46 = vmul.f32 %v2242_v29, %v2236_v25  ;;  %v2469_v44 = vrot.slane %v4803_v8, 4 }
 0xdb0   :  { %v2466_v50 = vsel %vm259_vm3, %v2465_v59, %v2464_v42  ;;  %v2247_v18 = vmul.f32 %v2242_v29, %v2238_v15  ;;  %v2471_v23 = vrot.slane %v4806_v55, 3  ;;  %v2248_v11 = vmul.f32 %v2242_v29, %v2239_v12  ;;  %v3278_v42 = vld [vmem:[#allocation16] ss:$0 sm:$0xff] }
 0xdb1   :  { %v2468_v5 = vsel %vm262_vm4, %v2467_v0, %v2466_v50  ;;  %v2251_v33 = vperm.slane %v4603_v28, 3  ;;  %v2246_v37 = vmul.f32 %v2242_v29, %v2237_v20  ;;  %v2249_v47 = vmul.f32 %v2242_v29, %v2240_v4  ;;  %v232_v4 = vld [vmem:[%s5518_s13 + $0x8] sm:$0xff] }
 0xdb2   :  { %v2470_v14 = vsel %vm265_vm5, %v2469_v44, %v2468_v5  ;;  %v2250_v57 = vmul.f32 %v2242_v29, %v2241_v60  ;;  %v231_v60 = vld [vmem:[%s5518_s13] sm:$0xff]  ;;  %2421 = vmatpush.msra.mxu2 %v232_v4  ;;  %2329 = vmatpush.msra.mxu0 %v232_v4 }
 0xdb3   :  { %v2472_v26 = vsel %vm268_vm6, %v2471_v23, %v2470_v14  ;;  %v4839_v17 = vadd.f32 %v2251_v33, %v2243_v35  ;;  %v4841_v2 = vadd.f32 %v2251_v33, %v2244_v45  ;;  %v4843_v19 = vadd.f32 %v2251_v33, %v2245_v46  ;;  %v4885_v14 = vld [vmem:[%s5519_s14] ss:$0 sm:$0xff] }
 0xdb4   :  { %3248 = vmatmul.msk.f32.vlgmr.msrb.gmra.mxu3 %vm270_vm7, %v2472_v26  ;;  %v4846_v6 = vadd.f32 %v2251_v33, %v2247_v18  ;;  %v4848_v32 = vadd.f32 %v2251_v33, %v2248_v11  ;;  %v4853_v16 = vadd.f32 %v2251_v33, %v2249_v47  ;;  %v4855_v29 = vadd.f32 %v2251_v33, %v2246_v37 }
 0xdb5   :  { %v2551_v28 = vrot.slane %v4839_v17, 3  ;;  %v2552_v13 = vrot.slane %v4841_v2, 2  ;;  %v2554_v54 = vrot.slane %v4843_v19, 1  ;;  %v4857_v40 = vadd.f32 %v2251_v33, %v2250_v57  ;;  %2422 = vmatpush.msra.mxu2 %v231_v60  ;;  %2330 = vmatpush.msra.mxu0 %v231_v60 }
 0xdb6   :  { %v2557_v59 = vrot.slane %v4846_v6, 7  ;;  %v2559_v39 = vrot.slane %v4848_v32, 6  ;;  %v2561_v25 = vrot.slane %v4853_v16, 5 }
 0xdb7   :  { %v2553_v1 = vsel %vm250_vm0, %v2552_v13, %v2551_v28  ;;  %v2563_v15 = vrot.slane %v4857_v40, 4  ;;  %2603 = vmatpush.msrb.mxu2 %v4707_v53  ;;  %2511 = vmatpush.msrb.mxu0 %v4707_v53 }
 0xdb8   :  { %v2555_v38 = vsel %vm253_vm1, %v2554_v54, %v2553_v1 }
 0xdb9   :  { %v2556_v0 = vsel %vm256_vm2, %v4855_v29, %v2555_v38  ;;  %2604 = vmatpush.msrb.mxu2 %v4712_v49  ;;  %2512 = vmatpush.msrb.mxu0 %v4712_v49 }
 0xdba   :  { %v2558_v24 = vsel %vm259_vm3, %v2557_v59, %v2556_v0 }
 0xdbb   :  { %v2560_v20 = vsel %vm262_vm4, %v2559_v39, %v2558_v24  ;;  %2605 = vmatpush.msrb.mxu2 %v232_v4  ;;  %2513 = vmatpush.msrb.mxu0 %v232_v4 }
 0xdbc   :  { %v2562_v51 = vsel %vm265_vm5, %v2561_v25, %v2560_v20 }
 0xdbd   :  { %v2564_v12 = vsel %vm268_vm6, %v2563_v15, %v2562_v51  ;;  %2606 = vmatpush.msrb.mxu2 %v231_v60  ;;  %2514 = vmatpush.msrb.mxu0 %v231_v60 }
 0xdbe   :  { %3250 = vmatmul.msk.f32.vlgmr.msrb.gmra.mxu1 %vm270_vm7, %v2564_v12 }
 0xe24   :  { %v2304_v35 = vpop.f32.mrf.mxu3 }
 0xe25   :  { %v2305_v45 = vadd.f32 %v3278_v42, %v2304_v35 }
 0xe27   :  { %v2400_v46 = vpop.f32.mrf.mxu1  ;;  %v2307_v50 = vmax.f32 %v2305_v45, 0.0 }
 0xe28   :  { %v2401_v44 = vadd.f32 %v3278_v42, %v2400_v46 }
 0xe29   :  { %3245 = vmatmul.msk.f32.vlgmr.msra.gmra.mxu0 %vm2311_vm8, %v2307_v50 }
 0xe2a   :  { %v2403_v18 = vmax.f32 %v2401_v44, 0.0 }
 0xe2c   :  { %3247 = vmatmul.msk.f32.vlgmr.msra.gmra.mxu2 %vm2311_vm8, %v2403_v18 }
 0xe37   :  { %v2492_v5 = vpop.f32.mrf.mxu3 }
 0xe38   :  { %v2493_v53 = vadd.f32 %v3278_v42, %v2492_v5 }
 0xe3a   :  { %v2495_v23 = vmax.f32 %v2493_v53, 0.0 }
 0xe3b   :  { %v2584_v11 = vpop.f32.mrf.mxu1 }
 0xe3c   :  { %v2585_v33 = vadd.f32 %v3278_v42, %v2584_v11  ;;  %3249 = vmatmul.msk.f32.vlgmr.msrb.gmra.mxu0 %vm2311_vm8, %v2495_v23 }
 0xe3e   :  { %v2587_v49 = vmax.f32 %v2585_v33, 0.0 }
 0xe40   :  { %3251 = vmatmul.msk.f32.vlgmr.msrb.gmra.mxu2 %vm2311_vm8, %v2587_v49  ;;  %vm5546_vm8 = vcmask 190464  }
 0xea6   :  { %v2332_v37 = vpop.f32.mrf.mxu0 }
 0xea7   :  { %v2333_v47 = vadd.f32 %v4885_v14, %v2332_v37 }
 0xea9   :  { %v2336_v57 = vrot.slane %v2333_v47, 1  ;;  %v2337_v26 = vrot.slane %v2333_v47, 2  ;;  %v2338_v13 = vrot.slane %v2333_v47, 3  ;;  %v2339_v54 = vrot.slane %v2333_v47, 4 }
 0xeaa   :  { %v4896_v0 = vadd.f32 %v2333_v47, %v4656_v63  ;;  %v2340_v24 = vrot.slane %v2333_v47, 5  ;;  %v2341_v25 = vrot.slane %v2333_v47, 6 }
 0xeab   :  { %v4889_v28 = vadd.f32 %v2336_v57, %v4658_v34  ;;  %v4892_v1 = vadd.f32 %v2337_v26, %v4660_v58  ;;  %v4900_v20 = vadd.f32 %v2338_v13, %v4662_v56  ;;  %v4903_v34 = vadd.f32 %v2339_v54, %v4664_v41 }
 0xeac   :  { %v4941_v23 = vadd.f32 %v2340_v24, %v4666_v21 }
 0xead   :  { %v2643_v38 = vrot.slane %v4889_v28, 7  ;;  %v2645_v15 = vrot.slane %v4892_v1, 6  ;;  %v2647_v53 = vrot.slane %v4900_v20, 5  ;;  %v2649_v13 = vrot.slane %v4903_v34, 4 }
 0xeaf   :  { %v2424_v59 = vpop.f32.mrf.mxu2  ;;  %v2644_v58 = vsel %vm250_vm0, %v2643_v38, %v4896_v0 }
 0xeb0   :  { %v2425_v39 = vadd.f32 %v4885_v14, %v2424_v59  ;;  %v5542_v59 = vld [vmem:[#allocation28_spill] sm:$0xff] }
 0xeb2   :  { %v2434_v51 = vrot.slane %v2425_v39, 6  ;;  %v2428_v12 = vrot.slane %v2425_v39, 7  ;;  %v2429_v4 = vrot.slane %v2425_v39, 1  ;;  %v2430_v63 = vrot.slane %v2425_v39, 2 }
 0xeb3   :  { %v2431_v60 = vrot.slane %v2425_v39, 3  ;;  %v2432_v42 = vrot.slane %v2425_v39, 4  ;;  %v2433_v35 = vrot.slane %v2425_v39, 5  ;;  %v4909_v45 = vadd.f32 %v2425_v39, %v4716_v7 }
 0xeb4   :  { %v4912_v56 = vadd.f32 %v2434_v51, %v4738_v61  ;;  %v4915_v41 = vadd.f32 %v2428_v12, %v4702_v31  ;;  %v4918_v46 = vadd.f32 %v2429_v4, %v4719_v30  ;;  %v4921_v50 = vadd.f32 %v2430_v63, %v4722_v3  ;;  %v5543_v51 = vld [vmem:[#allocation29_spill] sm:$0xff] }
 0xeb5   :  { %v4924_v44 = vadd.f32 %v2431_v60, %v4727_v9  ;;  %v4927_v18 = vadd.f32 %v2432_v42, %v4730_v36  ;;  %v2670_v7 = vrot.slane %v4909_v45, 7  ;;  %v2646_v61 = vsel %vm253_vm1, %v2645_v15, %v2644_v58 }
 0xeb6   :  { %v2682_v5 = vrot.slane %v4912_v56, 1  ;;  %v2672_v31 = vrot.slane %v4918_v46, 6  ;;  %v2674_v30 = vrot.slane %v4921_v50, 5  ;;  %v4936_v3 = vadd.f32 %v2433_v35, %v4733_v22 }
 0xeb7   :  { %v2671_v9 = vsel %vm253_vm1, %v2670_v7, %v4915_v41  ;;  %v2342_v36 = vrot.slane %v2333_v47, 7  ;;  %v2676_v49 = vrot.slane %v4924_v44, 4  ;;  %v2648_v37 = vsel %vm256_vm2, %v2647_v53, %v2646_v61 }
 0xeb8   :  { %v2688_v11 = vsel %vm1809_vm10, %v2682_v5, 0.0  ;;  %v2673_v33 = vsel %vm256_vm2, %v2672_v31, %v2671_v9  ;;  %v2678_v26 = vrot.slane %v4927_v18, 3  ;;  %v2680_v38 = vrot.slane %v4936_v3, 2 }
 0xeb9   :  { %v2516_v57 = vpop.f32.mrf.mxu0  ;;  %2689 = vadd.xlane.f32.xlu1 %v2688_v11  ;;  %v2675_v22 = vsel %vm259_vm3, %v2674_v30, %v2673_v33  ;;  %v4955_v39 = vadd.f32 %v2341_v25, %v5542_v59  ;;  %v2650_v24 = vsel %vm259_vm3, %v2649_v13, %v2648_v37  ;;  %v4959_v12 = vadd.f32 %v2342_v36, %v5543_v51 }
 0xeba   :  { %v2517_v47 = vadd.f32 %v4885_v14, %v2516_v57  ;;  %v2677_v21 = vsel %vm262_vm4, %v2676_v49, %v2675_v22  ;;  %v2651_v4 = vrot.slane %v4941_v23, 3 }
 0xebb   :  { %v2679_v54 = vsel %vm265_vm5, %v2678_v26, %v2677_v21  ;;  %v2655_v11 = vrot.slane %v4959_v12, 1 }
 0xebc   :  { %v2525_v58 = vrot.slane %v2517_v47, 4  ;;  %v2526_v15 = vrot.slane %v2517_v47, 5  ;;  %v2681_v63 = vsel %vm268_vm6, %v2680_v38, %v2679_v54  ;;  %v2520_v60 = vrot.slane %v2517_v47, 6 }
 0xebd   :  { %v2521_v42 = vrot.slane %v2517_v47, 7  ;;  %v2522_v35 = vrot.slane %v2517_v47, 1  ;;  %v2652_v61 = vsel %vm262_vm4, %v2651_v4, %v2650_v24  ;;  %v2523_v5 = vrot.slane %v2517_v47, 2 }
 0xebe   :  { %v4964_v7 = vadd.f32 %v2525_v58, %v4803_v8  ;;  %v4967_v25 = vadd.f32 %v2526_v15, %v4806_v55  ;;  %v4974_v30 = vadd.f32 %v2517_v47, %v4795_v48  ;;  %v2685_v9 = vsel %vm1805_vm9, %v2681_v63, 0.0 }
 0xebf   :  { %v4971_v31 = vadd.f32 %v2521_v42, %v4784_v62  ;;  %v4977_v53 = vadd.f32 %v2522_v35, %v4788_v10  ;;  %v2653_v55 = vrot.slane %v4955_v39, 2  ;;  %v4985_v62 = vadd.f32 %v2520_v60, %v4781_v27 }
 0xec0   :  { %v2716_v8 = vrot.slane %v4964_v7, 2  ;;  %v2717_v36 = vrot.slane %v4967_v25, 1  ;;  %v2524_v49 = vrot.slane %v2517_v47, 3  ;;  %v2708_v37 = vrot.slane %v4974_v30, 6 }
 0xec1   :  { %2686 = vadd.xlane.f32.xlu1 %v2685_v9  ;;  %v2706_v48 = vrot.slane %v4971_v31, 7  ;;  %v2654_v10 = vsel %vm265_vm5, %v2653_v55, %v2652_v61  ;;  %v4993_v26 = vadd.f32 %v2523_v5, %v4791_v52  ;;  %v2710_v27 = vrot.slane %v4977_v53, 5 }
 0xec2   :  { %v2718_v33 = vsel %vm250_vm0, %v2717_v36, %v2716_v8  ;;  %v2656_v47 = vsel %vm268_vm6, %v2655_v11, %v2654_v10  ;;  %v5003_v52 = vadd.f32 %v2524_v49, %v4798_v43 }
 0xec3   :  { %v2608_v57 = vpop.f32.mrf.mxu2  ;;  %v2724_v22 = vsel %vm1848_vm12, %v2718_v33, 0.0  ;;  %v2707_v13 = vsel %vm256_vm2, %v2706_v48, %v4985_v62  ;;  %v2712_v51 = vrot.slane %v4993_v26, 4  ;;  %v2658_v35 = vsel %vm270_vm7, %v2656_v47, 0.0 }
 0xec4   :  { %v2609_v21 = vadd.f32 %v4885_v14, %v2608_v57  ;;  %2725 = vadd.xlane.f32.xlu2 %v2724_v22  ;;  %v2709_v54 = vsel %vm259_vm3, %v2708_v37, %v2707_v13 }
 0xec5   :  { %v2711_v38 = vsel %vm262_vm4, %v2710_v27, %v2709_v54 }
 0xec6   :  { %v2612_v59 = vrot.slane %v2609_v21, 5  ;;  %v2613_v24 = vrot.slane %v2609_v21, 6  ;;  %v2614_v58 = vrot.slane %v2609_v21, 7  ;;  %v2615_v15 = vrot.slane %v2609_v21, 1 }
 0xec7   :  { %v2616_v4 = vrot.slane %v2609_v21, 2  ;;  %v2617_v63 = vrot.slane %v2609_v21, 3  ;;  %v5013_v42 = vadd.f32 %v2609_v21, %v4855_v29  ;;  %v2713_v43 = vsel %vm265_vm5, %v2712_v51, %v2711_v38 }
 0xec8   :  { %v5007_v14 = vadd.f32 %v2613_v24, %v4841_v2  ;;  %v5010_v60 = vadd.f32 %v2614_v58, %v4843_v19  ;;  %v5017_v61 = vadd.f32 %v2615_v15, %v4846_v6  ;;  %v2618_v5 = vrot.slane %v2609_v21, 4 }
 0xec9   :  { %2659 = vadd.xlane.f32.xlu1 %v2658_v35  ;;  %v5021_v9 = vadd.f32 %v2612_v59, %v4839_v17  ;;  %v5026_v8 = vadd.f32 %v2616_v4, %v4848_v32  ;;  %v2714_v29 = vrot.slane %v5003_v52, 3  ;;  %v5030_v36 = vadd.f32 %v2617_v63, %v4853_v16 }
 0xeca   :  { %v2742_v2 = vrot.slane %v5007_v14, 7  ;;  %v2744_v19 = vrot.slane %v5010_v60, 6  ;;  %v2746_v55 = vrot.slane %v5013_v42, 5  ;;  %v2748_v11 = vrot.slane %v5017_v61, 4 }
 0xecb   :  { %v2715_v48 = vsel %vm268_vm6, %v2714_v29, %v2713_v43  ;;  %v5039_v33 = vadd.f32 %v2618_v5, %v4857_v40  ;;  %v2750_v10 = vrot.slane %v5026_v8, 3  ;;  %v2751_v16 = vrot.slane %v5030_v36, 2 }
 0xecc   :  { %v2743_v6 = vsel %vm259_vm3, %v2742_v2, %v5021_v9  ;;  %v2721_v57 = vsel %vm5545_vm13, %v2715_v48, 0.0 }
 0xecd   :  { %v2745_v17 = vsel %vm262_vm4, %v2744_v19, %v2743_v6  ;;  %v2753_v22 = vrot.slane %v5039_v33, 1  ;;  %v2752_v13 = vsel %vm250_vm0, %v2751_v16, %v2750_v10 }
 0xece   :  { %v2747_v32 = vsel %vm265_vm5, %v2746_v55, %v2745_v17  ;;  %v5548_v17 = vld [vmem:[#allocation27_spill] sm:$0xff] }
 0xecf   :  { %v2749_v49 = vsel %vm268_vm6, %v2748_v11, %v2747_v32  ;;  %v2754_v40 = vsel %vm253_vm1, %v2753_v22, %v2752_v13 }
 0xed0   :  { %v2757_v37 = vsel %vm5544_vm11, %v2749_v49, 0.0  ;;  %v2760_v27 = vsel %vm5546_vm8, %v2754_v40, 0.0  ;;  %vm5547_vm11 = vcmask 1045504  }
 0xed1   :  { %2758 = vadd.xlane.f32.xlu0 %v2757_v37  ;;  %2722 = vadd.xlane.f32.xlu1 %v2721_v57 }
 0xed9   :  { %2761 = vadd.xlane.f32.xlu1 %v2760_v27 }
 0xf2c   :  { %v2690_v21 = vpop.xlane.xlu1 %2689 }
 0xf2d   :  { %v2694_v15 = vrot.slane %v2690_v21, 1 }
 0xf34   :  { %v2687_v54 = vpop.xlane.xlu1 %2686 }
 0xf35   :  { %v2693_v24 = vrot.slane %v2687_v54, 1 }
 0xf37   :  { %v2726_v59 = vpop.xlane.xlu2 %2725  ;;  %v2695_v63 = vsel %vm1815_vm15, %v2693_v24, %v2694_v15 }
 0xf38   :  { %v2730_v51 = vrot.slane %v2726_v59, 2 }
 0xf3c   :  { %v2660_v47 = vpop.xlane.xlu1 %2659 }
 0xf3d   :  { %v2697_v43 = vadd.f32 %v2695_v63, %v2660_v47 }
 0xf44   :  { %v2723_v38 = vpop.xlane.xlu1 %2722  ;;  %v2759_v4 = vpop.xlane.xlu0 %2758 }
 0xf45   :  { %v2729_v58 = vrot.slane %v2723_v38, 2  ;;  %v2765_v2 = vrot.slane %v2759_v4, 3 }
 0xf47   :  { %v2731_v35 = vsel %vm5547_vm11, %v2729_v58, %v2730_v51 }
 0xf48   :  { %v2733_v29 = vadd.f32 %v2731_v35, %v2697_v43 }
 0xf4c   :  { %v2762_v5 = vpop.xlane.xlu1 %2761 }
 0xf4d   :  { %v2766_v19 = vrot.slane %v2762_v5, 3 }
 0xf4f   :  { %v2767_v6 = vsel %vm1893_vm14, %v2765_v2, %v2766_v19 }
 0xf50   :  { %v2769_v55 = vadd.f32 %v2767_v6, %v2733_v29 }
 0xf52   :  { %v2770_v11 = vmul.f32 %v2769_v55, %v5548_v17 }
 0xf54   :  { %2773 = vperm.xlu0 %3271, %v2770_v11  }
 0xfc6   :  { %v5055_v48 = vpop.permute.xlu0 %2773 }
 0xfc7   :  { %v5058_v32 = vrot.slane %v5055_v48, 6  ;;  %v5061_v10 = vrot.slane %v5055_v48, 4  ;;  %v5064_v16 = vrot.slane %v5055_v48, 5  ;;  %v5067_v49 = vrot.slane %v5055_v48, 1 }
 0xfc8   :  { %v5070_v37 = vrot.slane %v5055_v48, 2  ;;  %v5073_v57 = vrot.slane %v5055_v48, 3  ;;  %v5076_v22 = vrot.slane %v5055_v48, 7  ;;  %v5080_v13 = vsub.f32 %v4974_v30, %v5055_v48 }
 0xfc9   :  { %v5084_v40 = vsub.f32 %v4912_v56, %v5058_v32  ;;  %v5088_v27 = vsub.f32 %v4964_v7, %v5061_v10  ;;  %v5092_v21 = vsub.f32 %v4967_v25, %v5064_v16  ;;  %v5096_v54 = vsub.f32 %v4985_v62, %v5058_v32 }
 0xfca   :  { %v5100_v30 = vsub.f32 %v4971_v31, %v5076_v22  ;;  %v5104_v56 = vsub.f32 %v4977_v53, %v5067_v49  ;;  %v5108_v7 = vsub.f32 %v4993_v26, %v5070_v37  ;;  %v5112_v25 = vsub.f32 %v5003_v52, %v5073_v57 }
 0xfcb   :  { %v2848_v62 = vmul.f32 %v5084_v40, %v5084_v40  ;;  %v2899_v47 = vmul.f32 %v5088_v27, %v5088_v27  ;;  %v2900_v31 = vmul.f32 %v5092_v21, %v5092_v21  ;;  %v2893_v53 = vmul.f32 %v5096_v54, %v5096_v54 }
 0xfcc   :  { %v2894_v26 = vmul.f32 %v5100_v30, %v5100_v30  ;;  %v2895_v38 = vmul.f32 %v5080_v13, %v5080_v13  ;;  %v2896_v52 = vmul.f32 %v5104_v56, %v5104_v56  ;;  %v2897_v59 = vmul.f32 %v5108_v7, %v5108_v7 }
 0xfcd   :  { %v2869_v24 = vrot.slane %v2848_v62, 1  ;;  %v2919_v58 = vrot.slane %v2899_v47, 2  ;;  %v2920_v15 = vrot.slane %v2900_v31, 1  ;;  %v2898_v51 = vmul.f32 %v5112_v25, %v5112_v25 }
 0xfce   :  { %v2909_v4 = vrot.slane %v2894_v26, 7  ;;  %v2911_v63 = vrot.slane %v2895_v38, 6  ;;  %v2913_v35 = vrot.slane %v2896_v52, 5  ;;  %v2915_v43 = vrot.slane %v2897_v59, 4 }
 0xfcf   :  { %v2875_v5 = vsel %vm1809_vm10, %v2869_v24, 0.0  ;;  %v2921_v2 = vsel %vm250_vm0, %v2920_v15, %v2919_v58  ;;  %v2917_v19 = vrot.slane %v2898_v51, 3  ;;  %v5136_v29 = vsub.f32 %v4915_v41, %v5076_v22  ;;  %vm5549_vm10 = vmmov %vm5545_vm13 }
 0xfd0   :  { %2876 = vadd.xlane.f32.xlu1 %v2875_v5  ;;  %v2927_v6 = vsel %vm1848_vm12, %v2921_v2, 0.0  ;;  %v2910_v55 = vsel %vm256_vm2, %v2909_v4, %v2893_v53  ;;  %v5142_v11 = vsub.f32 %v4909_v45, %v5055_v48  ;;  %v5146_v62 = vsub.f32 %v4918_v46, %v5067_v49 }
 0xfd1   :  { %2928 = vadd.xlane.f32.xlu2 %v2927_v6  ;;  %v2912_v47 = vsel %vm259_vm3, %v2911_v63, %v2910_v55  ;;  %v5151_v41 = vsub.f32 %v4921_v50, %v5070_v37  ;;  %v5155_v31 = vsub.f32 %v4924_v44, %v5073_v57  ;;  %v5159_v53 = vsub.f32 %v4927_v18, %v5061_v10 }
 0xfd2   :  { %v2914_v45 = vsel %vm262_vm4, %v2913_v35, %v2912_v47  ;;  %v5164_v46 = vsub.f32 %v4936_v3, %v5064_v16  ;;  %v2841_v26 = vmul.f32 %v5136_v29, %v5136_v29  ;;  %v2842_v50 = vmul.f32 %v5142_v11, %v5142_v11 }
 0xfd3   :  { %v2916_v38 = vsel %vm265_vm5, %v2915_v43, %v2914_v45  ;;  %v2843_v44 = vmul.f32 %v5146_v62, %v5146_v62  ;;  %v2844_v18 = vmul.f32 %v5151_v41, %v5151_v41  ;;  %v2845_v52 = vmul.f32 %v5155_v31, %v5155_v31 }
 0xfd4   :  { %v2918_v3 = vsel %vm268_vm6, %v2917_v19, %v2916_v38  ;;  %v2846_v59 = vmul.f32 %v5159_v53, %v5159_v53  ;;  %v2847_v24 = vmul.f32 %v5164_v46, %v5164_v46  ;;  %v2857_v58 = vrot.slane %v2842_v50, 7 }
 0xfd5   :  { %v2924_v15 = vsel %vm5549_vm10, %v2918_v3, 0.0  ;;  %v2859_v51 = vrot.slane %v2843_v44, 6  ;;  %v2861_v4 = vrot.slane %v2844_v18, 5  ;;  %v2863_v35 = vrot.slane %v2845_v52, 4 }
 0xfd6   :  { %2925 = vadd.xlane.f32.xlu0 %v2924_v15  ;;  %v2858_v63 = vsel %vm253_vm1, %v2857_v58, %v2841_v26  ;;  %v2865_v43 = vrot.slane %v2846_v59, 3  ;;  %v5186_v5 = vsub.f32 %v5026_v8, %v5070_v37  ;;  %v2867_v19 = vrot.slane %v2847_v24, 2 }
 0xfd7   :  { %v2860_v2 = vsel %vm256_vm2, %v2859_v51, %v2858_v63  ;;  %v5191_v6 = vsub.f32 %v5030_v36, %v5073_v57  ;;  %v5195_v55 = vsub.f32 %v5039_v33, %v5061_v10  ;;  %v5202_v8 = vsub.f32 %v4889_v28, %v5067_v49 }
 0xfd8   :  { %v2862_v47 = vsel %vm259_vm3, %v2861_v4, %v2860_v2  ;;  %v2950_v45 = vmul.f32 %v5186_v5, %v5186_v5  ;;  %v5206_v26 = vsub.f32 %v4892_v1, %v5070_v37  ;;  %v5215_v38 = vsub.f32 %v4900_v20, %v5073_v57 }
 0xfd9   :  { %v2864_v36 = vsel %vm262_vm4, %v2863_v35, %v2862_v47  ;;  %v2951_v50 = vmul.f32 %v5191_v6, %v5191_v6  ;;  %v2952_v33 = vmul.f32 %v5195_v55, %v5195_v55  ;;  %v5220_v18 = vsub.f32 %v4903_v34, %v5061_v10 }
 0xfda   :  { %v2866_v44 = vsel %vm265_vm5, %v2865_v43, %v2864_v36  ;;  %v2969_v28 = vrot.slane %v2950_v45, 3  ;;  %v5224_v1 = vsub.f32 %v4941_v23, %v5064_v16  ;;  %v5229_v59 = vsub.f32 %v4896_v0, %v5055_v48 }
 0xfdb   :  { %v2868_v37 = vsel %vm268_vm6, %v2867_v19, %v2866_v44  ;;  %v2970_v52 = vrot.slane %v2951_v50, 2  ;;  %v2972_v3 = vrot.slane %v2952_v33, 1  ;;  %v5234_v57 = vsub.f32 %v4955_v39, %v5058_v32 }
 0xfdc   :  { %v2872_v20 = vsel %vm1805_vm9, %v2868_v37, 0.0  ;;  %v5238_v34 = vsub.f32 %v4959_v12, %v5076_v22  ;;  %v2799_v23 = vmul.f32 %v5202_v8, %v5202_v8  ;;  %v2800_v0 = vmul.f32 %v5206_v26, %v5206_v26  ;;  %vm5550_vm9 = vmmov %vm5546_vm8 }
 0xfdd   :  { %2873 = vadd.xlane.f32.xlu1 %v2872_v20  ;;  %v2971_v10 = vsel %vm250_vm0, %v2970_v52, %v2969_v28  ;;  %v2801_v24 = vmul.f32 %v5215_v38, %v5215_v38  ;;  %v2802_v39 = vmul.f32 %v5220_v18, %v5220_v18  ;;  %v2803_v12 = vmul.f32 %v5224_v1, %v5224_v1 }
 0xfde   :  { %v2973_v58 = vsel %vm253_vm1, %v2972_v3, %v2971_v10  ;;  %v2798_v51 = vmul.f32 %v5229_v59, %v5229_v59  ;;  %v2814_v4 = vrot.slane %v2799_v23, 7  ;;  %v2816_v63 = vrot.slane %v2800_v0, 6 }
 0xfdf   :  { %v2979_v15 = vsel %vm5550_vm9, %v2973_v58, 0.0  ;;  %v2804_v35 = vmul.f32 %v5234_v57, %v5234_v57  ;;  %v2805_v43 = vmul.f32 %v5238_v34, %v5238_v34  ;;  %v2818_v2 = vrot.slane %v2801_v24, 5 }
 0xfe0   :  { %2980 = vadd.xlane.f32.xlu2 %v2979_v15  ;;  %v2815_v19 = vsel %vm250_vm0, %v2814_v4, %v2798_v51  ;;  %v5262_v47 = vsub.f32 %v5021_v9, %v5064_v16  ;;  %v5266_v45 = vsub.f32 %v5007_v14, %v5058_v32  ;;  %v5270_v36 = vsub.f32 %v5010_v60, %v5076_v22 }
 0xfe1   :  { %v2817_v50 = vsel %vm253_vm1, %v2816_v63, %v2815_v19  ;;  %v2820_v33 = vrot.slane %v2802_v39, 4  ;;  %v2822_v44 = vrot.slane %v2803_v12, 3  ;;  %v5275_v28 = vsub.f32 %v5013_v42, %v5055_v48  ;;  %vm5552_vm1 = vmmov %vm5547_vm11 }
 0xfe2   :  { %v2819_v37 = vsel %vm256_vm2, %v2818_v2, %v2817_v50  ;;  %v5280_v9 = vsub.f32 %v5017_v61, %v5067_v49  ;;  %v2946_v14 = vmul.f32 %v5266_v45, %v5266_v45  ;;  %v2947_v60 = vmul.f32 %v5270_v36, %v5270_v36 }
 0xfe3   :  { %v2821_v32 = vsel %vm259_vm3, %v2820_v33, %v2819_v37  ;;  %v2824_v16 = vrot.slane %v2804_v35, 2  ;;  %v2826_v22 = vrot.slane %v2805_v43, 1  ;;  %v2948_v42 = vmul.f32 %v5275_v28, %v5275_v28 }
 0xfe4   :  { %v2823_v48 = vsel %vm262_vm4, %v2822_v44, %v2821_v32  ;;  %v2945_v52 = vmul.f32 %v5262_v47, %v5262_v47  ;;  %v2961_v61 = vrot.slane %v2946_v14, 7  ;;  %v2963_v49 = vrot.slane %v2947_v60, 6 }
 0xfe5   :  { %v2825_v3 = vsel %vm265_vm5, %v2824_v16, %v2823_v48  ;;  %v2949_v23 = vmul.f32 %v5280_v9, %v5280_v9  ;;  %v2965_v58 = vrot.slane %v2948_v42, 5  ;;  %vm5551_vm0 = vcmask 195587  }
 0xfe6   :  { %v2827_v20 = vsel %vm268_vm6, %v2826_v22, %v2825_v3  ;;  %v2962_v10 = vsel %vm259_vm3, %v2961_v61, %v2945_v52  ;;  %vm3151_vm12 = vcmask 191488  }
 0xfe7   :  { %v2829_v0 = vsel %vm270_vm7, %v2827_v20, 0.0  ;;  %v2964_v24 = vsel %vm262_vm4, %v2963_v49, %v2962_v10  ;;  %v2967_v12 = vrot.slane %v2949_v23, 4  ;;  %vm3142_vm7 = vcmask 1042432  }
 0xfe8   :  { %2830 = vadd.xlane.f32.xlu1 %v2829_v0  ;;  %v2966_v39 = vsel %vm265_vm5, %v2965_v58, %v2964_v24  ;;  %vm3124_vm5 = vcmask 1040384  }
 0xfe9   :  { %v2968_v15 = vsel %vm268_vm6, %v2967_v12, %v2966_v39  ;;  %v236_v12 = vld [vmem:[%s5520_s15] sm:$0xf]  ;;  %vm3133_vm6 = vcmask 1041408   ;;  %s3636_s15 = smov [#allocation19]  }
 0xfea   :  { %v2976_v51 = vsel %vm5551_vm0, %v2968_v15, 0.0  ;;  %v237_v15 = vld [vmem:[#allocation17] sm:$0xf]  ;;  %s3164_s23 = sshll.u32 %s3636_s15, 4  ;;  %s3165_s23 = int_to_ptr.vmem [resolvable:$true] %s3164_s23 }
 0xff0   :  { %2977 = vadd.xlane.f32.xlu1 %v2976_v51  ;;  %v3028_v51 = vperm.slane %v236_v12, 0 }
0x1043   :  { %v2877_v4 = vpop.xlane.xlu1 %2876 }
0x1044   :  { %v2929_v35 = vpop.xlane.xlu2 %2928  ;;  %v2881_v50 = vrot.slane %v2877_v4, 1  ;;  %v3054_v4 = vperm.slane %v236_v12, 1 }
0x1045   :  { %v2933_v60 = vrot.slane %v2929_v35, 2  ;;  %v5311_v35 = vperm.slane %v236_v12, 2 }
0x1049   :  { %v2926_v19 = vpop.xlane.xlu0 %2925 }
0x104a   :  { %v2932_v33 = vrot.slane %v2926_v19, 2 }
0x104c   :  { %v2934_v22 = vsel %vm5552_vm1, %v2932_v33, %v2933_v60 }
0x1050   :  { %v2874_v63 = vpop.xlane.xlu1 %2873 }
0x1051   :  { %v2880_v2 = vrot.slane %v2874_v63, 1  ;;  %v5309_v63 = vperm.slane %v237_v15, 1 }
0x1053   :  { %v2882_v44 = vsel %vm1815_vm15, %v2880_v2, %v2881_v50  ;;  %v2981_v37 = vpop.xlane.xlu2 %2980  ;;  %v5315_v2 = vperm.slane %v236_v12, 3 }
0x1054   :  { %v2985_v16 = vrot.slane %v2981_v37, 3 }
0x105b   :  { %v2831_v43 = vpop.xlane.xlu1 %2830 }
0x105c   :  { %v2884_v14 = vadd.f32 %v2882_v44, %v2831_v43  ;;  %v5313_v43 = vperm.slane %v237_v15, 2 }
0x105e   :  { %v2936_v48 = vadd.f32 %v2934_v22, %v2884_v14 }
0x1063   :  { %v2978_v32 = vpop.xlane.xlu1 %2977 }
0x1064   :  { %v2984_v42 = vrot.slane %v2978_v32, 3 }
0x1066   :  { %v2986_v52 = vsel %vm1893_vm14, %v2984_v42, %v2985_v16 }
0x1067   :  { %v2988_v61 = vadd.f32 %v2986_v52, %v2936_v48 }
0x1069   :  { %v2989_v49 = vmul.f32 %v2988_v61, %v5548_v17  ;;  %v3037_v17 = vperm.slane %v237_v15, 0 }
0x106b   :  { %v2990_v3 = vadd.f32 1e-05, %v2989_v49 }
0x106d   :  { %3332 = vrsqrt.f32 %v2990_v3  ;;  %vm2997_vm3 = vweird.f32 %v2990_v3 }
0x1073   :  { %v3333_v20 = vpop.eup %3332 }
0x1074   :  { %v2992_v23 = vmul.f32 %v3333_v20, %v2990_v3  ;;  %vm2998_vm2 = vweird.f32 %v3333_v20 }
0x1075   :  { %vm2999_vm4 = vmor %vm2997_vm3, %vm2998_vm2 }
0x1076   :  { %v2993_v10 = vmul.f32 %v3333_v20, %v2992_v23 }
0x1078   :  { %v2994_v0 = vmul.f32 0.5, %v2993_v10  ;;  %v5356_v10 = vperm.slane %v237_v15, 3 }
0x107a   :  { %v2995_v24 = vsub.f32 1.5, %v2994_v0 }
0x107c   :  { %v2996_v58 = vmul.f32 %v3333_v20, %v2995_v24 }
0x107e   :  { %v3000_v39 = vsel %vm2999_vm4, %v3333_v20, %v2996_v58 }
0x107f   :  { %3003 = vperm.xlu1 %3273, %v3000_v39  }
0x10f1   :  { %v5317_v19 = vpop.permute.xlu1 %3003 }
0x10f2   :  { %v5320_v50 = vrot.slane %v5317_v19, 1  ;;  %v5323_v33 = vrot.slane %v5317_v19, 2  ;;  %v5326_v44 = vrot.slane %v5317_v19, 3  ;;  %v5329_v37 = vrot.slane %v5317_v19, 4 }
0x10f3   :  { %v5332_v14 = vrot.slane %v5317_v19, 5  ;;  %v5335_v60 = vrot.slane %v5317_v19, 6  ;;  %v5338_v32 = vrot.slane %v5317_v19, 7  ;;  %v3020_v16 = vmul.f32 %v5317_v19, %v5229_v59 }
0x10f4   :  { %v3021_v22 = vmul.f32 %v5320_v50, %v5202_v8  ;;  %v3022_v42 = vmul.f32 %v5323_v33, %v5206_v26  ;;  %v3023_v48 = vmul.f32 %v5326_v44, %v5215_v38  ;;  %v3024_v52 = vmul.f32 %v5329_v37, %v5220_v18 }
0x10f5   :  { %v3025_v61 = vmul.f32 %v5332_v14, %v5224_v1  ;;  %v3026_v49 = vmul.f32 %v5335_v60, %v5234_v57  ;;  %v3027_v59 = vmul.f32 %v5338_v32, %v5238_v34  ;;  %v3029_v3 = vmul.f32 %v3028_v51, %v3020_v16 }
0x10f6   :  { %v3030_v8 = vmul.f32 %v3028_v51, %v3021_v22  ;;  %v3031_v20 = vmul.f32 %v3028_v51, %v3022_v42  ;;  %v3032_v23 = vmul.f32 %v3028_v51, %v3023_v48  ;;  %v3033_v26 = vmul.f32 %v3028_v51, %v3024_v52 }
0x10f7   :  { %v3034_v38 = vmul.f32 %v3028_v51, %v3025_v61  ;;  %v3035_v0 = vmul.f32 %v3028_v51, %v3026_v49  ;;  %v3036_v24 = vmul.f32 %v3028_v51, %v3027_v59  ;;  %v5358_v18 = vadd.f32 %v3037_v17, %v3029_v3 }
0x10f8   :  { %v5360_v58 = vadd.f32 %v3037_v17, %v3030_v8  ;;  %v5362_v1 = vadd.f32 %v3037_v17, %v3031_v20  ;;  %v5364_v57 = vadd.f32 %v3037_v17, %v3032_v23  ;;  %v5366_v39 = vadd.f32 %v3037_v17, %v3033_v26 }
0x10f9   :  { %v5368_v34 = vadd.f32 %v3037_v17, %v3034_v38  ;;  %v5370_v12 = vadd.f32 %v3037_v17, %v3035_v0  ;;  %v3046_v15 = vmul.f32 %v5338_v32, %v5136_v29  ;;  %v3047_v51 = vmul.f32 %v5317_v19, %v5142_v11 }
0x10fa   :  { %v3048_v16 = vmul.f32 %v5320_v50, %v5146_v62  ;;  %v3049_v22 = vmul.f32 %v5323_v33, %v5151_v41  ;;  %v3050_v42 = vmul.f32 %v5326_v44, %v5155_v31  ;;  %v3051_v48 = vmul.f32 %v5329_v37, %v5159_v53 }
0x10fb   :  { %v3052_v52 = vmul.f32 %v5332_v14, %v5164_v46  ;;  %v3053_v29 = vmul.f32 %v5335_v60, %v5084_v40  ;;  %v3055_v61 = vmul.f32 %v3054_v4, %v3046_v15  ;;  %v3056_v11 = vmul.f32 %v3054_v4, %v3047_v51 }
0x10fc   :  { %v3057_v49 = vmul.f32 %v3054_v4, %v3048_v16  ;;  %v3058_v59 = vmul.f32 %v3054_v4, %v3049_v22  ;;  %v3059_v62 = vmul.f32 %v3054_v4, %v3050_v42  ;;  %v5388_v3 = vadd.f32 %v3037_v17, %v3036_v24 }
0x10fd   :  { %v3060_v41 = vmul.f32 %v3054_v4, %v3051_v48  ;;  %v3061_v8 = vmul.f32 %v3054_v4, %v3052_v52  ;;  %v3062_v20 = vmul.f32 %v3054_v4, %v3053_v29  ;;  %v3064_v31 = vadd.f32 %v5309_v63, %v3055_v61 }
0x10fe   :  { %v3065_v53 = vadd.f32 %v5309_v63, %v3056_v11  ;;  %v3066_v23 = vadd.f32 %v5309_v63, %v3057_v49  ;;  %v3067_v46 = vadd.f32 %v5309_v63, %v3058_v59  ;;  %v3068_v40 = vadd.f32 %v5309_v63, %v3059_v62 }
0x10ff   :  { %v3069_v26 = vadd.f32 %v5309_v63, %v3060_v41  ;;  %v3070_v38 = vadd.f32 %v5309_v63, %v3061_v8  ;;  %v3072_v17 = vmul.f32 %v5335_v60, %v5096_v54  ;;  %v3073_v4 = vmul.f32 %v5338_v32, %v5100_v30 }
0x1100   :  { %v3074_v0 = vmul.f32 %v5317_v19, %v5080_v13  ;;  %v3075_v24 = vmul.f32 %v5320_v50, %v5104_v56  ;;  %v3076_v15 = vmul.f32 %v5323_v33, %v5108_v7  ;;  %v3077_v51 = vmul.f32 %v5326_v44, %v5112_v25 }
0x1101   :  { %v3078_v16 = vmul.f32 %v5329_v37, %v5088_v27  ;;  %v3079_v54 = vmul.f32 %v5332_v14, %v5092_v21  ;;  %v3081_v30 = vmul.f32 %v5311_v35, %v3072_v17  ;;  %v3082_v13 = vmul.f32 %v5311_v35, %v3073_v4 }
0x1102   :  { %v3083_v22 = vmul.f32 %v5311_v35, %v3074_v0  ;;  %v3084_v56 = vmul.f32 %v5311_v35, %v3075_v24  ;;  %v3085_v7 = vmul.f32 %v5311_v35, %v3076_v15  ;;  %v3071_v25 = vadd.f32 %v5309_v63, %v3062_v20 }
0x1103   :  { %v3086_v42 = vmul.f32 %v5311_v35, %v3077_v51  ;;  %v3087_v27 = vmul.f32 %v5311_v35, %v3078_v16  ;;  %v3088_v21 = vmul.f32 %v5311_v35, %v3079_v54  ;;  %v3090_v48 = vadd.f32 %v5313_v43, %v3081_v30 }
0x1104   :  { %v3091_v52 = vadd.f32 %v5313_v43, %v3082_v13  ;;  %v3092_v29 = vadd.f32 %v5313_v43, %v3083_v22  ;;  %v3093_v61 = vadd.f32 %v5313_v43, %v3084_v56  ;;  %v3094_v11 = vadd.f32 %v5313_v43, %v3085_v7 }
0x1105   :  { %v3095_v49 = vadd.f32 %v5313_v43, %v3086_v42  ;;  %v3096_v63 = vadd.f32 %v5313_v43, %v3087_v27  ;;  %v3098_v59 = vmul.f32 %v5332_v14, %v5262_v47  ;;  %v3099_v35 = vmul.f32 %v5335_v60, %v5266_v45 }
0x1106   :  { %v3100_v62 = vmul.f32 %v5338_v32, %v5270_v36  ;;  %v3101_v41 = vmul.f32 %v5317_v19, %v5275_v28  ;;  %v3102_v8 = vmul.f32 %v5320_v50, %v5280_v9  ;;  %v3103_v20 = vmul.f32 %v5323_v33, %v5186_v5 }
0x1107   :  { %v3104_v17 = vmul.f32 %v5326_v44, %v5191_v6  ;;  %v3105_v47 = vmul.f32 %v5329_v37, %v5195_v55  ;;  %v3107_v45 = vmul.f32 %v5315_v2, %v3098_v59  ;;  %v3108_v14 = vmul.f32 %v5315_v2, %v3099_v35 }
0x1108   :  { %v3109_v36 = vmul.f32 %v5315_v2, %v3100_v62  ;;  %v3110_v28 = vmul.f32 %v5315_v2, %v3101_v41  ;;  %v3111_v19 = vmul.f32 %v5315_v2, %v3102_v8  ;;  %v3097_v9 = vadd.f32 %v5313_v43, %v3088_v21 }
0x1109   :  { %v3112_v5 = vmul.f32 %v5315_v2, %v3103_v20  ;;  %v3113_v50 = vmul.f32 %v5315_v2, %v3104_v17  ;;  %v3114_v6 = vmul.f32 %v5315_v2, %v3105_v47  ;;  %v3116_v55 = vadd.f32 %v5356_v10, %v3107_v45 }
0x110a   :  { %v3117_v33 = vadd.f32 %v5356_v10, %v3108_v14  ;;  %v3118_v44 = vadd.f32 %v5356_v10, %v3109_v36  ;;  %v3119_v37 = vadd.f32 %v5356_v10, %v3110_v28  ;;  %v3120_v60 = vadd.f32 %v5356_v10, %v3111_v19 }
0x110b   :  { %v3121_v32 = vadd.f32 %v5356_v10, %v3112_v5  ;;  %v3122_v43 = vadd.f32 %v5356_v10, %v3113_v50  ;;  %v3125_v4 = vsel %vm3124_vm5, %v5358_v18, %v3064_v31  ;;  %v3126_v2 = vsel %vm3124_vm5, %v5360_v58, %v3065_v53 }
0x110c   :  { %v3127_v0 = vsel %vm3124_vm5, %v5362_v1, %v3066_v23  ;;  %v3128_v24 = vsel %vm3124_vm5, %v5364_v57, %v3067_v46  ;;  %v3129_v15 = vsel %vm3124_vm5, %v5366_v39, %v3068_v40  ;;  %v3130_v51 = vsel %vm3124_vm5, %v5368_v34, %v3069_v26 }
0x110d   :  { %v3131_v16 = vsel %vm3124_vm5, %v5370_v12, %v3070_v38  ;;  %v3132_v18 = vsel %vm3124_vm5, %v5388_v3, %v3071_v25  ;;  %v3134_v58 = vsel %vm3133_vm6, %v3125_v4, %v3090_v48  ;;  %v3135_v31 = vsel %vm3133_vm6, %v3126_v2, %v3091_v52 }
0x110e   :  { %v3136_v1 = vsel %vm3133_vm6, %v3127_v0, %v3092_v29  ;;  %v3137_v57 = vsel %vm3133_vm6, %v3128_v24, %v3093_v61  ;;  %v3143_v53 = vsel %vm3142_vm7, %v3134_v58, %v3116_v55  ;;  %v3144_v39 = vsel %vm3142_vm7, %v3135_v31, %v3117_v33 }
0x110f   :  { %v3145_v34 = vsel %vm3142_vm7, %v3136_v1, %v3118_v44  ;;  %v3146_v23 = vsel %vm3142_vm7, %v3137_v57, %v3119_v37  ;;  %3152 = vst.msk [vmem:[#allocation19] sm:$0xf] %vm3151_vm12, %v3143_v53  ;;  %v3138_v12 = vsel %vm3133_vm6, %v3129_v15, %v3094_v11  ;;  %v3139_v3 = vsel %vm3133_vm6, %v3130_v51, %v3095_v49 }
0x1110   :  { %3155 = vst.msk [vmem:[#allocation19 + $0xc] sm:$0xf] %vm3151_vm12, %v3146_v23  ;;  %v3140_v46 = vsel %vm3133_vm6, %v3131_v16, %v3096_v63  ;;  %v3141_v40 = vsel %vm3133_vm6, %v3132_v18, %v3097_v9  ;;  %v3147_v26 = vsel %vm3142_vm7, %v3138_v12, %v3120_v60  ;;  %v3123_v38 = vadd.f32 %v5356_v10, %v3114_v6 }
0x1111   :  { %3153 = vst.msk [vmem:[#allocation19 + $0x4] sm:$0xf] %vm3151_vm12, %v3144_v39  ;;  %v3148_v54 = vsel %vm3142_vm7, %v3139_v3, %v3121_v32  ;;  %v3149_v30 = vsel %vm3142_vm7, %v3140_v46, %v3122_v43 }
0x1112   :  { %3154 = vst.msk [vmem:[#allocation19 + $0x8] sm:$0xf] %vm3151_vm12, %v3145_v34  ;;  %v3150_v13 = vsel %vm3142_vm7, %v3141_v40, %v3123_v38 }
0x1113   :  { %3156 = vst.msk [vmem:[#allocation19 + $0x10] sm:$0xf] %vm3151_vm12, %v3147_v26 }
0x1114   :  { %3157 = vst.msk [vmem:[#allocation19 + $0x14] sm:$0xf] %vm3151_vm12, %v3148_v54 }
0x1115   :  { %3158 = vst.msk [vmem:[#allocation19 + $0x18] sm:$0xf] %vm3151_vm12, %v3149_v30 }
0x1116   :  { %3159 = vst.msk [vmem:[#allocation19 + $0x1c] sm:$0xf] %vm3151_vm12, %v3150_v13 }
0x1117   :  { %3172 = dma.vmem_to_hbm [thread:$0]  %s3165_s23, 512, %s3167_s2, [#allocation4], %s3637_s17, %s3637_s17, %s3638_s18  }
0x1118   :  { %3618 = dma.done.wait [#allocation4], 512  }
0x1119   :  { %3619 = vsyncadd [#allocation4], 4294966784 }
0x111a   :  { %3177 = vsyncpa [#allocation3], 1 }
0x111b   :  { %3178 = vsyncpa [#allocation6], 1 }
0x111c   :  { %3179 = vsyncpa [#allocation9], 1 }
0x111d   :  { %3180 = vsyncpa [#allocation12], 1 }
0x111e   :  { %3181 = vsyncpa [#allocation15], 1 }
0x111f   :  { %3182 = vsyncpa [#allocation18], 1 }
0x1120   :  { %3183 = vsyncpa [#allocation4], 1 }

</bundles_post_ra>
